<compile_context>
chip_gen: v7x
topology: tpu7x:2x2x1
jax: 0.10.0
libtpu: 0.0.40
codegen_flags: <defaults>
</compile_context>

<pallas_src>
import functools
import math

import jax
import jax.numpy as jnp
from jax.experimental import pallas as pl
from jax.experimental.pallas import tpu as pltpu

MAX_TM = 256        # max pixel-rows per tile (multiple of 8)
EPS = 1e-5          # BatchNorm eps (PyTorch default)
FEATURE_SIZE = 4    # p.feature_size in PINet CULane parameters


def _round_up(x, m):
    return (x + m - 1) // m * m


def _tile_rows(M):
    """Adaptive row tile: avoids padding tiny (deep hourglass) activations."""
    TM = min(MAX_TM, _round_up(max(M, 1), 8))
    Mp = _round_up(M, TM)
    return TM, Mp


# ----------------------------------------------------------------------------
# Pallas kernels
# ----------------------------------------------------------------------------
@functools.lru_cache(maxsize=None)
def _matmul_stats_call(Mp, TM, Kp, Np):
    """y = A@B (bf16 in, f32 acc) with fused per-column sum / sum-of-squares."""

    def kernel(a_ref, b_ref, o_ref, sum_ref, ssq_ref):
        y = jnp.dot(a_ref[...], b_ref[...], preferred_element_type=jnp.float32)
        o_ref[...] = y

        @pl.when(pl.program_id(0) == 0)
        def _():
            sum_ref[...] = jnp.zeros_like(sum_ref)
            ssq_ref[...] = jnp.zeros_like(ssq_ref)

        sum_ref[...] += jnp.sum(y, axis=0, keepdims=True)
        ssq_ref[...] += jnp.sum(y * y, axis=0, keepdims=True)

    return pl.pallas_call(
        kernel,
        out_shape=(
            jax.ShapeDtypeStruct((Mp, Np), jnp.float32),
            jax.ShapeDtypeStruct((1, Np), jnp.float32),
            jax.ShapeDtypeStruct((1, Np), jnp.float32),
        ),
        grid_spec=pltpu.PrefetchScalarGridSpec(
            num_scalar_prefetch=0,
            grid=(Mp // TM,),
            in_specs=[
                pl.BlockSpec((TM, Kp), lambda i: (i, 0)),
                pl.BlockSpec((Kp, Np), lambda i: (0, 0)),
            ],
            out_specs=(
                pl.BlockSpec((TM, Np), lambda i: (i, 0)),
                pl.BlockSpec((1, Np), lambda i: (0, 0)),
                pl.BlockSpec((1, Np), lambda i: (0, 0)),
            ),
        ),
        compiler_params=pltpu.CompilerParams(dimension_semantics=("arbitrary",)),
    )


@functools.lru_cache(maxsize=None)
def _matmul_bias_call(Mp, TM, Kp, Np):
    """y = A@B + bias (bf16 in, f32 acc). Used only for the bias-carrying heads."""

    def kernel(a_ref, b_ref, bias_ref, o_ref):
        o_ref[...] = (
            jnp.dot(a_ref[...], b_ref[...], preferred_element_type=jnp.float32)
            + bias_ref[...]
        )

    return pl.pallas_call(
        kernel,
        out_shape=jax.ShapeDtypeStruct((Mp, Np), jnp.float32),
        grid_spec=pltpu.PrefetchScalarGridSpec(
            num_scalar_prefetch=0,
            grid=(Mp // TM,),
            in_specs=[
                pl.BlockSpec((TM, Kp), lambda i: (i, 0)),
                pl.BlockSpec((Kp, Np), lambda i: (0, 0)),
                pl.BlockSpec((1, Np), lambda i: (0, 0)),
            ],
            out_specs=pl.BlockSpec((TM, Np), lambda i: (i, 0)),
        ),
        compiler_params=pltpu.CompilerParams(dimension_semantics=("parallel",)),
    )


@functools.lru_cache(maxsize=None)
def _scale_shift_call(Mp, TM, Np, relu):
    """y = x*scale + shift (per channel), optional ReLU. (BN apply, f32)."""

    def kernel(x_ref, s_ref, t_ref, o_ref):
        y = x_ref[...] * s_ref[...] + t_ref[...]
        if relu:
            y = jnp.maximum(y, 0.0)
        o_ref[...] = y

    return pl.pallas_call(
        kernel,
        out_shape=jax.ShapeDtypeStruct((Mp, Np), jnp.float32),
        grid_spec=pltpu.PrefetchScalarGridSpec(
            num_scalar_prefetch=0,
            grid=(Mp // TM,),
            in_specs=[
                pl.BlockSpec((TM, Np), lambda i: (i, 0)),
                pl.BlockSpec((1, Np), lambda i: (0, 0)),
                pl.BlockSpec((1, Np), lambda i: (0, 0)),
            ],
            out_specs=pl.BlockSpec((TM, Np), lambda i: (i, 0)),
        ),
        compiler_params=pltpu.CompilerParams(dimension_semantics=("parallel",)),
    )


# ----------------------------------------------------------------------------
# Kernel wrappers (padding glue, runs inside jit)
# ----------------------------------------------------------------------------
def matmul_stats(patches, Bp):
    """Conv matmul (no bias) + fused per-column stats. Returns (y, sum, ssq)."""
    M, K = patches.shape
    Kp, Np = Bp.shape
    TM, Mp = _tile_rows(M)
    A = jnp.pad(patches.astype(jnp.bfloat16), ((0, Mp - M), (0, Kp - K)))
    y, s, ss = _matmul_stats_call(Mp, TM, Kp, Np)(A, Bp)
    return y, s[0], ss[0]


def matmul_bias(patches, Bp, bias):
    M, K = patches.shape
    Kp, Np = Bp.shape
    C = bias.shape[0]
    TM, Mp = _tile_rows(M)
    A = jnp.pad(patches.astype(jnp.bfloat16), ((0, Mp - M), (0, Kp - K)))
    bp = jnp.pad(bias.astype(jnp.float32), (0, Np - C)).reshape(1, Np)
    y = _matmul_bias_call(Mp, TM, Kp, Np)(A, Bp, bp)
    return y[:M, :C]


def bn_scale_shift(s, ss, count, gamma, beta):
    """Training-mode BN (batch stats, biased variance) -> per-channel scale/shift."""
    mean = s / count
    var = jnp.maximum(ss / count - mean * mean, 0.0)
    scale = gamma * jax.lax.rsqrt(var + EPS)
    shift = beta - mean * scale
    return scale, shift


def apply_scale_shift(y, scale, shift, M, C, relu=True):
    """y (Mp,Np) f32, scale/shift (C,) -> (M,C) after BN(+ReLU)."""
    Mp, Np = y.shape
    TM, _ = _tile_rows(Mp)
    sp = jnp.pad(scale.astype(jnp.float32), (0, Np - C)).reshape(1, Np)
    tp = jnp.pad(shift.astype(jnp.float32), (0, Np - C)).reshape(1, Np)
    out = _scale_shift_call(Mp, TM, Np, bool(relu))(y, sp, tp)
    return out[:M, :C]


# ----------------------------------------------------------------------------
# Conv building blocks (im2col glue kept in plain JAX)
# ----------------------------------------------------------------------------
# TODO(synk): 3x3 convs still materialize im2col patches in HBM; a halo-block
# direct-conv kernel (9 shifted VMEM matmuls) would remove the 9x patch traffic.
def im2col(x_nhwc, kh, kw, stride, pad):
    x = jnp.pad(x_nhwc, ((0, 0), (pad, pad), (pad, pad), (0, 0))) if pad > 0 else x_nhwc
    N, H, W, C = x.shape
    Ho = (H - kh) // stride + 1
    Wo = (W - kw) // stride + 1
    cols = []
    for i in range(kh):
        for j in range(kw):
            cols.append(
                x[:, i : i + (Ho - 1) * stride + 1 : stride,
                     j : j + (Wo - 1) * stride + 1 : stride, :]
            )
    patches = jnp.stack(cols, axis=3)                      # (N,Ho,Wo,kh*kw,C)
    return patches.reshape(N * Ho * Wo, kh * kw * C), (N, Ho, Wo)


def cbr_forward(p, x, k, stride, pad):
    """Conv (no bias) + BatchNorm(batch stats) + ReLU."""
    patches, (N, Ho, Wo) = im2col(x, k, k, stride, pad)
    C = p["gamma"].shape[0]
    M = patches.shape[0]
    y, s, ss = matmul_stats(patches, p["B"])
    scale, shift = bn_scale_shift(s[:C], ss[:C], M, p["gamma"], p["beta"])
    out = apply_scale_shift(y, scale, shift, M, C, relu=True)
    return out.reshape(N, Ho, Wo, C)


def conv_bias_forward(p, x, k, stride, pad):
    """Conv + bias, no BN / no activation (output heads)."""
    patches, (N, Ho, Wo) = im2col(x, k, k, stride, pad)
    C = p["bias"].shape[0]
    out = matmul_bias(patches, p["B"], p["bias"])
    return out.reshape(N, Ho, Wo, C)


def ctbr_forward(p, x):
    """ConvTranspose2d(3, s=2, p=1, op=1) + BN + ReLU via 4-parity decomposition
    fused into one dense matmul (output channels grouped by output parity)."""
    Nb, H, W, Cin = x.shape
    cout = p["gamma"].shape[0]
    xp = jnp.pad(x, ((0, 0), (0, 1), (0, 1), (0, 0)))
    taps = [xp[:, ti:ti + H, tj:tj + W, :] for ti in (0, 1) for tj in (0, 1)]
    patches = jnp.concatenate(taps, axis=-1).reshape(Nb * H * W, 4 * Cin)
    M = patches.shape[0]
    y, s, ss = matmul_stats(patches, p["B"])
    # BN stats span all 4 parity groups (i.e. all 2H x 2W output pixels).
    s4 = s[:4 * cout].reshape(4, cout).sum(axis=0)
    ss4 = ss[:4 * cout].reshape(4, cout).sum(axis=0)
    scale, shift = bn_scale_shift(s4, ss4, 4 * M, p["gamma"], p["beta"])
    out = apply_scale_shift(y, jnp.tile(scale, 4), jnp.tile(shift, 4),
                            M, 4 * cout, relu=True)
    out = out.reshape(Nb, H, W, 2, 2, cout).transpose(0, 1, 3, 2, 4, 5)
    return out.reshape(Nb, 2 * H, 2 * W, cout)


def maxpool2(x_nhwc):
    N, H, W, C = x_nhwc.shape
    return x_nhwc.reshape(N, H // 2, 2, W // 2, 2, C).max(axis=(2, 4))


# ----------------------------------------------------------------------------
# Parameter construction (deterministic, synthetic). Params are array-only
# pytrees; weight matrices are precomputed in im2col layout, padded, bf16.
# ----------------------------------------------------------------------------
class PRNG:
    def __init__(self, key):
        self.key = key

    def next(self):
        self.key, sub = jax.random.split(self.key)
        return sub


def _conv_matrix(rng, cin, cout, k):
    std = 1.0 / math.sqrt(cin * k * k)
    w = jax.random.normal(rng.next(), (cout, cin, k, k), jnp.float32) * std
    return jnp.transpose(w, (2, 3, 1, 0)).reshape(k * k * cin, cout)


def _pad_bf16(B):
    K, N = B.shape
    Kp, Np = _round_up(K, 128), _round_up(N, 128)
    return jnp.pad(B, ((0, Kp - K), (0, Np - N))).astype(jnp.bfloat16)


def make_cbr(rng, cin, cout, k):
    return {"B": _pad_bf16(_conv_matrix(rng, cin, cout, k)),
            "gamma": jnp.ones((cout,), jnp.float32),
            "beta": jnp.zeros((cout,), jnp.float32)}


def make_cbr_fused(rng, cin, couts, k):
    """Several same-input, same-geometry conv+BN+ReLU branches fused along N."""
    mats = [_conv_matrix(rng, cin, c, k) for c in couts]
    total = sum(couts)
    return {"B": _pad_bf16(jnp.concatenate(mats, axis=1)),
            "gamma": jnp.ones((total,), jnp.float32),
            "beta": jnp.zeros((total,), jnp.float32)}


def make_heads_c2(rng, cin_each, outs):
    """Block-diagonal fusion of the three 1x1 bias head convs (acti=False)."""
    total_in = cin_each * len(outs)
    total_out = sum(outs)
    W = jnp.zeros((total_in, total_out), jnp.float32)
    col = 0
    for idx, o in enumerate(outs):
        W = W.at[idx * cin_each:(idx + 1) * cin_each, col:col + o].set(
            _conv_matrix(rng, cin_each, o, 1))
        col += o
    return {"B": _pad_bf16(W), "bias": jnp.zeros((total_out,), jnp.float32)}


def make_ctbr(rng, cin, cout):
    """ConvTranspose2d(3,s=2,p=1,op=1) weights as a fused 4-parity matrix."""
    std = 1.0 / math.sqrt(cin * 9)
    w = jax.random.normal(rng.next(), (cin, cout, 3, 3), jnp.float32) * std
    Wmat = jnp.zeros((4 * cin, 4 * cout), jnp.float32)
    for ti in (0, 1):
        for tj in (0, 1):
            for dy in (0, 1):
                for dx in (0, 1):
                    ky, kx = 1 + dy - 2 * ti, 1 + dx - 2 * tj
                    if 0 <= ky < 3 and 0 <= kx < 3:
                        t, g = 2 * ti + tj, 2 * dy + dx
                        Wmat = Wmat.at[t * cin:(t + 1) * cin,
                                       g * cout:(g + 1) * cout].set(w[:, :, ky, kx])
    return {"B": _pad_bf16(Wmat),
            "gamma": jnp.ones((cout,), jnp.float32),
            "beta": jnp.zeros((cout,), jnp.float32)}


# --- bottleneck / bottleneck_down / bottleneck_up ---------------------------
def make_bottleneck(rng, cin, cout):
    t = cin // 4 if cin >= 4 else cin
    return {
        "conv1_res": make_cbr_fused(rng, cin, (t, cout), 1),  # conv1 + residual
        "conv2": make_cbr(rng, t, t, 3),
        "conv3": make_cbr(rng, t, cout, 1),
    }


def bottleneck_forward(p, x):
    t = p["conv2"]["gamma"].shape[0]
    fused = cbr_forward(p["conv1_res"], x, 1, 1, 0)   # one matmul for conv1+residual
    r, res = fused[..., :t], fused[..., t:]
    r = cbr_forward(p["conv2"], r, 3, 1, 1)
    r = cbr_forward(p["conv3"], r, 1, 1, 0)
    return r + res


def make_bottleneck_down(rng, cin, cout):
    t = cin // 4 if cin >= 4 else cin
    return {
        "conv1": make_cbr(rng, cin, t, 1),
        "conv2": make_cbr(rng, t, t, 3),
        "conv3": make_cbr(rng, t, cout, 1),
        "residual": make_cbr(rng, cin, cout, 3),
    }


def bottleneck_down_forward(p, x):
    r = cbr_forward(p["conv1"], x, 1, 1, 0)
    r = cbr_forward(p["conv2"], r, 3, 2, 1)
    r = cbr_forward(p["conv3"], r, 1, 1, 0)
    return r + cbr_forward(p["residual"], x, 3, 2, 1)


def make_bottleneck_up(rng, cin, cout):
    t = cin // 4 if cin >= 4 else cin
    return {
        "conv1": make_cbr(rng, cin, t, 1),
        "conv2": make_ctbr(rng, t, t),
        "conv3": make_cbr(rng, t, cout, 1),
        "residual": make_ctbr(rng, cin, cout),
    }


def bottleneck_up_forward(p, x):
    r = cbr_forward(p["conv1"], x, 1, 1, 0)
    r = ctbr_forward(p["conv2"], r)
    r = cbr_forward(p["conv3"], r, 1, 1, 0)
    return r + ctbr_forward(p["residual"], x)


# --- fused Output heads ------------------------------------------------------
def make_outputs(rng, in_size):
    half = in_size // 2
    return {
        "c1": make_cbr_fused(rng, in_size, (half, half, half), 3),   # three 3x3 heads
        "c2": make_heads_c2(rng, half, (1, 2, FEATURE_SIZE)),        # three 1x1 heads
    }


def outputs_forward(p, x):
    h = cbr_forward(p["c1"], x, 3, 1, 1)           # (N,H,W,3*half), one im2col shared
    y = conv_bias_forward(p["c2"], h, 1, 1, 0)     # (N,H,W,1+2+FEATURE_SIZE)
    conf = y[..., 0:1]
    off = y[..., 1:3]
    inst = y[..., 3:3 + FEATURE_SIZE]
    return conf, off, inst


# --- hourglass_same ----------------------------------------------------------
def make_hourglass_same(rng, cin, cout):
    return {
        "down1": make_bottleneck_down(rng, cin, cout),
        "down2": make_bottleneck_down(rng, cout, cout),
        "down3": make_bottleneck_down(rng, cout, cout),
        "down4": make_bottleneck_down(rng, cout, cout),
        "same1": make_bottleneck(rng, cout, cout),
        "same2": make_bottleneck(rng, cout, cout),
        "up1": make_bottleneck_up(rng, cout, cout),
        "up2": make_bottleneck_up(rng, cout, cout),
        "up3": make_bottleneck_up(rng, cout, cout),
        "up4": make_bottleneck_up(rng, cout, cout),
        "residual1": make_bottleneck(rng, cin, cout),
        "residual2": make_bottleneck(rng, cout, cout),
        "residual3": make_bottleneck(rng, cout, cout),
        "residual4": make_bottleneck(rng, cout, cout),
    }


def hourglass_same_forward(p, x):
    o1 = bottleneck_down_forward(p["down1"], x)     # H/2
    o2 = bottleneck_down_forward(p["down2"], o1)    # H/4
    o3 = bottleneck_down_forward(p["down3"], o2)    # H/8
    o4 = bottleneck_down_forward(p["down4"], o3)    # H/16
    o = bottleneck_forward(p["same1"], o4)
    o = bottleneck_forward(p["same2"], o)
    o = bottleneck_up_forward(p["up1"], o) + bottleneck_forward(p["residual4"], o3)
    o = bottleneck_up_forward(p["up2"], o) + bottleneck_forward(p["residual3"], o2)
    o = bottleneck_up_forward(p["up3"], o) + bottleneck_forward(p["residual2"], o1)
    o = bottleneck_up_forward(p["up4"], o) + bottleneck_forward(p["residual1"], x)
    return o


# --- hourglass_block ---------------------------------------------------------
def make_hourglass_block(rng, cin, cout):
    return {
        "layer1": make_hourglass_same(rng, cin, cout),
        "re1": make_bottleneck(rng, cout, cout),
        "re2": make_bottleneck(rng, cout, cout),
        "re3": make_bottleneck(rng, 1, cout),
        "out": make_outputs(rng, cout),
    }


def hourglass_block_forward(p, inputs):
    outputs = hourglass_same_forward(p["layer1"], inputs)
    outputs = bottleneck_forward(p["re1"], outputs)
    out_confidence, out_offset, out_instance = outputs_forward(p["out"], outputs)
    out = out_confidence
    outputs = bottleneck_forward(p["re2"], outputs)
    out = bottleneck_forward(p["re3"], out)
    outputs = outputs + out + inputs                 # input_re = True
    return [out_confidence, out_offset, out_instance], outputs, out_instance


# --- resize_layer ------------------------------------------------------------
def make_resize(rng, cin, cout):
    return {
        "conv": make_cbr(rng, cin, cout // 8, 7),
        "re1": make_bottleneck(rng, cout // 8, cout // 4),
        "re2": make_bottleneck(rng, cout // 4, cout // 2),
        "re3": make_bottleneck(rng, cout // 2, cout),
    }


def resize_forward(p, x):
    x = cbr_forward(p["conv"], x, 7, 2, 3)
    x = bottleneck_forward(p["re1"], x)
    x = maxpool2(x)
    x = bottleneck_forward(p["re2"], x)
    x = maxpool2(x)
    x = bottleneck_forward(p["re3"], x)
    return x


# --- lane_detection_network --------------------------------------------------
def make_network(rng):
    return {
        "resizing": make_resize(rng, 3, 128),
        "layer1": make_hourglass_block(rng, 128, 128),
        "layer2": make_hourglass_block(rng, 128, 128),
        "layer3": make_hourglass_block(rng, 128, 128),
        "layer4": make_hourglass_block(rng, 128, 128),
    }


# jit the big pieces; all four hourglass blocks have identical param pytrees
# (arrays only), so hourglass_block_forward compiles once and is reused 4x.
_resize_jit = jax.jit(resize_forward)
_block_jit = jax.jit(hourglass_block_forward)


def network_forward(params, x_nchw):
    x = jnp.transpose(x_nchw, (0, 2, 3, 1)).astype(jnp.float32)   # NCHW -> NHWC
    out = _resize_jit(params["resizing"], x)
    _r1, out, _f1 = _block_jit(params["layer1"], out)
    _r2, out, _f2 = _block_jit(params["layer2"], out)
    _r3, out, _f3 = _block_jit(params["layer3"], out)
    r4, out, f4 = _block_jit(params["layer4"], out)
    to_nchw = lambda t: jnp.transpose(t, (0, 3, 1, 2))
    return ([[to_nchw(t) for t in r4]], [to_nchw(f4)])


# ----------------------------------------------------------------------------
if __name__ == "__main__":
    key = jax.random.PRNGKey(0)
    pkey, xkey = jax.random.split(key)
    params = make_network(PRNG(pkey))

    # Smallest spatial size the 8x resize + 4-level hourglass supports: 128x128.
    x = jax.random.normal(xkey, (2, 3, 128, 128), jnp.float32)

    results, features = network_forward(params, x)
    results, features = jax.block_until_ready((results, features))

    conf, off, inst = results[0]
    assert conf.shape == (2, 1, 16, 16)
    assert off.shape == (2, 2, 16, 16)
    assert inst.shape == (2, FEATURE_SIZE, 16, 16)
    assert features[0].shape == (2, FEATURE_SIZE, 16, 16)
    print("KERNEL_OK")
</pallas_src>

<mosaic_0001>
module attributes {stable_mosaic.version = 11 : i64} {
  func.func @kernel(%arg0: i32, %arg1: memref<256x256xbf16, #tpu.memory_space<vmem>>, %arg2: memref<256x128xbf16, #tpu.memory_space<vmem>>, %arg3: memref<256x128xf32, #tpu.memory_space<vmem>>, %arg4: memref<1x128xf32, #tpu.memory_space<vmem>>, %arg5: memref<1x128xf32, #tpu.memory_space<vmem>>) attributes {dimension_semantics = [#tpu.dimension_semantics<arbitrary>], iteration_bounds = array<i64: 32>, scalar_prefetch = 0 : i64, scratch_operands = 0 : i64, tpu.core_type = #tpu.core_type<tc>, window_params = [{transform_indices = @transform_0, window_bounds = array<i64: 256, 256>}, {pipeline_mode = #tpu.pipeline_mode<synchronous>, transform_indices = @transform_1, window_bounds = array<i64: 256, 128>}, {transform_indices = @transform_2, window_bounds = array<i64: 256, 128>}, {pipeline_mode = #tpu.pipeline_mode<synchronous>, transform_indices = @transform_3, window_bounds = array<i64: 1, 128>}, {pipeline_mode = #tpu.pipeline_mode<synchronous>, transform_indices = @transform_4, window_bounds = array<i64: 1, 128>}]} {
    %c0 = arith.constant 0 : index
    %c0_0 = arith.constant 0 : index
    %0 = vector.load %arg1[%c0, %c0_0] : memref<256x256xbf16, #tpu.memory_space<vmem>>, vector<256x256xbf16>
    %c0_1 = arith.constant 0 : index
    %c0_2 = arith.constant 0 : index
    %1 = vector.load %arg2[%c0_1, %c0_2] : memref<256x128xbf16, #tpu.memory_space<vmem>>, vector<256x128xbf16>
    %cst = arith.constant dense<0.000000e+00> : vector<256x128xf32>
    %2 = tpu.matmul %0, %1, %cst {dimension_numbers = #tpu.dot_dimension_numbers<[1], [0], [0], [1], [0, 0, 1, 1], [], []>} : vector<256x256xbf16>, vector<256x128xbf16>, vector<256x128xf32> -> vector<256x128xf32>
    %c0_3 = arith.constant 0 : index
    %c0_4 = arith.constant 0 : index
    %3 = vector.load %arg3[%c0_3, %c0_4] : memref<256x128xf32, #tpu.memory_space<vmem>>, vector<256x128xf32>
    tpu.vector_store %arg3[%c0_3, %c0_4], %2 {strides = array<i32>} : memref<256x128xf32, #tpu.memory_space<vmem>>, vector<256x128xf32>,
    %c0_i32 = arith.constant 0 : i32
    %4 = arith.cmpi eq, %arg0, %c0_i32 : i32
    %5 = arith.extui %4 : i1 to i32
    %c0_i32_5 = arith.constant 0 : i32
    %6 = arith.cmpi ne, %5, %c0_i32_5 : i32
    scf.if %6 {
      %cst_16 = arith.constant 0.000000e+00 : f32
      %18 = vector.broadcast %cst_16 : f32 to vector<1x128xf32>
      %c0_17 = arith.constant 0 : index
      %c0_18 = arith.constant 0 : index
      %19 = vector.load %arg4[%c0_17, %c0_18] : memref<1x128xf32, #tpu.memory_space<vmem>>, vector<1x128xf32>
      tpu.vector_store %arg4[%c0_17, %c0_18], %18 {strides = array<i32>} : memref<1x128xf32, #tpu.memory_space<vmem>>, vector<1x128xf32>,
      %cst_19 = arith.constant 0.000000e+00 : f32
      %20 = vector.broadcast %cst_19 : f32 to vector<1x128xf32>
      %c0_20 = arith.constant 0 : index
      %c0_21 = arith.constant 0 : index
      %21 = vector.load %arg5[%c0_20, %c0_21] : memref<1x128xf32, #tpu.memory_space<vmem>>, vector<1x128xf32>
      tpu.vector_store %arg5[%c0_20, %c0_21], %20 {strides = array<i32>} : memref<1x128xf32, #tpu.memory_space<vmem>>, vector<1x128xf32>,
    } else {
    }
    %c0_6 = arith.constant 0 : index
    %c0_7 = arith.constant 0 : index
    %7 = vector.load %arg4[%c0_6, %c0_7] : memref<1x128xf32, #tpu.memory_space<vmem>>, vector<1x128xf32>
    %cst_8 = arith.constant dense<0.000000e+00> : vector<128xf32>
    %8 = vector.multi_reduction <add>, %2, %cst_8 [0] : vector<256x128xf32> to vector<128xf32>
    %9 = vector.shape_cast %8 : vector<128xf32> to vector<1x128xf32>
    %10 = arith.addf %7, %9 : vector<1x128xf32>
    %c0_9 = arith.constant 0 : index
    %c0_10 = arith.constant 0 : index
    %11 = vector.load %arg4[%c0_9, %c0_10] : memref<1x128xf32, #tpu.memory_space<vmem>>, vector<1x128xf32>
    tpu.vector_store %arg4[%c0_9, %c0_10], %10 {strides = array<i32>} : memref<1x128xf32, #tpu.memory_space<vmem>>, vector<1x128xf32>,
    %c0_11 = arith.constant 0 : index
    %c0_12 = arith.constant 0 : index
    %12 = vector.load %arg5[%c0_11, %c0_12] : memref<1x128xf32, #tpu.memory_space<vmem>>, vector<1x128xf32>
    %13 = arith.mulf %2, %2 : vector<256x128xf32>
    %cst_13 = arith.constant dense<0.000000e+00> : vector<128xf32>
    %14 = vector.multi_reduction <add>, %13, %cst_13 [0] : vector<256x128xf32> to vector<128xf32>
    %15 = vector.shape_cast %14 : vector<128xf32> to vector<1x128xf32>
    %16 = arith.addf %12, %15 : vector<1x128xf32>
    %c0_14 = arith.constant 0 : index
    %c0_15 = arith.constant 0 : index
    %17 = vector.load %arg5[%c0_14, %c0_15] : memref<1x128xf32, #tpu.memory_space<vmem>>, vector<1x128xf32>
    tpu.vector_store %arg5[%c0_14, %c0_15], %16 {strides = array<i32>} : memref<1x128xf32, #tpu.memory_space<vmem>>, vector<1x128xf32>,
    return
  }
  func.func @transform_0(%arg0: i32) -> (i32, i32) {
    %c0_i32 = arith.constant 0 : i32
    %c0_i32_0 = arith.constant 0 : i32
    return %arg0, %c0_i32 : i32, i32
  }
  func.func @transform_1(%arg0: i32) -> (i32, i32) {
    %c0_i32 = arith.constant 0 : i32
    %c0_i32_0 = arith.constant 0 : i32
    %c0_i32_1 = arith.constant 0 : i32
    return %c0_i32, %c0_i32_0 : i32, i32
  }
  func.func @transform_2(%arg0: i32) -> (i32, i32) {
    %c0_i32 = arith.constant 0 : i32
    %c0_i32_0 = arith.constant 0 : i32
    return %arg0, %c0_i32 : i32, i32
  }
  func.func @transform_3(%arg0: i32) -> (i32, i32) {
    %c0_i32 = arith.constant 0 : i32
    %c0_i32_0 = arith.constant 0 : i32
    %c0_i32_1 = arith.constant 0 : i32
    return %c0_i32, %c0_i32_0 : i32, i32
  }
  func.func @transform_4(%arg0: i32) -> (i32, i32) {
    %c0_i32 = arith.constant 0 : i32
    %c0_i32_0 = arith.constant 0 : i32
    %c0_i32_1 = arith.constant 0 : i32
    return %c0_i32, %c0_i32_0 : i32, i32
  }
}

module attributes {stable_mosaic.version = 11 : i64} {
  func.func @kernel(%arg0: i32, %arg1: memref<256x128xf32, #tpu.memory_space<vmem>>, %arg2: memref<1x128xf32, #tpu.memory_space<vmem>>, %arg3: memref<1x128xf32, #tpu.memory_space<vmem>>, %arg4: memref<256x128xf32, #tpu.memory_space<vmem>>) attributes {dimension_semantics = [#tpu.dimension_semantics<parallel>], iteration_bounds = array<i64: 32>, scalar_prefetch = 0 : i64, scratch_operands = 0 : i64, tpu.core_type = #tpu.core_type<tc>, window_params = [{transform_indices = @transform_0, window_bounds = array<i64: 256, 128>}, {pipeline_mode = #tpu.pipeline_mode<synchronous>, transform_indices = @transform_1, window_bounds = array<i64: 1, 128>}, {pipeline_mode = #tpu.pipeline_mode<synchronous>, transform_indices = @transform_2, window_bounds = array<i64: 1, 128>}, {transform_indices = @transform_3, window_bounds = array<i64: 256, 128>}]} {
    %c0 = arith.constant 0 : index
    %c0_0 = arith.constant 0 : index
    %0 = vector.load %arg1[%c0, %c0_0] : memref<256x128xf32, #tpu.memory_space<vmem>>, vector<256x128xf32>
    %c0_1 = arith.constant 0 : index
    %c0_2 = arith.constant 0 : index
    %1 = vector.load %arg2[%c0_1, %c0_2] : memref<1x128xf32, #tpu.memory_space<vmem>>, vector<1x128xf32>
    %2 = vector.broadcast %1 : vector<1x128xf32> to vector<256x128xf32>
    %3 = arith.mulf %0, %2 : vector<256x128xf32>
    %c0_3 = arith.constant 0 : index
    %c0_4 = arith.constant 0 : index
    %4 = vector.load %arg3[%c0_3, %c0_4] : memref<1x128xf32, #tpu.memory_space<vmem>>, vector<1x128xf32>
    %5 = vector.broadcast %4 : vector<1x128xf32> to vector<256x128xf32>
    %6 = arith.addf %3, %5 : vector<256x128xf32>
    %cst = arith.constant 0.000000e+00 : f32
    %7 = vector.broadcast %cst : f32 to vector<256x128xf32>
    %8 = arith.maximumf %6, %7 : vector<256x128xf32>
    %c0_5 = arith.constant 0 : index
    %c0_6 = arith.constant 0 : index
    %9 = vector.load %arg4[%c0_5, %c0_6] : memref<256x128xf32, #tpu.memory_space<vmem>>, vector<256x128xf32>
    tpu.vector_store %arg4[%c0_5, %c0_6], %8 {strides = array<i32>} : memref<256x128xf32, #tpu.memory_space<vmem>>, vector<256x128xf32>,
    return
  }
  func.func @transform_0(%arg0: i32) -> (i32, i32) {
    %c0_i32 = arith.constant 0 : i32
    %c0_i32_0 = arith.constant 0 : i32
    return %arg0, %c0_i32 : i32, i32
  }
  func.func @transform_1(%arg0: i32) -> (i32, i32) {
    %c0_i32 = arith.constant 0 : i32
    %c0_i32_0 = arith.constant 0 : i32
    %c0_i32_1 = arith.constant 0 : i32
    return %c0_i32, %c0_i32_0 : i32, i32
  }
  func.func @transform_2(%arg0: i32) -> (i32, i32) {
    %c0_i32 = arith.constant 0 : i32
    %c0_i32_0 = arith.constant 0 : i32
    %c0_i32_1 = arith.constant 0 : i32
    return %c0_i32, %c0_i32_0 : i32, i32
  }
  func.func @transform_3(%arg0: i32) -> (i32, i32) {
    %c0_i32 = arith.constant 0 : i32
    %c0_i32_0 = arith.constant 0 : i32
    return %arg0, %c0_i32 : i32, i32
  }
}

module attributes {stable_mosaic.version = 11 : i64} {
  func.func @kernel(%arg0: i32, %arg1: memref<256x128xbf16, #tpu.memory_space<vmem>>, %arg2: memref<128x128xbf16, #tpu.memory_space<vmem>>, %arg3: memref<256x128xf32, #tpu.memory_space<vmem>>, %arg4: memref<1x128xf32, #tpu.memory_space<vmem>>, %arg5: memref<1x128xf32, #tpu.memory_space<vmem>>) attributes {dimension_semantics = [#tpu.dimension_semantics<arbitrary>], iteration_bounds = array<i64: 32>, scalar_prefetch = 0 : i64, scratch_operands = 0 : i64, tpu.core_type = #tpu.core_type<tc>, window_params = [{transform_indices = @transform_0, window_bounds = array<i64: 256, 128>}, {pipeline_mode = #tpu.pipeline_mode<synchronous>, transform_indices = @transform_1, window_bounds = array<i64: 128, 128>}, {transform_indices = @transform_2, window_bounds = array<i64: 256, 128>}, {pipeline_mode = #tpu.pipeline_mode<synchronous>, transform_indices = @transform_3, window_bounds = array<i64: 1, 128>}, {pipeline_mode = #tpu.pipeline_mode<synchronous>, transform_indices = @transform_4, window_bounds = array<i64: 1, 128>}]} {
    %c0 = arith.constant 0 : index
    %c0_0 = arith.constant 0 : index
    %0 = vector.load %arg1[%c0, %c0_0] : memref<256x128xbf16, #tpu.memory_space<vmem>>, vector<256x128xbf16>
    %c0_1 = arith.constant 0 : index
    %c0_2 = arith.constant 0 : index
    %1 = vector.load %arg2[%c0_1, %c0_2] : memref<128x128xbf16, #tpu.memory_space<vmem>>, vector<128x128xbf16>
    %cst = arith.constant dense<0.000000e+00> : vector<256x128xf32>
    %2 = tpu.matmul %0, %1, %cst {dimension_numbers = #tpu.dot_dimension_numbers<[1], [0], [0], [1], [0, 0, 1, 1], [], []>} : vector<256x128xbf16>, vector<128x128xbf16>, vector<256x128xf32> -> vector<256x128xf32>
    %c0_3 = arith.constant 0 : index
    %c0_4 = arith.constant 0 : index
    %3 = vector.load %arg3[%c0_3, %c0_4] : memref<256x128xf32, #tpu.memory_space<vmem>>, vector<256x128xf32>
    tpu.vector_store %arg3[%c0_3, %c0_4], %2 {strides = array<i32>} : memref<256x128xf32, #tpu.memory_space<vmem>>, vector<256x128xf32>,
    %c0_i32 = arith.constant 0 : i32
    %4 = arith.cmpi eq, %arg0, %c0_i32 : i32
    %5 = arith.extui %4 : i1 to i32
    %c0_i32_5 = arith.constant 0 : i32
    %6 = arith.cmpi ne, %5, %c0_i32_5 : i32
    scf.if %6 {
      %cst_16 = arith.constant 0.000000e+00 : f32
      %18 = vector.broadcast %cst_16 : f32 to vector<1x128xf32>
      %c0_17 = arith.constant 0 : index
      %c0_18 = arith.constant 0 : index
      %19 = vector.load %arg4[%c0_17, %c0_18] : memref<1x128xf32, #tpu.memory_space<vmem>>, vector<1x128xf32>
      tpu.vector_store %arg4[%c0_17, %c0_18], %18 {strides = array<i32>} : memref<1x128xf32, #tpu.memory_space<vmem>>, vector<1x128xf32>,
      %cst_19 = arith.constant 0.000000e+00 : f32
      %20 = vector.broadcast %cst_19 : f32 to vector<1x128xf32>
      %c0_20 = arith.constant 0 : index
      %c0_21 = arith.constant 0 : index
      %21 = vector.load %arg5[%c0_20, %c0_21] : memref<1x128xf32, #tpu.memory_space<vmem>>, vector<1x128xf32>
      tpu.vector_store %arg5[%c0_20, %c0_21], %20 {strides = array<i32>} : memref<1x128xf32, #tpu.memory_space<vmem>>, vector<1x128xf32>,
    } else {
    }
    %c0_6 = arith.constant 0 : index
    %c0_7 = arith.constant 0 : index
    %7 = vector.load %arg4[%c0_6, %c0_7] : memref<1x128xf32, #tpu.memory_space<vmem>>, vector<1x128xf32>
    %cst_8 = arith.constant dense<0.000000e+00> : vector<128xf32>
    %8 = vector.multi_reduction <add>, %2, %cst_8 [0] : vector<256x128xf32> to vector<128xf32>
    %9 = vector.shape_cast %8 : vector<128xf32> to vector<1x128xf32>
    %10 = arith.addf %7, %9 : vector<1x128xf32>
    %c0_9 = arith.constant 0 : index
    %c0_10 = arith.constant 0 : index
    %11 = vector.load %arg4[%c0_9, %c0_10] : memref<1x128xf32, #tpu.memory_space<vmem>>, vector<1x128xf32>
    tpu.vector_store %arg4[%c0_9, %c0_10], %10 {strides = array<i32>} : memref<1x128xf32, #tpu.memory_space<vmem>>, vector<1x128xf32>,
    %c0_11 = arith.constant 0 : index
    %c0_12 = arith.constant 0 : index
    %12 = vector.load %arg5[%c0_11, %c0_12] : memref<1x128xf32, #tpu.memory_space<vmem>>, vector<1x128xf32>
    %13 = arith.mulf %2, %2 : vector<256x128xf32>
    %cst_13 = arith.constant dense<0.000000e+00> : vector<128xf32>
    %14 = vector.multi_reduction <add>, %13, %cst_13 [0] : vector<256x128xf32> to vector<128xf32>
    %15 = vector.shape_cast %14 : vector<128xf32> to vector<1x128xf32>
    %16 = arith.addf %12, %15 : vector<1x128xf32>
    %c0_14 = arith.constant 0 : index
    %c0_15 = arith.constant 0 : index
    %17 = vector.load %arg5[%c0_14, %c0_15] : memref<1x128xf32, #tpu.memory_space<vmem>>, vector<1x128xf32>
    tpu.vector_store %arg5[%c0_14, %c0_15], %16 {strides = array<i32>} : memref<1x128xf32, #tpu.memory_space<vmem>>, vector<1x128xf32>,
    return
  }
  func.func @transform_0(%arg0: i32) -> (i32, i32) {
    %c0_i32 = arith.constant 0 : i32
    %c0_i32_0 = arith.constant 0 : i32
    return %arg0, %c0_i32 : i32, i32
  }
  func.func @transform_1(%arg0: i32) -> (i32, i32) {
    %c0_i32 = arith.constant 0 : i32
    %c0_i32_0 = arith.constant 0 : i32
    %c0_i32_1 = arith.constant 0 : i32
    return %c0_i32, %c0_i32_0 : i32, i32
  }
  func.func @transform_2(%arg0: i32) -> (i32, i32) {
    %c0_i32 = arith.constant 0 : i32
    %c0_i32_0 = arith.constant 0 : i32
    return %arg0, %c0_i32 : i32, i32
  }
  func.func @transform_3(%arg0: i32) -> (i32, i32) {
    %c0_i32 = arith.constant 0 : i32
    %c0_i32_0 = arith.constant 0 : i32
    %c0_i32_1 = arith.constant 0 : i32
    return %c0_i32, %c0_i32_0 : i32, i32
  }
  func.func @transform_4(%arg0: i32) -> (i32, i32) {
    %c0_i32 = arith.constant 0 : i32
    %c0_i32_0 = arith.constant 0 : i32
    %c0_i32_1 = arith.constant 0 : i32
    return %c0_i32, %c0_i32_0 : i32, i32
  }
}

module attributes {stable_mosaic.version = 11 : i64} {
  func.func @kernel(%arg0: i32, %arg1: memref<256x128xbf16, #tpu.memory_space<vmem>>, %arg2: memref<128x128xbf16, #tpu.memory_space<vmem>>, %arg3: memref<256x128xf32, #tpu.memory_space<vmem>>, %arg4: memref<1x128xf32, #tpu.memory_space<vmem>>, %arg5: memref<1x128xf32, #tpu.memory_space<vmem>>) attributes {dimension_semantics = [#tpu.dimension_semantics<arbitrary>], iteration_bounds = array<i64: 8>, scalar_prefetch = 0 : i64, scratch_operands = 0 : i64, tpu.core_type = #tpu.core_type<tc>, window_params = [{transform_indices = @transform_0, window_bounds = array<i64: 256, 128>}, {pipeline_mode = #tpu.pipeline_mode<synchronous>, transform_indices = @transform_1, window_bounds = array<i64: 128, 128>}, {transform_indices = @transform_2, window_bounds = array<i64: 256, 128>}, {pipeline_mode = #tpu.pipeline_mode<synchronous>, transform_indices = @transform_3, window_bounds = array<i64: 1, 128>}, {pipeline_mode = #tpu.pipeline_mode<synchronous>, transform_indices = @transform_4, window_bounds = array<i64: 1, 128>}]} {
    %c0 = arith.constant 0 : index
    %c0_0 = arith.constant 0 : index
    %0 = vector.load %arg1[%c0, %c0_0] : memref<256x128xbf16, #tpu.memory_space<vmem>>, vector<256x128xbf16>
    %c0_1 = arith.constant 0 : index
    %c0_2 = arith.constant 0 : index
    %1 = vector.load %arg2[%c0_1, %c0_2] : memref<128x128xbf16, #tpu.memory_space<vmem>>, vector<128x128xbf16>
    %cst = arith.constant dense<0.000000e+00> : vector<256x128xf32>
    %2 = tpu.matmul %0, %1, %cst {dimension_numbers = #tpu.dot_dimension_numbers<[1], [0], [0], [1], [0, 0, 1, 1], [], []>} : vector<256x128xbf16>, vector<128x128xbf16>, vector<256x128xf32> -> vector<256x128xf32>
    %c0_3 = arith.constant 0 : index
    %c0_4 = arith.constant 0 : index
    %3 = vector.load %arg3[%c0_3, %c0_4] : memref<256x128xf32, #tpu.memory_space<vmem>>, vector<256x128xf32>
    tpu.vector_store %arg3[%c0_3, %c0_4], %2 {strides = array<i32>} : memref<256x128xf32, #tpu.memory_space<vmem>>, vector<256x128xf32>,
    %c0_i32 = arith.constant 0 : i32
    %4 = arith.cmpi eq, %arg0, %c0_i32 : i32
    %5 = arith.extui %4 : i1 to i32
    %c0_i32_5 = arith.constant 0 : i32
    %6 = arith.cmpi ne, %5, %c0_i32_5 : i32
    scf.if %6 {
      %cst_16 = arith.constant 0.000000e+00 : f32
      %18 = vector.broadcast %cst_16 : f32 to vector<1x128xf32>
      %c0_17 = arith.constant 0 : index
      %c0_18 = arith.constant 0 : index
      %19 = vector.load %arg4[%c0_17, %c0_18] : memref<1x128xf32, #tpu.memory_space<vmem>>, vector<1x128xf32>
      tpu.vector_store %arg4[%c0_17, %c0_18], %18 {strides = array<i32>} : memref<1x128xf32, #tpu.memory_space<vmem>>, vector<1x128xf32>,
      %cst_19 = arith.constant 0.000000e+00 : f32
      %20 = vector.broadcast %cst_19 : f32 to vector<1x128xf32>
      %c0_20 = arith.constant 0 : index
      %c0_21 = arith.constant 0 : index
      %21 = vector.load %arg5[%c0_20, %c0_21] : memref<1x128xf32, #tpu.memory_space<vmem>>, vector<1x128xf32>
      tpu.vector_store %arg5[%c0_20, %c0_21], %20 {strides = array<i32>} : memref<1x128xf32, #tpu.memory_space<vmem>>, vector<1x128xf32>,
    } else {
    }
    %c0_6 = arith.constant 0 : index
    %c0_7 = arith.constant 0 : index
    %7 = vector.load %arg4[%c0_6, %c0_7] : memref<1x128xf32, #tpu.memory_space<vmem>>, vector<1x128xf32>
    %cst_8 = arith.constant dense<0.000000e+00> : vector<128xf32>
    %8 = vector.multi_reduction <add>, %2, %cst_8 [0] : vector<256x128xf32> to vector<128xf32>
    %9 = vector.shape_cast %8 : vector<128xf32> to vector<1x128xf32>
    %10 = arith.addf %7, %9 : vector<1x128xf32>
    %c0_9 = arith.constant 0 : index
    %c0_10 = arith.constant 0 : index
    %11 = vector.load %arg4[%c0_9, %c0_10] : memref<1x128xf32, #tpu.memory_space<vmem>>, vector<1x128xf32>
    tpu.vector_store %arg4[%c0_9, %c0_10], %10 {strides = array<i32>} : memref<1x128xf32, #tpu.memory_space<vmem>>, vector<1x128xf32>,
    %c0_11 = arith.constant 0 : index
    %c0_12 = arith.constant 0 : index
    %12 = vector.load %arg5[%c0_11, %c0_12] : memref<1x128xf32, #tpu.memory_space<vmem>>, vector<1x128xf32>
    %13 = arith.mulf %2, %2 : vector<256x128xf32>
    %cst_13 = arith.constant dense<0.000000e+00> : vector<128xf32>
    %14 = vector.multi_reduction <add>, %13, %cst_13 [0] : vector<256x128xf32> to vector<128xf32>
    %15 = vector.shape_cast %14 : vector<128xf32> to vector<1x128xf32>
    %16 = arith.addf %12, %15 : vector<1x128xf32>
    %c0_14 = arith.constant 0 : index
    %c0_15 = arith.constant 0 : index
    %17 = vector.load %arg5[%c0_14, %c0_15] : memref<1x128xf32, #tpu.memory_space<vmem>>, vector<1x128xf32>
    tpu.vector_store %arg5[%c0_14, %c0_15], %16 {strides = array<i32>} : memref<1x128xf32, #tpu.memory_space<vmem>>, vector<1x128xf32>,
    return
  }
  func.func @transform_0(%arg0: i32) -> (i32, i32) {
    %c0_i32 = arith.constant 0 : i32
    %c0_i32_0 = arith.constant 0 : i32
    return %arg0, %c0_i32 : i32, i32
  }
  func.func @transform_1(%arg0: i32) -> (i32, i32) {
    %c0_i32 = arith.constant 0 : i32
    %c0_i32_0 = arith.constant 0 : i32
    %c0_i32_1 = arith.constant 0 : i32
    return %c0_i32, %c0_i32_0 : i32, i32
  }
  func.func @transform_2(%arg0: i32) -> (i32, i32) {
    %c0_i32 = arith.constant 0 : i32
    %c0_i32_0 = arith.constant 0 : i32
    return %arg0, %c0_i32 : i32, i32
  }
  func.func @transform_3(%arg0: i32) -> (i32, i32) {
    %c0_i32 = arith.constant 0 : i32
    %c0_i32_0 = arith.constant 0 : i32
    %c0_i32_1 = arith.constant 0 : i32
    return %c0_i32, %c0_i32_0 : i32, i32
  }
  func.func @transform_4(%arg0: i32) -> (i32, i32) {
    %c0_i32 = arith.constant 0 : i32
    %c0_i32_0 = arith.constant 0 : i32
    %c0_i32_1 = arith.constant 0 : i32
    return %c0_i32, %c0_i32_0 : i32, i32
  }
}

module attributes {stable_mosaic.version = 11 : i64} {
  func.func @kernel(%arg0: i32, %arg1: memref<256x128xf32, #tpu.memory_space<vmem>>, %arg2: memref<1x128xf32, #tpu.memory_space<vmem>>, %arg3: memref<1x128xf32, #tpu.memory_space<vmem>>, %arg4: memref<256x128xf32, #tpu.memory_space<vmem>>) attributes {dimension_semantics = [#tpu.dimension_semantics<parallel>], iteration_bounds = array<i64: 8>, scalar_prefetch = 0 : i64, scratch_operands = 0 : i64, tpu.core_type = #tpu.core_type<tc>, window_params = [{transform_indices = @transform_0, window_bounds = array<i64: 256, 128>}, {pipeline_mode = #tpu.pipeline_mode<synchronous>, transform_indices = @transform_1, window_bounds = array<i64: 1, 128>}, {pipeline_mode = #tpu.pipeline_mode<synchronous>, transform_indices = @transform_2, window_bounds = array<i64: 1, 128>}, {transform_indices = @transform_3, window_bounds = array<i64: 256, 128>}]} {
    %c0 = arith.constant 0 : index
    %c0_0 = arith.constant 0 : index
    %0 = vector.load %arg1[%c0, %c0_0] : memref<256x128xf32, #tpu.memory_space<vmem>>, vector<256x128xf32>
    %c0_1 = arith.constant 0 : index
    %c0_2 = arith.constant 0 : index
    %1 = vector.load %arg2[%c0_1, %c0_2] : memref<1x128xf32, #tpu.memory_space<vmem>>, vector<1x128xf32>
    %2 = vector.broadcast %1 : vector<1x128xf32> to vector<256x128xf32>
    %3 = arith.mulf %0, %2 : vector<256x128xf32>
    %c0_3 = arith.constant 0 : index
    %c0_4 = arith.constant 0 : index
    %4 = vector.load %arg3[%c0_3, %c0_4] : memref<1x128xf32, #tpu.memory_space<vmem>>, vector<1x128xf32>
    %5 = vector.broadcast %4 : vector<1x128xf32> to vector<256x128xf32>
    %6 = arith.addf %3, %5 : vector<256x128xf32>
    %cst = arith.constant 0.000000e+00 : f32
    %7 = vector.broadcast %cst : f32 to vector<256x128xf32>
    %8 = arith.maximumf %6, %7 : vector<256x128xf32>
    %c0_5 = arith.constant 0 : index
    %c0_6 = arith.constant 0 : index
    %9 = vector.load %arg4[%c0_5, %c0_6] : memref<256x128xf32, #tpu.memory_space<vmem>>, vector<256x128xf32>
    tpu.vector_store %arg4[%c0_5, %c0_6], %8 {strides = array<i32>} : memref<256x128xf32, #tpu.memory_space<vmem>>, vector<256x128xf32>,
    return
  }
  func.func @transform_0(%arg0: i32) -> (i32, i32) {
    %c0_i32 = arith.constant 0 : i32
    %c0_i32_0 = arith.constant 0 : i32
    return %arg0, %c0_i32 : i32, i32
  }
  func.func @transform_1(%arg0: i32) -> (i32, i32) {
    %c0_i32 = arith.constant 0 : i32
    %c0_i32_0 = arith.constant 0 : i32
    %c0_i32_1 = arith.constant 0 : i32
    return %c0_i32, %c0_i32_0 : i32, i32
  }
  func.func @transform_2(%arg0: i32) -> (i32, i32) {
    %c0_i32 = arith.constant 0 : i32
    %c0_i32_0 = arith.constant 0 : i32
    %c0_i32_1 = arith.constant 0 : i32
    return %c0_i32, %c0_i32_0 : i32, i32
  }
  func.func @transform_3(%arg0: i32) -> (i32, i32) {
    %c0_i32 = arith.constant 0 : i32
    %c0_i32_0 = arith.constant 0 : i32
    return %arg0, %c0_i32 : i32, i32
  }
}

module attributes {stable_mosaic.version = 11 : i64} {
  func.func @kernel(%arg0: i32, %arg1: memref<256x128xbf16, #tpu.memory_space<vmem>>, %arg2: memref<128x256xbf16, #tpu.memory_space<vmem>>, %arg3: memref<256x256xf32, #tpu.memory_space<vmem>>, %arg4: memref<1x256xf32, #tpu.memory_space<vmem>>, %arg5: memref<1x256xf32, #tpu.memory_space<vmem>>) attributes {dimension_semantics = [#tpu.dimension_semantics<arbitrary>], iteration_bounds = array<i64: 2>, scalar_prefetch = 0 : i64, scratch_operands = 0 : i64, tpu.core_type = #tpu.core_type<tc>, window_params = [{transform_indices = @transform_0, window_bounds = array<i64: 256, 128>}, {pipeline_mode = #tpu.pipeline_mode<synchronous>, transform_indices = @transform_1, window_bounds = array<i64: 128, 256>}, {transform_indices = @transform_2, window_bounds = array<i64: 256, 256>}, {pipeline_mode = #tpu.pipeline_mode<synchronous>, transform_indices = @transform_3, window_bounds = array<i64: 1, 256>}, {pipeline_mode = #tpu.pipeline_mode<synchronous>, transform_indices = @transform_4, window_bounds = array<i64: 1, 256>}]} {
    %c0 = arith.constant 0 : index
    %c0_0 = arith.constant 0 : index
    %0 = vector.load %arg1[%c0, %c0_0] : memref<256x128xbf16, #tpu.memory_space<vmem>>, vector<256x128xbf16>
    %c0_1 = arith.constant 0 : index
    %c0_2 = arith.constant 0 : index
    %1 = vector.load %arg2[%c0_1, %c0_2] : memref<128x256xbf16, #tpu.memory_space<vmem>>, vector<128x256xbf16>
    %cst = arith.constant dense<0.000000e+00> : vector<256x256xf32>
    %2 = tpu.matmul %0, %1, %cst {dimension_numbers = #tpu.dot_dimension_numbers<[1], [0], [0], [1], [0, 0, 1, 1], [], []>} : vector<256x128xbf16>, vector<128x256xbf16>, vector<256x256xf32> -> vector<256x256xf32>
    %c0_3 = arith.constant 0 : index
    %c0_4 = arith.constant 0 : index
    %3 = vector.load %arg3[%c0_3, %c0_4] : memref<256x256xf32, #tpu.memory_space<vmem>>, vector<256x256xf32>
    tpu.vector_store %arg3[%c0_3, %c0_4], %2 {strides = array<i32>} : memref<256x256xf32, #tpu.memory_space<vmem>>, vector<256x256xf32>,
    %c0_i32 = arith.constant 0 : i32
    %4 = arith.cmpi eq, %arg0, %c0_i32 : i32
    %5 = arith.extui %4 : i1 to i32
    %c0_i32_5 = arith.constant 0 : i32
    %6 = arith.cmpi ne, %5, %c0_i32_5 : i32
    scf.if %6 {
      %cst_16 = arith.constant 0.000000e+00 : f32
      %18 = vector.broadcast %cst_16 : f32 to vector<1x256xf32>
      %c0_17 = arith.constant 0 : index
      %c0_18 = arith.constant 0 : index
      %19 = vector.load %arg4[%c0_17, %c0_18] : memref<1x256xf32, #tpu.memory_space<vmem>>, vector<1x256xf32>
      tpu.vector_store %arg4[%c0_17, %c0_18], %18 {strides = array<i32>} : memref<1x256xf32, #tpu.memory_space<vmem>>, vector<1x256xf32>,
      %cst_19 = arith.constant 0.000000e+00 : f32
      %20 = vector.broadcast %cst_19 : f32 to vector<1x256xf32>
      %c0_20 = arith.constant 0 : index
      %c0_21 = arith.constant 0 : index
      %21 = vector.load %arg5[%c0_20, %c0_21] : memref<1x256xf32, #tpu.memory_space<vmem>>, vector<1x256xf32>
      tpu.vector_store %arg5[%c0_20, %c0_21], %20 {strides = array<i32>} : memref<1x256xf32, #tpu.memory_space<vmem>>, vector<1x256xf32>,
    } else {
    }
    %c0_6 = arith.constant 0 : index
    %c0_7 = arith.constant 0 : index
    %7 = vector.load %arg4[%c0_6, %c0_7] : memref<1x256xf32, #tpu.memory_space<vmem>>, vector<1x256xf32>
    %cst_8 = arith.constant dense<0.000000e+00> : vector<256xf32>
    %8 = vector.multi_reduction <add>, %2, %cst_8 [0] : vector<256x256xf32> to vector<256xf32>
    %9 = vector.shape_cast %8 : vector<256xf32> to vector<1x256xf32>
    %10 = arith.addf %7, %9 : vector<1x256xf32>
    %c0_9 = arith.constant 0 : index
    %c0_10 = arith.constant 0 : index
    %11 = vector.load %arg4[%c0_9, %c0_10] : memref<1x256xf32, #tpu.memory_space<vmem>>, vector<1x256xf32>
    tpu.vector_store %arg4[%c0_9, %c0_10], %10 {strides = array<i32>} : memref<1x256xf32, #tpu.memory_space<vmem>>, vector<1x256xf32>,
    %c0_11 = arith.constant 0 : index
    %c0_12 = arith.constant 0 : index
    %12 = vector.load %arg5[%c0_11, %c0_12] : memref<1x256xf32, #tpu.memory_space<vmem>>, vector<1x256xf32>
    %13 = arith.mulf %2, %2 : vector<256x256xf32>
    %cst_13 = arith.constant dense<0.000000e+00> : vector<256xf32>
    %14 = vector.multi_reduction <add>, %13, %cst_13 [0] : vector<256x256xf32> to vector<256xf32>
    %15 = vector.shape_cast %14 : vector<256xf32> to vector<1x256xf32>
    %16 = arith.addf %12, %15 : vector<1x256xf32>
    %c0_14 = arith.constant 0 : index
    %c0_15 = arith.constant 0 : index
    %17 = vector.load %arg5[%c0_14, %c0_15] : memref<1x256xf32, #tpu.memory_space<vmem>>, vector<1x256xf32>
    tpu.vector_store %arg5[%c0_14, %c0_15], %16 {strides = array<i32>} : memref<1x256xf32, #tpu.memory_space<vmem>>, vector<1x256xf32>,
    return
  }
  func.func @transform_0(%arg0: i32) -> (i32, i32) {
    %c0_i32 = arith.constant 0 : i32
    %c0_i32_0 = arith.constant 0 : i32
    return %arg0, %c0_i32 : i32, i32
  }
  func.func @transform_1(%arg0: i32) -> (i32, i32) {
    %c0_i32 = arith.constant 0 : i32
    %c0_i32_0 = arith.constant 0 : i32
    %c0_i32_1 = arith.constant 0 : i32
    return %c0_i32, %c0_i32_0 : i32, i32
  }
  func.func @transform_2(%arg0: i32) -> (i32, i32) {
    %c0_i32 = arith.constant 0 : i32
    %c0_i32_0 = arith.constant 0 : i32
    return %arg0, %c0_i32 : i32, i32
  }
  func.func @transform_3(%arg0: i32) -> (i32, i32) {
    %c0_i32 = arith.constant 0 : i32
    %c0_i32_0 = arith.constant 0 : i32
    %c0_i32_1 = arith.constant 0 : i32
    return %c0_i32, %c0_i32_0 : i32, i32
  }
  func.func @transform_4(%arg0: i32) -> (i32, i32) {
    %c0_i32 = arith.constant 0 : i32
    %c0_i32_0 = arith.constant 0 : i32
    %c0_i32_1 = arith.constant 0 : i32
    return %c0_i32, %c0_i32_0 : i32, i32
  }
}

module attributes {stable_mosaic.version = 11 : i64} {
  func.func @kernel(%arg0: i32, %arg1: memref<256x256xf32, #tpu.memory_space<vmem>>, %arg2: memref<1x256xf32, #tpu.memory_space<vmem>>, %arg3: memref<1x256xf32, #tpu.memory_space<vmem>>, %arg4: memref<256x256xf32, #tpu.memory_space<vmem>>) attributes {dimension_semantics = [#tpu.dimension_semantics<parallel>], iteration_bounds = array<i64: 2>, scalar_prefetch = 0 : i64, scratch_operands = 0 : i64, tpu.core_type = #tpu.core_type<tc>, window_params = [{transform_indices = @transform_0, window_bounds = array<i64: 256, 256>}, {pipeline_mode = #tpu.pipeline_mode<synchronous>, transform_indices = @transform_1, window_bounds = array<i64: 1, 256>}, {pipeline_mode = #tpu.pipeline_mode<synchronous>, transform_indices = @transform_2, window_bounds = array<i64: 1, 256>}, {transform_indices = @transform_3, window_bounds = array<i64: 256, 256>}]} {
    %c0 = arith.constant 0 : index
    %c0_0 = arith.constant 0 : index
    %0 = vector.load %arg1[%c0, %c0_0] : memref<256x256xf32, #tpu.memory_space<vmem>>, vector<256x256xf32>
    %c0_1 = arith.constant 0 : index
    %c0_2 = arith.constant 0 : index
    %1 = vector.load %arg2[%c0_1, %c0_2] : memref<1x256xf32, #tpu.memory_space<vmem>>, vector<1x256xf32>
    %2 = vector.broadcast %1 : vector<1x256xf32> to vector<256x256xf32>
    %3 = arith.mulf %0, %2 : vector<256x256xf32>
    %c0_3 = arith.constant 0 : index
    %c0_4 = arith.constant 0 : index
    %4 = vector.load %arg3[%c0_3, %c0_4] : memref<1x256xf32, #tpu.memory_space<vmem>>, vector<1x256xf32>
    %5 = vector.broadcast %4 : vector<1x256xf32> to vector<256x256xf32>
    %6 = arith.addf %3, %5 : vector<256x256xf32>
    %cst = arith.constant 0.000000e+00 : f32
    %7 = vector.broadcast %cst : f32 to vector<256x256xf32>
    %8 = arith.maximumf %6, %7 : vector<256x256xf32>
    %c0_5 = arith.constant 0 : index
    %c0_6 = arith.constant 0 : index
    %9 = vector.load %arg4[%c0_5, %c0_6] : memref<256x256xf32, #tpu.memory_space<vmem>>, vector<256x256xf32>
    tpu.vector_store %arg4[%c0_5, %c0_6], %8 {strides = array<i32>} : memref<256x256xf32, #tpu.memory_space<vmem>>, vector<256x256xf32>,
    return
  }
  func.func @transform_0(%arg0: i32) -> (i32, i32) {
    %c0_i32 = arith.constant 0 : i32
    %c0_i32_0 = arith.constant 0 : i32
    return %arg0, %c0_i32 : i32, i32
  }
  func.func @transform_1(%arg0: i32) -> (i32, i32) {
    %c0_i32 = arith.constant 0 : i32
    %c0_i32_0 = arith.constant 0 : i32
    %c0_i32_1 = arith.constant 0 : i32
    return %c0_i32, %c0_i32_0 : i32, i32
  }
  func.func @transform_2(%arg0: i32) -> (i32, i32) {
    %c0_i32 = arith.constant 0 : i32
    %c0_i32_0 = arith.constant 0 : i32
    %c0_i32_1 = arith.constant 0 : i32
    return %c0_i32, %c0_i32_0 : i32, i32
  }
  func.func @transform_3(%arg0: i32) -> (i32, i32) {
    %c0_i32 = arith.constant 0 : i32
    %c0_i32_0 = arith.constant 0 : i32
    return %arg0, %c0_i32 : i32, i32
  }
}

module attributes {stable_mosaic.version = 11 : i64} {
  func.func @kernel(%arg0: i32, %arg1: memref<256x256xbf16, #tpu.memory_space<vmem>>, %arg2: memref<256x128xbf16, #tpu.memory_space<vmem>>, %arg3: memref<256x128xf32, #tpu.memory_space<vmem>>, %arg4: memref<1x128xf32, #tpu.memory_space<vmem>>, %arg5: memref<1x128xf32, #tpu.memory_space<vmem>>) attributes {dimension_semantics = [#tpu.dimension_semantics<arbitrary>], iteration_bounds = array<i64: 2>, scalar_prefetch = 0 : i64, scratch_operands = 0 : i64, tpu.core_type = #tpu.core_type<tc>, window_params = [{transform_indices = @transform_0, window_bounds = array<i64: 256, 256>}, {pipeline_mode = #tpu.pipeline_mode<synchronous>, transform_indices = @transform_1, window_bounds = array<i64: 256, 128>}, {transform_indices = @transform_2, window_bounds = array<i64: 256, 128>}, {pipeline_mode = #tpu.pipeline_mode<synchronous>, transform_indices = @transform_3, window_bounds = array<i64: 1, 128>}, {pipeline_mode = #tpu.pipeline_mode<synchronous>, transform_indices = @transform_4, window_bounds = array<i64: 1, 128>}]} {
    %c0 = arith.constant 0 : index
    %c0_0 = arith.constant 0 : index
    %0 = vector.load %arg1[%c0, %c0_0] : memref<256x256xbf16, #tpu.memory_space<vmem>>, vector<256x256xbf16>
    %c0_1 = arith.constant 0 : index
    %c0_2 = arith.constant 0 : index
    %1 = vector.load %arg2[%c0_1, %c0_2] : memref<256x128xbf16, #tpu.memory_space<vmem>>, vector<256x128xbf16>
    %cst = arith.constant dense<0.000000e+00> : vector<256x128xf32>
    %2 = tpu.matmul %0, %1, %cst {dimension_numbers = #tpu.dot_dimension_numbers<[1], [0], [0], [1], [0, 0, 1, 1], [], []>} : vector<256x256xbf16>, vector<256x128xbf16>, vector<256x128xf32> -> vector<256x128xf32>
    %c0_3 = arith.constant 0 : index
    %c0_4 = arith.constant 0 : index
    %3 = vector.load %arg3[%c0_3, %c0_4] : memref<256x128xf32, #tpu.memory_space<vmem>>, vector<256x128xf32>
    tpu.vector_store %arg3[%c0_3, %c0_4], %2 {strides = array<i32>} : memref<256x128xf32, #tpu.memory_space<vmem>>, vector<256x128xf32>,
    %c0_i32 = arith.constant 0 : i32
    %4 = arith.cmpi eq, %arg0, %c0_i32 : i32
    %5 = arith.extui %4 : i1 to i32
    %c0_i32_5 = arith.constant 0 : i32
    %6 = arith.cmpi ne, %5, %c0_i32_5 : i32
    scf.if %6 {
      %cst_16 = arith.constant 0.000000e+00 : f32
      %18 = vector.broadcast %cst_16 : f32 to vector<1x128xf32>
      %c0_17 = arith.constant 0 : index
      %c0_18 = arith.constant 0 : index
      %19 = vector.load %arg4[%c0_17, %c0_18] : memref<1x128xf32, #tpu.memory_space<vmem>>, vector<1x128xf32>
      tpu.vector_store %arg4[%c0_17, %c0_18], %18 {strides = array<i32>} : memref<1x128xf32, #tpu.memory_space<vmem>>, vector<1x128xf32>,
      %cst_19 = arith.constant 0.000000e+00 : f32
      %20 = vector.broadcast %cst_19 : f32 to vector<1x128xf32>
      %c0_20 = arith.constant 0 : index
      %c0_21 = arith.constant 0 : index
      %21 = vector.load %arg5[%c0_20, %c0_21] : memref<1x128xf32, #tpu.memory_space<vmem>>, vector<1x128xf32>
      tpu.vector_store %arg5[%c0_20, %c0_21], %20 {strides = array<i32>} : memref<1x128xf32, #tpu.memory_space<vmem>>, vector<1x128xf32>,
    } else {
    }
    %c0_6 = arith.constant 0 : index
    %c0_7 = arith.constant 0 : index
    %7 = vector.load %arg4[%c0_6, %c0_7] : memref<1x128xf32, #tpu.memory_space<vmem>>, vector<1x128xf32>
    %cst_8 = arith.constant dense<0.000000e+00> : vector<128xf32>
    %8 = vector.multi_reduction <add>, %2, %cst_8 [0] : vector<256x128xf32> to vector<128xf32>
    %9 = vector.shape_cast %8 : vector<128xf32> to vector<1x128xf32>
    %10 = arith.addf %7, %9 : vector<1x128xf32>
    %c0_9 = arith.constant 0 : index
    %c0_10 = arith.constant 0 : index
    %11 = vector.load %arg4[%c0_9, %c0_10] : memref<1x128xf32, #tpu.memory_space<vmem>>, vector<1x128xf32>
    tpu.vector_store %arg4[%c0_9, %c0_10], %10 {strides = array<i32>} : memref<1x128xf32, #tpu.memory_space<vmem>>, vector<1x128xf32>,
    %c0_11 = arith.constant 0 : index
    %c0_12 = arith.constant 0 : index
    %12 = vector.load %arg5[%c0_11, %c0_12] : memref<1x128xf32, #tpu.memory_space<vmem>>, vector<1x128xf32>
    %13 = arith.mulf %2, %2 : vector<256x128xf32>
    %cst_13 = arith.constant dense<0.000000e+00> : vector<128xf32>
    %14 = vector.multi_reduction <add>, %13, %cst_13 [0] : vector<256x128xf32> to vector<128xf32>
    %15 = vector.shape_cast %14 : vector<128xf32> to vector<1x128xf32>
    %16 = arith.addf %12, %15 : vector<1x128xf32>
    %c0_14 = arith.constant 0 : index
    %c0_15 = arith.constant 0 : index
    %17 = vector.load %arg5[%c0_14, %c0_15] : memref<1x128xf32, #tpu.memory_space<vmem>>, vector<1x128xf32>
    tpu.vector_store %arg5[%c0_14, %c0_15], %16 {strides = array<i32>} : memref<1x128xf32, #tpu.memory_space<vmem>>, vector<1x128xf32>,
    return
  }
  func.func @transform_0(%arg0: i32) -> (i32, i32) {
    %c0_i32 = arith.constant 0 : i32
    %c0_i32_0 = arith.constant 0 : i32
    return %arg0, %c0_i32 : i32, i32
  }
  func.func @transform_1(%arg0: i32) -> (i32, i32) {
    %c0_i32 = arith.constant 0 : i32
    %c0_i32_0 = arith.constant 0 : i32
    %c0_i32_1 = arith.constant 0 : i32
    return %c0_i32, %c0_i32_0 : i32, i32
  }
  func.func @transform_2(%arg0: i32) -> (i32, i32) {
    %c0_i32 = arith.constant 0 : i32
    %c0_i32_0 = arith.constant 0 : i32
    return %arg0, %c0_i32 : i32, i32
  }
  func.func @transform_3(%arg0: i32) -> (i32, i32) {
    %c0_i32 = arith.constant 0 : i32
    %c0_i32_0 = arith.constant 0 : i32
    %c0_i32_1 = arith.constant 0 : i32
    return %c0_i32, %c0_i32_0 : i32, i32
  }
  func.func @transform_4(%arg0: i32) -> (i32, i32) {
    %c0_i32 = arith.constant 0 : i32
    %c0_i32_0 = arith.constant 0 : i32
    %c0_i32_1 = arith.constant 0 : i32
    return %c0_i32, %c0_i32_0 : i32, i32
  }
}

module attributes {stable_mosaic.version = 11 : i64} {
  func.func @kernel(%arg0: i32, %arg1: memref<256x128xf32, #tpu.memory_space<vmem>>, %arg2: memref<1x128xf32, #tpu.memory_space<vmem>>, %arg3: memref<1x128xf32, #tpu.memory_space<vmem>>, %arg4: memref<256x128xf32, #tpu.memory_space<vmem>>) attributes {dimension_semantics = [#tpu.dimension_semantics<parallel>], iteration_bounds = array<i64: 2>, scalar_prefetch = 0 : i64, scratch_operands = 0 : i64, tpu.core_type = #tpu.core_type<tc>, window_params = [{transform_indices = @transform_0, window_bounds = array<i64: 256, 128>}, {pipeline_mode = #tpu.pipeline_mode<synchronous>, transform_indices = @transform_1, window_bounds = array<i64: 1, 128>}, {pipeline_mode = #tpu.pipeline_mode<synchronous>, transform_indices = @transform_2, window_bounds = array<i64: 1, 128>}, {transform_indices = @transform_3, window_bounds = array<i64: 256, 128>}]} {
    %c0 = arith.constant 0 : index
    %c0_0 = arith.constant 0 : index
    %0 = vector.load %arg1[%c0, %c0_0] : memref<256x128xf32, #tpu.memory_space<vmem>>, vector<256x128xf32>
    %c0_1 = arith.constant 0 : index
    %c0_2 = arith.constant 0 : index
    %1 = vector.load %arg2[%c0_1, %c0_2] : memref<1x128xf32, #tpu.memory_space<vmem>>, vector<1x128xf32>
    %2 = vector.broadcast %1 : vector<1x128xf32> to vector<256x128xf32>
    %3 = arith.mulf %0, %2 : vector<256x128xf32>
    %c0_3 = arith.constant 0 : index
    %c0_4 = arith.constant 0 : index
    %4 = vector.load %arg3[%c0_3, %c0_4] : memref<1x128xf32, #tpu.memory_space<vmem>>, vector<1x128xf32>
    %5 = vector.broadcast %4 : vector<1x128xf32> to vector<256x128xf32>
    %6 = arith.addf %3, %5 : vector<256x128xf32>
    %cst = arith.constant 0.000000e+00 : f32
    %7 = vector.broadcast %cst : f32 to vector<256x128xf32>
    %8 = arith.maximumf %6, %7 : vector<256x128xf32>
    %c0_5 = arith.constant 0 : index
    %c0_6 = arith.constant 0 : index
    %9 = vector.load %arg4[%c0_5, %c0_6] : memref<256x128xf32, #tpu.memory_space<vmem>>, vector<256x128xf32>
    tpu.vector_store %arg4[%c0_5, %c0_6], %8 {strides = array<i32>} : memref<256x128xf32, #tpu.memory_space<vmem>>, vector<256x128xf32>,
    return
  }
  func.func @transform_0(%arg0: i32) -> (i32, i32) {
    %c0_i32 = arith.constant 0 : i32
    %c0_i32_0 = arith.constant 0 : i32
    return %arg0, %c0_i32 : i32, i32
  }
  func.func @transform_1(%arg0: i32) -> (i32, i32) {
    %c0_i32 = arith.constant 0 : i32
    %c0_i32_0 = arith.constant 0 : i32
    %c0_i32_1 = arith.constant 0 : i32
    return %c0_i32, %c0_i32_0 : i32, i32
  }
  func.func @transform_2(%arg0: i32) -> (i32, i32) {
    %c0_i32 = arith.constant 0 : i32
    %c0_i32_0 = arith.constant 0 : i32
    %c0_i32_1 = arith.constant 0 : i32
    return %c0_i32, %c0_i32_0 : i32, i32
  }
  func.func @transform_3(%arg0: i32) -> (i32, i32) {
    %c0_i32 = arith.constant 0 : i32
    %c0_i32_0 = arith.constant 0 : i32
    return %arg0, %c0_i32 : i32, i32
  }
}

module attributes {stable_mosaic.version = 11 : i64} {
  func.func @kernel(%arg0: i32, %arg1: memref<256x128xbf16, #tpu.memory_space<vmem>>, %arg2: memref<128x128xbf16, #tpu.memory_space<vmem>>, %arg3: memref<256x128xf32, #tpu.memory_space<vmem>>, %arg4: memref<1x128xf32, #tpu.memory_space<vmem>>, %arg5: memref<1x128xf32, #tpu.memory_space<vmem>>) attributes {dimension_semantics = [#tpu.dimension_semantics<arbitrary>], iteration_bounds = array<i64: 2>, scalar_prefetch = 0 : i64, scratch_operands = 0 : i64, tpu.core_type = #tpu.core_type<tc>, window_params = [{transform_indices = @transform_0, window_bounds = array<i64: 256, 128>}, {pipeline_mode = #tpu.pipeline_mode<synchronous>, transform_indices = @transform_1, window_bounds = array<i64: 128, 128>}, {transform_indices = @transform_2, window_bounds = array<i64: 256, 128>}, {pipeline_mode = #tpu.pipeline_mode<synchronous>, transform_indices = @transform_3, window_bounds = array<i64: 1, 128>}, {pipeline_mode = #tpu.pipeline_mode<synchronous>, transform_indices = @transform_4, window_bounds = array<i64: 1, 128>}]} {
    %c0 = arith.constant 0 : index
    %c0_0 = arith.constant 0 : index
    %0 = vector.load %arg1[%c0, %c0_0] : memref<256x128xbf16, #tpu.memory_space<vmem>>, vector<256x128xbf16>
    %c0_1 = arith.constant 0 : index
    %c0_2 = arith.constant 0 : index
    %1 = vector.load %arg2[%c0_1, %c0_2] : memref<128x128xbf16, #tpu.memory_space<vmem>>, vector<128x128xbf16>
    %cst = arith.constant dense<0.000000e+00> : vector<256x128xf32>
    %2 = tpu.matmul %0, %1, %cst {dimension_numbers = #tpu.dot_dimension_numbers<[1], [0], [0], [1], [0, 0, 1, 1], [], []>} : vector<256x128xbf16>, vector<128x128xbf16>, vector<256x128xf32> -> vector<256x128xf32>
    %c0_3 = arith.constant 0 : index
    %c0_4 = arith.constant 0 : index
    %3 = vector.load %arg3[%c0_3, %c0_4] : memref<256x128xf32, #tpu.memory_space<vmem>>, vector<256x128xf32>
    tpu.vector_store %arg3[%c0_3, %c0_4], %2 {strides = array<i32>} : memref<256x128xf32, #tpu.memory_space<vmem>>, vector<256x128xf32>,
    %c0_i32 = arith.constant 0 : i32
    %4 = arith.cmpi eq, %arg0, %c0_i32 : i32
    %5 = arith.extui %4 : i1 to i32
    %c0_i32_5 = arith.constant 0 : i32
    %6 = arith.cmpi ne, %5, %c0_i32_5 : i32
    scf.if %6 {
      %cst_16 = arith.constant 0.000000e+00 : f32
      %18 = vector.broadcast %cst_16 : f32 to vector<1x128xf32>
      %c0_17 = arith.constant 0 : index
      %c0_18 = arith.constant 0 : index
      %19 = vector.load %arg4[%c0_17, %c0_18] : memref<1x128xf32, #tpu.memory_space<vmem>>, vector<1x128xf32>
      tpu.vector_store %arg4[%c0_17, %c0_18], %18 {strides = array<i32>} : memref<1x128xf32, #tpu.memory_space<vmem>>, vector<1x128xf32>,
      %cst_19 = arith.constant 0.000000e+00 : f32
      %20 = vector.broadcast %cst_19 : f32 to vector<1x128xf32>
      %c0_20 = arith.constant 0 : index
      %c0_21 = arith.constant 0 : index
      %21 = vector.load %arg5[%c0_20, %c0_21] : memref<1x128xf32, #tpu.memory_space<vmem>>, vector<1x128xf32>
      tpu.vector_store %arg5[%c0_20, %c0_21], %20 {strides = array<i32>} : memref<1x128xf32, #tpu.memory_space<vmem>>, vector<1x128xf32>,
    } else {
    }
    %c0_6 = arith.constant 0 : index
    %c0_7 = arith.constant 0 : index
    %7 = vector.load %arg4[%c0_6, %c0_7] : memref<1x128xf32, #tpu.memory_space<vmem>>, vector<1x128xf32>
    %cst_8 = arith.constant dense<0.000000e+00> : vector<128xf32>
    %8 = vector.multi_reduction <add>, %2, %cst_8 [0] : vector<256x128xf32> to vector<128xf32>
    %9 = vector.shape_cast %8 : vector<128xf32> to vector<1x128xf32>
    %10 = arith.addf %7, %9 : vector<1x128xf32>
    %c0_9 = arith.constant 0 : index
    %c0_10 = arith.constant 0 : index
    %11 = vector.load %arg4[%c0_9, %c0_10] : memref<1x128xf32, #tpu.memory_space<vmem>>, vector<1x128xf32>
    tpu.vector_store %arg4[%c0_9, %c0_10], %10 {strides = array<i32>} : memref<1x128xf32, #tpu.memory_space<vmem>>, vector<1x128xf32>,
    %c0_11 = arith.constant 0 : index
    %c0_12 = arith.constant 0 : index
    %12 = vector.load %arg5[%c0_11, %c0_12] : memref<1x128xf32, #tpu.memory_space<vmem>>, vector<1x128xf32>
    %13 = arith.mulf %2, %2 : vector<256x128xf32>
    %cst_13 = arith.constant dense<0.000000e+00> : vector<128xf32>
    %14 = vector.multi_reduction <add>, %13, %cst_13 [0] : vector<256x128xf32> to vector<128xf32>
    %15 = vector.shape_cast %14 : vector<128xf32> to vector<1x128xf32>
    %16 = arith.addf %12, %15 : vector<1x128xf32>
    %c0_14 = arith.constant 0 : index
    %c0_15 = arith.constant 0 : index
    %17 = vector.load %arg5[%c0_14, %c0_15] : memref<1x128xf32, #tpu.memory_space<vmem>>, vector<1x128xf32>
    tpu.vector_store %arg5[%c0_14, %c0_15], %16 {strides = array<i32>} : memref<1x128xf32, #tpu.memory_space<vmem>>, vector<1x128xf32>,
    return
  }
  func.func @transform_0(%arg0: i32) -> (i32, i32) {
    %c0_i32 = arith.constant 0 : i32
    %c0_i32_0 = arith.constant 0 : i32
    return %arg0, %c0_i32 : i32, i32
  }
  func.func @transform_1(%arg0: i32) -> (i32, i32) {
    %c0_i32 = arith.constant 0 : i32
    %c0_i32_0 = arith.constant 0 : i32
    %c0_i32_1 = arith.constant 0 : i32
    return %c0_i32, %c0_i32_0 : i32, i32
  }
  func.func @transform_2(%arg0: i32) -> (i32, i32) {
    %c0_i32 = arith.constant 0 : i32
    %c0_i32_0 = arith.constant 0 : i32
    return %arg0, %c0_i32 : i32, i32
  }
  func.func @transform_3(%arg0: i32) -> (i32, i32) {
    %c0_i32 = arith.constant 0 : i32
    %c0_i32_0 = arith.constant 0 : i32
    %c0_i32_1 = arith.constant 0 : i32
    return %c0_i32, %c0_i32_0 : i32, i32
  }
  func.func @transform_4(%arg0: i32) -> (i32, i32) {
    %c0_i32 = arith.constant 0 : i32
    %c0_i32_0 = arith.constant 0 : i32
    %c0_i32_1 = arith.constant 0 : i32
    return %c0_i32, %c0_i32_0 : i32, i32
  }
}

</mosaic_0001>

<bundles_post_ra>
// kernel: resize_forward.20
= control target key start
LH: loop header
LB: loop body
LE: loop exit
PB: predicated region body
PF: predicated region fallthrough
CT: control target
= control target key end

     0   :  { %s1196_s15 = smov 0   ;;  %s1538_s0 = inlined_call_operand.vmem [shape: bf16[8192,256], index: 0, kind: input, shape index: {}]   ;;  %s1539_s1 = inlined_call_operand.vmem [shape: bf16[256,128], index: 1, kind: input, shape index: {}]   ;;  %s1540_s2 = inlined_call_operand.vmem [shape: f32[8192,128], index: 2, kind: output, shape index: {0}]   ;;  %s1541_s3 = inlined_call_operand.vmem [shape: f32[1,128], index: 3, kind: output, shape index: {1}]   ;;  %s1542_s4 = inlined_call_operand.vmem [shape: f32[1,128], index: 4, kind: output, shape index: {2}]  }
   0x1 LB: > { %s899_s16 = sadd.s32 4294967295, %s1168_s15   ;;  %p903_p0 = scmp.ge.s32.totalorder %s1168_s15, 1  ;;  %s1168_s15 = sphi %s1196_s15, %s15_s15  }
   0x2   : > { %p159_p1 = scmp.lt.s32.totalorder %s1168_s15, 33 }
   0x4   : > { %p160_p2 = pnand %p903_p0, %p159_p1 }
   0x5   : > { %v1098_v0 = vld [vmem:[%s1539_s1 + $0x40] sm:$0xff] (!%p160_p2)   ;;  %s904_s19 = sshll.u32 (!%p160_p2), %s899_s16, 5  ;;  %v1100_v2 = vld [vmem:[%s1539_s1 + $0x48] sm:$0xff] (!%p160_p2)   ;;  %v1102_v4 = vld [vmem:[%s1539_s1 + $0x50] sm:$0xff] (!%p160_p2)   ;;  %p957_p4 = scmp.ne.s32.totalorder (!%p160_p2), %s899_s16, 0 }
   0x6   : > { %163 = sbr.rel (%p160_p2) target bundleno = 391 (0x187), region = 28  ;;  %v1099_v1 = vld [vmem:[%s1539_s1] sm:$0xff] (!%p160_p2)   ;;  %961 = vmatprep.subr.bf16.mxu0 (!%p160_p2), %v1098_v0  ;;  %1073 = vmatprep.subr.bf16.mxu1 (!%p160_p2), %v1098_v0  ;;  %v1101_v3 = vld [vmem:[%s1539_s1 + $0x8] sm:$0xff] (!%p160_p2)   ;;  %p187_p3 = scmp.lt.s32.totalorder (!%p160_p2), %s904_s19, 1023  ;;  %v1103_v5 = vld [vmem:[%s1539_s1 + $0x10] sm:$0xff] (!%p160_p2)  }
   0x7   : > { %962 = vmatpush3.bf16.msra.mxu0 (!%p160_p2), %v1099_v1  ;;  %1081 = vmatpush3.bf16.msra.mxu1 (!%p160_p2), %v1099_v1  ;;  %v1104_v6 = vld [vmem:[%s1539_s1 + $0x58] sm:$0xff] (!%p160_p2)   ;;  %v1106_v8 = vld [vmem:[%s1539_s1 + $0x60] sm:$0xff] (!%p160_p2)   ;;  %v1108_v10 = vld [vmem:[%s1539_s1 + $0x68] sm:$0xff] (!%p160_p2)  }
   0x8   : > { %963 = vmatprep.subr.bf16.mxu0 (!%p160_p2), %v1100_v2  ;;  %1074 = vmatprep.subr.bf16.mxu1 (!%p160_p2), %v1100_v2  ;;  %v1105_v7 = vld [vmem:[%s1539_s1 + $0x18] sm:$0xff] (!%p160_p2)   ;;  %v1107_v9 = vld [vmem:[%s1539_s1 + $0x20] sm:$0xff] (!%p160_p2)   ;;  %v1109_v13 = vld [vmem:[%s1539_s1 + $0x28] sm:$0xff] (!%p160_p2)  }
   0x9   : > { %v1110_v14 = vld [vmem:[%s1539_s1 + $0x70] sm:$0xff] (!%p160_p2)   ;;  %v1112_v16 = vld [vmem:[%s1539_s1 + $0x78] sm:$0xff] (!%p160_p2)  }
   0xa   : > { %v1111_v15 = vld [vmem:[%s1539_s1 + $0x30] sm:$0xff] (!%p160_p2)   ;;  %v1113_v17 = vld [vmem:[%s1539_s1 + $0x38] sm:$0xff] (!%p160_p2)  }
   0xb   : > { %964 = vmatpush3.bf16.msra.mxu0 (!%p160_p2), %v1101_v3  ;;  %1082 = vmatpush3.bf16.msra.mxu1 (!%p160_p2), %v1101_v3 }
   0xc   : > { %965 = vmatprep.subr.bf16.mxu0 (!%p160_p2), %v1102_v4  ;;  %1075 = vmatprep.subr.bf16.mxu1 (!%p160_p2), %v1102_v4 }
   0xd   : > { %s1544_s19 = smov (!%p187_p3, %s904_s19), 1023 }
   0xe   : > { %s960_s8 = sshll.u32 %s1544_s19, 3 }
   0xf   : > { %966 = vmatpush3.bf16.msra.mxu0 %v1103_v5  ;;  %1083 = vmatpush3.bf16.msra.mxu1 %v1103_v5  ;;  %s1241_s13 = scalar_lea.vmem %s1538_s0, %s960_s8  ;;  %s1301_s7 = scalar_lea.vmem %s1540_s2, %s960_s8 }
  0x10   : > { %967 = vmatprep.subr.bf16.mxu0 %v1104_v6  ;;  %1076 = vmatprep.subr.bf16.mxu1 %v1104_v6  ;;  %v1116_v11 = vld [vmem:[%s1241_s13 + $0x4] ss:$8 sps:$4 sm:$0xff]   ;;  %v1114_v18 = vld [vmem:[%s1241_s13] ss:$8 sps:$4 sm:$0xff]   ;;  %v1120_v20 = vld [vmem:[%s1241_s13 + $0x14] ss:$8 sps:$4 sm:$0xff]  }
  0x11   : > { %v1119_v12 = vld [vmem:[%s1241_s13 + $0x84] ss:$8 sps:$4 sm:$0xff]   ;;  %552 = vmatprep.mubr.bf16.mxu0 %v1116_v11  ;;  %v1117_v19 = vld [vmem:[%s1241_s13 + $0x80] ss:$8 sps:$4 sm:$0xff]   ;;  %v1122_v21 = vld [vmem:[%s1241_s13 + $0x94] ss:$8 sps:$4 sm:$0xff]  }
  0x12   : > { %616 = vmatprep.mubr.bf16.mxu1 %v1119_v12  ;;  %v1124_v22 = vld [vmem:[%s1241_s13 + $0x10] ss:$8 sps:$4 sm:$0xff]   ;;  %v1126_v24 = vld [vmem:[%s1241_s13 + $0x24] ss:$8 sps:$4 sm:$0xff]   ;;  %v1130_v26 = vld [vmem:[%s1241_s13 + $0x20] ss:$8 sps:$4 sm:$0xff]  }
  0x13   : > { %968 = vmatpush3.bf16.msra.mxu0 %v1105_v7  ;;  %1084 = vmatpush3.bf16.msra.mxu1 %v1105_v7  ;;  %v1125_v23 = vld [vmem:[%s1241_s13 + $0x90] ss:$8 sps:$4 sm:$0xff]   ;;  %v1128_v25 = vld [vmem:[%s1241_s13 + $0xa4] ss:$8 sps:$4 sm:$0xff]   ;;  %v1131_v27 = vld [vmem:[%s1241_s13 + $0xa0] ss:$8 sps:$4 sm:$0xff]  }
  0x14   : > { %969 = vmatprep.subr.bf16.mxu0 %v1106_v8  ;;  %1077 = vmatprep.subr.bf16.mxu1 %v1106_v8  ;;  %v1132_v28 = vld [vmem:[%s1241_s13 + $0x34] ss:$8 sps:$4 sm:$0xff]   ;;  %v1136_v30 = vld [vmem:[%s1241_s13 + $0x30] ss:$8 sps:$4 sm:$0xff]   ;;  %v1138_v32 = vld [vmem:[%s1241_s13 + $0x44] ss:$8 sps:$4 sm:$0xff]  }
  0x15   : > { %v1134_v29 = vld [vmem:[%s1241_s13 + $0xb4] ss:$8 sps:$4 sm:$0xff]   ;;  %v1137_v31 = vld [vmem:[%s1241_s13 + $0xb0] ss:$8 sps:$4 sm:$0xff]   ;;  %v1140_v33 = vld [vmem:[%s1241_s13 + $0xc4] ss:$8 sps:$4 sm:$0xff]  }
  0x16   : > { %v1142_v34 = vld [vmem:[%s1241_s13 + $0x40] ss:$8 sps:$4 sm:$0xff]   ;;  %v1144_v36 = vld [vmem:[%s1241_s13 + $0x54] ss:$8 sps:$4 sm:$0xff]   ;;  %v1148_v38 = vld [vmem:[%s1241_s13 + $0x50] ss:$8 sps:$4 sm:$0xff]  }
  0x17   : > { %970 = vmatpush3.bf16.msra.mxu0 %v1107_v9  ;;  %1085 = vmatpush3.bf16.msra.mxu1 %v1107_v9  ;;  %v1143_v35 = vld [vmem:[%s1241_s13 + $0xc0] ss:$8 sps:$4 sm:$0xff]   ;;  %v1146_v37 = vld [vmem:[%s1241_s13 + $0xd4] ss:$8 sps:$4 sm:$0xff]   ;;  %v1149_v39 = vld [vmem:[%s1241_s13 + $0xd0] ss:$8 sps:$4 sm:$0xff]  }
  0x18   : > { %971 = vmatprep.subr.bf16.mxu0 %v1108_v10  ;;  %1078 = vmatprep.subr.bf16.mxu1 %v1108_v10  ;;  %v1150_v40 = vld [vmem:[%s1241_s13 + $0x64] ss:$8 sps:$4 sm:$0xff]   ;;  %v1154_v42 = vld [vmem:[%s1241_s13 + $0x60] ss:$8 sps:$4 sm:$0xff]   ;;  %v1156_v44 = vld [vmem:[%s1241_s13 + $0x74] ss:$8 sps:$4 sm:$0xff]  }
  0x19   : > { %v1152_v41 = vld [vmem:[%s1241_s13 + $0xe4] ss:$8 sps:$4 sm:$0xff]   ;;  %v1155_v43 = vld [vmem:[%s1241_s13 + $0xe0] ss:$8 sps:$4 sm:$0xff]   ;;  %v1158_v45 = vld [vmem:[%s1241_s13 + $0xf4] ss:$8 sps:$4 sm:$0xff]  }
  0x1a   : > { %v1160_v46 = vld [vmem:[%s1241_s13 + $0x70] ss:$8 sps:$4 sm:$0xff]  }
  0x1b   : > { %972 = vmatpush3.bf16.msra.mxu0 %v1109_v13  ;;  %1086 = vmatpush3.bf16.msra.mxu1 %v1109_v13  ;;  %v1161_v47 = vld [vmem:[%s1241_s13 + $0xf0] ss:$8 sps:$4 sm:$0xff]  }
  0x1c   : > { %973 = vmatprep.subr.bf16.mxu0 %v1110_v14  ;;  %1079 = vmatprep.subr.bf16.mxu1 %v1110_v14 }
  0x1f   : > { %974 = vmatpush3.bf16.msra.mxu0 %v1111_v15  ;;  %1087 = vmatpush3.bf16.msra.mxu1 %v1111_v15 }
  0x20   : > { %975 = vmatprep.subr.bf16.mxu0 %v1112_v16  ;;  %1080 = vmatprep.subr.bf16.mxu1 %v1112_v16 }
  0x23   : > { %976 = vmatpush3.bf16.msra.mxu0 %v1113_v17  ;;  %1088 = vmatpush3.bf16.msra.mxu1 %v1113_v17 }
  0x26   : > { %553 = vmatmul.mubr.bf16.vlgmr.msra.gmra.mrb[0].mxu0 %v1114_v18  ;;  %617 = vmatmul.mubr.bf16.vlgmr.msra.gmra.mrb[0].mxu1 %v1117_v19 }
  0x27   : > { %560 = vmatprep.mubr.bf16.mxu0 %v1120_v20  ;;  %624 = vmatprep.mubr.bf16.mxu1 %v1122_v21 }
  0x2e   : > { %561 = vmatmul.mubr.bf16.gmra.mrb[4].mxu0 %v1124_v22  ;;  %625 = vmatmul.mubr.bf16.gmra.mrb[4].mxu1 %v1125_v23 }
  0x2f   : > { %568 = vmatprep.mubr.bf16.mxu0 %v1126_v24  ;;  %632 = vmatprep.mubr.bf16.mxu1 %v1128_v25 }
  0x36   : > { %569 = vmatmul.mubr.bf16.gmra.mrb[8].mxu0 %v1130_v26  ;;  %633 = vmatmul.mubr.bf16.gmra.mrb[8].mxu1 %v1131_v27 }
  0x37   : > { %576 = vmatprep.mubr.bf16.mxu0 %v1132_v28  ;;  %640 = vmatprep.mubr.bf16.mxu1 %v1134_v29 }
  0x3e   : > { %577 = vmatmul.mubr.bf16.gmra.mrb[12].mxu0 %v1136_v30  ;;  %641 = vmatmul.mubr.bf16.gmra.mrb[12].mxu1 %v1137_v31 }
  0x3f   : > { %584 = vmatprep.mubr.bf16.mxu0 %v1138_v32  ;;  %648 = vmatprep.mubr.bf16.mxu1 %v1140_v33 }
  0x46   : > { %585 = vmatmul.mubr.bf16.gmra.mrb[16].mxu0 %v1142_v34  ;;  %649 = vmatmul.mubr.bf16.gmra.mrb[16].mxu1 %v1143_v35 }
  0x47   : > { %592 = vmatprep.mubr.bf16.mxu0 %v1144_v36  ;;  %656 = vmatprep.mubr.bf16.mxu1 %v1146_v37 }
  0x4e   : > { %593 = vmatmul.mubr.bf16.gmra.mrb[20].mxu0 %v1148_v38  ;;  %657 = vmatmul.mubr.bf16.gmra.mrb[20].mxu1 %v1149_v39 }
  0x4f   : > { %600 = vmatprep.mubr.bf16.mxu0 %v1150_v40  ;;  %664 = vmatprep.mubr.bf16.mxu1 %v1152_v41 }
  0x56   : > { %601 = vmatmul.mubr.bf16.gmra.mrb[24].mxu0 %v1154_v42  ;;  %665 = vmatmul.mubr.bf16.gmra.mrb[24].mxu1 %v1155_v43 }
  0x57   : > { %608 = vmatprep.mubr.bf16.mxu0 %v1156_v44  ;;  %672 = vmatprep.mubr.bf16.mxu1 %v1158_v45 }
  0x5e   : > { %609 = vmatmul.mubr.bf16.gmra.mrb[28].mxu0 %v1160_v46  ;;  %673 = vmatmul.mubr.bf16.gmra.mrb[28].mxu1 %v1161_v47 }
  0xf9   : > { %v977_v48 = vpop.f32.mrb[0].mxu0  ;;  %v1025_v49 = vpop.f32.mrb[0].mxu1 }
  0xfa   : > { %v978_v50 = vpop.f32.mrb[1].mxu0  ;;  %v1026_v51 = vpop.f32.mrb[1].mxu1 }
  0xfb   : > { %v1303_v52 = vadd.f32 %v978_v50, %v977_v48  ;;  %v1305_v53 = vadd.f32 %v1026_v51, %v1025_v49  ;;  %v980_v54 = vpop.f32.mrb[2].mxu0  ;;  %v1028_v55 = vpop.f32.mrb[2].mxu1 }
  0xfc   : > { %v981_v56 = vpop.f32.mrb[3].mxu0  ;;  %v1029_v57 = vpop.f32.mrb[3].mxu1 }
  0xfd   : > { %681 = vst [vmem:[%s1301_s7] sm:$0xff] %v1303_v52  ;;  %697 = vst [vmem:[%s1301_s7 + $0x80] sm:$0xff] %v1305_v53  ;;  %v1311_v58 = vadd.f32 %v981_v56, %v980_v54  ;;  %v1313_v59 = vadd.f32 %v1029_v57, %v1028_v55 }
  0xff   : > { %682 = vst [vmem:[%s1301_s7 + $0x8] sm:$0xff] %v1311_v58  ;;  %698 = vst [vmem:[%s1301_s7 + $0x88] sm:$0xff] %v1313_v59 }
 0x101   : > { %v983_v60 = vpop.f32.mrb[4].mxu0  ;;  %v1031_v61 = vpop.f32.mrb[4].mxu1 }
 0x102   : > { %v984_v62 = vpop.f32.mrb[5].mxu0  ;;  %v1032_v63 = vpop.f32.mrb[5].mxu1 }
 0x103   : > { %v1319_v0 = vadd.f32 %v984_v62, %v983_v60  ;;  %v1321_v1 = vadd.f32 %v1032_v63, %v1031_v61  ;;  %v986_v2 = vpop.f32.mrb[6].mxu0  ;;  %v1034_v3 = vpop.f32.mrb[6].mxu1 }
 0x104   : > { %v987_v4 = vpop.f32.mrb[7].mxu0  ;;  %v1035_v5 = vpop.f32.mrb[7].mxu1 }
 0x105   : > { %683 = vst [vmem:[%s1301_s7 + $0x10] sm:$0xff] %v1319_v0  ;;  %699 = vst [vmem:[%s1301_s7 + $0x90] sm:$0xff] %v1321_v1  ;;  %v1327_v6 = vadd.f32 %v987_v4, %v986_v2  ;;  %v1329_v7 = vadd.f32 %v1035_v5, %v1034_v3 }
 0x107   : > { %684 = vst [vmem:[%s1301_s7 + $0x18] sm:$0xff] %v1327_v6  ;;  %700 = vst [vmem:[%s1301_s7 + $0x98] sm:$0xff] %v1329_v7 }
 0x109   : > { %v989_v8 = vpop.f32.mrb[8].mxu0  ;;  %v1037_v9 = vpop.f32.mrb[8].mxu1 }
 0x10a   : > { %v990_v10 = vpop.f32.mrb[9].mxu0  ;;  %v1038_v11 = vpop.f32.mrb[9].mxu1 }
 0x10b   : > { %v1335_v12 = vadd.f32 %v990_v10, %v989_v8  ;;  %v1337_v13 = vadd.f32 %v1038_v11, %v1037_v9  ;;  %v992_v14 = vpop.f32.mrb[10].mxu0  ;;  %v1040_v15 = vpop.f32.mrb[10].mxu1 }
 0x10c   : > { %v993_v16 = vpop.f32.mrb[11].mxu0  ;;  %v1041_v17 = vpop.f32.mrb[11].mxu1 }
 0x10d   : > { %685 = vst [vmem:[%s1301_s7 + $0x20] sm:$0xff] %v1335_v12  ;;  %701 = vst [vmem:[%s1301_s7 + $0xa0] sm:$0xff] %v1337_v13  ;;  %v1343_v18 = vadd.f32 %v993_v16, %v992_v14  ;;  %v1345_v19 = vadd.f32 %v1041_v17, %v1040_v15 }
 0x10f   : > { %686 = vst [vmem:[%s1301_s7 + $0x28] sm:$0xff] %v1343_v18  ;;  %702 = vst [vmem:[%s1301_s7 + $0xa8] sm:$0xff] %v1345_v19 }
 0x111   : > { %v995_v20 = vpop.f32.mrb[12].mxu0  ;;  %v1043_v21 = vpop.f32.mrb[12].mxu1 }
 0x112   : > { %v996_v22 = vpop.f32.mrb[13].mxu0  ;;  %v1044_v23 = vpop.f32.mrb[13].mxu1 }
 0x113   : > { %v1351_v24 = vadd.f32 %v996_v22, %v995_v20  ;;  %v1353_v25 = vadd.f32 %v1044_v23, %v1043_v21  ;;  %v998_v26 = vpop.f32.mrb[14].mxu0  ;;  %v1046_v27 = vpop.f32.mrb[14].mxu1 }
 0x114   : > { %v999_v28 = vpop.f32.mrb[15].mxu0  ;;  %v1047_v29 = vpop.f32.mrb[15].mxu1 }
 0x115   : > { %687 = vst [vmem:[%s1301_s7 + $0x30] sm:$0xff] %v1351_v24  ;;  %703 = vst [vmem:[%s1301_s7 + $0xb0] sm:$0xff] %v1353_v25  ;;  %v1359_v30 = vadd.f32 %v999_v28, %v998_v26  ;;  %v1361_v31 = vadd.f32 %v1047_v29, %v1046_v27 }
 0x117   : > { %688 = vst [vmem:[%s1301_s7 + $0x38] sm:$0xff] %v1359_v30  ;;  %704 = vst [vmem:[%s1301_s7 + $0xb8] sm:$0xff] %v1361_v31 }
 0x119   : > { %v1001_v32 = vpop.f32.mrb[16].mxu0  ;;  %v1049_v33 = vpop.f32.mrb[16].mxu1 }
 0x11a   : > { %v1002_v34 = vpop.f32.mrb[17].mxu0  ;;  %v1050_v35 = vpop.f32.mrb[17].mxu1 }
 0x11b   : > { %v1367_v36 = vadd.f32 %v1002_v34, %v1001_v32  ;;  %v1369_v37 = vadd.f32 %v1050_v35, %v1049_v33  ;;  %v1004_v38 = vpop.f32.mrb[18].mxu0  ;;  %v1052_v39 = vpop.f32.mrb[18].mxu1  ;;  %v1170_v32 = vmov (!%p957_p4), 0.0  }
 0x11c   : > { %v1005_v40 = vpop.f32.mrb[19].mxu0  ;;  %v1053_v41 = vpop.f32.mrb[19].mxu1  ;;  %717 = vst [vmem:[%s1541_s3] sm:$0x1] (!%p957_p4), %v1170_v32  ;;  %718 = vst [vmem:[%s1542_s4] sm:$0x1] (!%p957_p4), %v1170_v32 }
 0x11d   : > { %689 = vst [vmem:[%s1301_s7 + $0x40] sm:$0xff] %v1367_v36  ;;  %705 = vst [vmem:[%s1301_s7 + $0xc0] sm:$0xff] %v1369_v37  ;;  %v1375_v42 = vadd.f32 %v1005_v40, %v1004_v38  ;;  %v1377_v43 = vadd.f32 %v1053_v41, %v1052_v39 }
 0x11f   : > { %690 = vst [vmem:[%s1301_s7 + $0x48] sm:$0xff] %v1375_v42  ;;  %706 = vst [vmem:[%s1301_s7 + $0xc8] sm:$0xff] %v1377_v43 }
 0x121   : > { %v1007_v44 = vpop.f32.mrb[20].mxu0  ;;  %v1055_v45 = vpop.f32.mrb[20].mxu1 }
 0x122   : > { %v1008_v46 = vpop.f32.mrb[21].mxu0  ;;  %v1056_v47 = vpop.f32.mrb[21].mxu1 }
 0x123   : > { %v1383_v48 = vadd.f32 %v1008_v46, %v1007_v44  ;;  %v1385_v49 = vadd.f32 %v1056_v47, %v1055_v45  ;;  %v1010_v50 = vpop.f32.mrb[22].mxu0  ;;  %v1058_v51 = vpop.f32.mrb[22].mxu1 }
 0x124   : > { %v1011_v54 = vpop.f32.mrb[23].mxu0  ;;  %v1059_v55 = vpop.f32.mrb[23].mxu1 }
 0x125   : > { %691 = vst [vmem:[%s1301_s7 + $0x50] sm:$0xff] %v1383_v48  ;;  %707 = vst [vmem:[%s1301_s7 + $0xd0] sm:$0xff] %v1385_v49  ;;  %v1391_v56 = vadd.f32 %v1011_v54, %v1010_v50  ;;  %v1393_v57 = vadd.f32 %v1059_v55, %v1058_v51 }
 0x127   : > { %692 = vst [vmem:[%s1301_s7 + $0x58] sm:$0xff] %v1391_v56  ;;  %708 = vst [vmem:[%s1301_s7 + $0xd8] sm:$0xff] %v1393_v57 }
 0x129   : > { %v1013_v60 = vpop.f32.mrb[24].mxu0  ;;  %v1061_v61 = vpop.f32.mrb[24].mxu1 }
 0x12a   : > { %v1014_v62 = vpop.f32.mrb[25].mxu0  ;;  %v1062_v63 = vpop.f32.mrb[25].mxu1 }
 0x12b   : > { %v1399_v2 = vadd.f32 %v1014_v62, %v1013_v60  ;;  %v1401_v3 = vadd.f32 %v1062_v63, %v1061_v61  ;;  %v1016_v4 = vpop.f32.mrb[26].mxu0  ;;  %v1064_v5 = vpop.f32.mrb[26].mxu1 }
 0x12c   : > { %v1017_v8 = vpop.f32.mrb[27].mxu0  ;;  %v1065_v9 = vpop.f32.mrb[27].mxu1 }
 0x12d   : > { %693 = vst [vmem:[%s1301_s7 + $0x60] sm:$0xff] %v1399_v2  ;;  %709 = vst [vmem:[%s1301_s7 + $0xe0] sm:$0xff] %v1401_v3  ;;  %v1407_v10 = vadd.f32 %v1017_v8, %v1016_v4  ;;  %v1409_v11 = vadd.f32 %v1065_v9, %v1064_v5 }
 0x12f   : > { %694 = vst [vmem:[%s1301_s7 + $0x68] sm:$0xff] %v1407_v10  ;;  %710 = vst [vmem:[%s1301_s7 + $0xe8] sm:$0xff] %v1409_v11 }
 0x131   : > { %v1019_v14 = vpop.f32.mrb[28].mxu0  ;;  %v1067_v15 = vpop.f32.mrb[28].mxu1  ;;  %716 = sbr.rel (%p957_p4) target bundleno = 312 (0x138), region = 32 }
 0x132   : > { %v1020_v16 = vpop.f32.mrb[29].mxu0  ;;  %v1068_v17 = vpop.f32.mrb[29].mxu1 }
 0x133   : > { %v1021_v20 = vadd.f32 %v1020_v16, %v1019_v14  ;;  %v1415_v21 = vadd.f32 %v1068_v17, %v1067_v15  ;;  %v1022_v22 = vpop.f32.mrb[30].mxu0  ;;  %v1070_v23 = vpop.f32.mrb[30].mxu1 }
 0x134   : > { %v1023_v26 = vpop.f32.mrb[31].mxu0  ;;  %v1071_v27 = vpop.f32.mrb[31].mxu1 }
 0x135   : > { %695 = vst [vmem:[%s1301_s7 + $0x70] sm:$0xff] %v1021_v20  ;;  %711 = vst [vmem:[%s1301_s7 + $0xf0] sm:$0xff] %v1415_v21  ;;  %v1024_v28 = vadd.f32 %v1023_v26, %v1022_v22  ;;  %v1420_v29 = vadd.f32 %v1071_v27, %v1070_v23 }
 0x137   : > { %696 = vst [vmem:[%s1301_s7 + $0x78] sm:$0xff] %v1024_v28  ;;  %712 = vst [vmem:[%s1301_s7 + $0xf8] sm:$0xff] %v1420_v29 }
 0x138 PF: > { %v720_v33 = vadd.f32 %v1311_v58, %v1303_v52  ;;  %v760_v38 = vmul.f32 %v1303_v52, %v1303_v52  ;;  %v761_v39 = vmul.f32 %v1311_v58, %v1311_v58  ;;  %v762_v41 = vmul.f32 %v1319_v0, %v1319_v0 }
 0x139   : > { %v763_v45 = vmul.f32 %v1327_v6, %v1327_v6  ;;  %v764_v50 = vmul.f32 %v1335_v12, %v1335_v12  ;;  %v765_v58 = vmul.f32 %v1343_v18, %v1343_v18  ;;  %v766_v55 = vmul.f32 %v1351_v24, %v1351_v24 }
 0x13a   : > { %v721_v34 = vadd.f32 %v1319_v0, %v720_v33  ;;  %v792_v46 = vadd.f32 %v761_v39, %v760_v38  ;;  %v767_v61 = vmul.f32 %v1359_v30, %v1359_v30  ;;  %v768_v63 = vmul.f32 %v1367_v36, %v1367_v36 }
 0x13b   : > { %v769_v5 = vmul.f32 %v1375_v42, %v1375_v42  ;;  %v770_v9 = vmul.f32 %v1383_v48, %v1383_v48  ;;  %v771_v15 = vmul.f32 %v1391_v56, %v1391_v56  ;;  %v772_v17 = vmul.f32 %v1399_v2, %v1399_v2 }
 0x13c   : > { %v722_v35 = vadd.f32 %v1327_v6, %v721_v34  ;;  %v793_v52 = vadd.f32 %v792_v46, %v762_v41  ;;  %v775_v34 = vmul.f32 %v1024_v28, %v1024_v28  ;;  %v776_v38 = vmul.f32 %v1305_v53, %v1305_v53 }
 0x13e   : > { %v723_v40 = vadd.f32 %v1335_v12, %v722_v35  ;;  %v794_v54 = vadd.f32 %v793_v52, %v763_v45  ;;  %v779_v45 = vmul.f32 %v1329_v7, %v1329_v7  ;;  %v781_v52 = vmul.f32 %v1345_v19, %v1345_v19 }
 0x140   : > { %v724_v44 = vadd.f32 %v1343_v18, %v723_v40  ;;  %v795_v60 = vadd.f32 %v794_v54, %v764_v50 }
 0x142   : > { %v725_v47 = vadd.f32 %v1351_v24, %v724_v44  ;;  %v796_v62 = vadd.f32 %v795_v60, %v765_v58  ;;  %v782_v58 = vmul.f32 %v1353_v25, %v1353_v25  ;;  %v784_v60 = vmul.f32 %v1369_v37, %v1369_v37 }
 0x144   : > { %v726_v51 = vadd.f32 %v1359_v30, %v725_v47  ;;  %v797_v4 = vadd.f32 %v796_v62, %v766_v55  ;;  %v780_v47 = vmul.f32 %v1337_v13, %v1337_v13 }
 0x146   : > { %v727_v0 = vadd.f32 %v1367_v36, %v726_v51  ;;  %v798_v8 = vadd.f32 %v797_v4, %v767_v61  ;;  %v785_v61 = vmul.f32 %v1377_v43, %v1377_v43  ;;  %v787_v4 = vmul.f32 %v1393_v57, %v1393_v57 }
 0x148   : > { %v728_v6 = vadd.f32 %v1375_v42, %v727_v0  ;;  %v799_v14 = vadd.f32 %v798_v8, %v768_v63  ;;  %v773_v42 = vmul.f32 %v1407_v10, %v1407_v10  ;;  %v783_v0 = vmul.f32 %v1361_v31, %v1361_v31 }
 0x14a   : > { %v729_v12 = vadd.f32 %v1383_v48, %v728_v6  ;;  %v800_v16 = vadd.f32 %v799_v14, %v769_v5  ;;  %v774_v48 = vmul.f32 %v1021_v20, %v1021_v20  ;;  %v788_v5 = vmul.f32 %v1401_v3, %v1401_v3 }
 0x14b   : > { %v790_v14 = vmul.f32 %v1415_v21, %v1415_v21 }
 0x14c   : > { %v730_v18 = vadd.f32 %v1391_v56, %v729_v12  ;;  %v801_v22 = vadd.f32 %v800_v16, %v770_v9  ;;  %v786_v12 = vmul.f32 %v1385_v49, %v1385_v49 }
 0x14e   : > { %v731_v24 = vadd.f32 %v1399_v2, %v730_v18  ;;  %v802_v26 = vadd.f32 %v801_v22, %v771_v15 }
 0x150   : > { %v732_v30 = vadd.f32 %v1407_v10, %v731_v24  ;;  %v803_v32 = vadd.f32 %v802_v26, %v772_v17  ;;  %v777_v10 = vmul.f32 %v1313_v59, %v1313_v59  ;;  %v789_v24 = vmul.f32 %v1409_v11, %v1409_v11 }
 0x152   : > { %v733_v36 = vadd.f32 %v1021_v20, %v732_v30  ;;  %v804_v35 = vadd.f32 %v803_v32, %v773_v42  ;;  %v778_v20 = vmul.f32 %v1321_v1, %v1321_v1 }
 0x154   : > { %v734_v23 = vadd.f32 %v1024_v28, %v733_v36  ;;  %v805_v2 = vadd.f32 %v804_v35, %v774_v48 }
 0x156   : > { %v735_v27 = vadd.f32 %v1305_v53, %v734_v23  ;;  %v806_v40 = vadd.f32 %v805_v2, %v775_v34 }
 0x158   : > { %v736_v33 = vadd.f32 %v1313_v59, %v735_v27  ;;  %v807_v44 = vadd.f32 %v806_v40, %v776_v38 }
 0x15a   : > { %v737_v56 = vadd.f32 %v1321_v1, %v736_v33  ;;  %v808_v46 = vadd.f32 %v807_v44, %v777_v10  ;;  %v759_v33 = vld [vmem:[%s1542_s4] sm:$0x1] }
 0x15c   : > { %v738_v39 = vadd.f32 %v1329_v7, %v737_v56  ;;  %v809_v50 = vadd.f32 %v808_v46, %v778_v20 }
 0x15e   : > { %v739_v41 = vadd.f32 %v1337_v13, %v738_v39  ;;  %v810_v51 = vadd.f32 %v809_v50, %v779_v45 }
 0x160   : > { %v740_v28 = vadd.f32 %v1345_v19, %v739_v41  ;;  %v811_v54 = vadd.f32 %v810_v51, %v780_v47 }
 0x162   : > { %v741_v53 = vadd.f32 %v1353_v25, %v740_v28  ;;  %v812_v55 = vadd.f32 %v811_v54, %v781_v52 }
 0x164   : > { %v742_v59 = vadd.f32 %v1361_v31, %v741_v53  ;;  %v813_v6 = vadd.f32 %v812_v55, %v782_v58 }
 0x166   : > { %v743_v1 = vadd.f32 %v1369_v37, %v742_v59  ;;  %v814_v62 = vadd.f32 %v813_v6, %v783_v0 }
 0x168   : > { %v744_v7 = vadd.f32 %v1377_v43, %v743_v1  ;;  %v815_v63 = vadd.f32 %v814_v62, %v784_v60 }
 0x16a   : > { %v745_v13 = vadd.f32 %v1385_v49, %v744_v7  ;;  %v816_v18 = vadd.f32 %v815_v63, %v785_v61 }
 0x16c   : > { %v746_v19 = vadd.f32 %v1393_v57, %v745_v13  ;;  %v817_v8 = vadd.f32 %v816_v18, %v786_v12  ;;  %v791_v57 = vmul.f32 %v1420_v29, %v1420_v29 }
 0x16e   : > { %v747_v25 = vadd.f32 %v1401_v3, %v746_v19  ;;  %v818_v9 = vadd.f32 %v817_v8, %v787_v4 }
 0x170   : > { %v748_v31 = vadd.f32 %v1409_v11, %v747_v25  ;;  %v819_v30 = vadd.f32 %v818_v9, %v788_v5  ;;  %v719_v11 = vld [vmem:[%s1541_s3] sm:$0x1] }
 0x172   : > { %v749_v37 = vadd.f32 %v1415_v21, %v748_v31  ;;  %v820_v16 = vadd.f32 %v819_v30, %v789_v24 }
 0x174   : > { %v750_v43 = vadd.f32 %v1420_v29, %v749_v37  ;;  %v821_v17 = vadd.f32 %v820_v16, %v790_v14 }
 0x176   : > { %v751_v49 = vrot.slane %v750_v43, 4  ;;  %v822_v22 = vadd.f32 %v821_v17, %v791_v57 }
 0x178   : > { %v752_v15 = vadd.f32 %v751_v49, %v750_v43  ;;  %v823_v42 = vrot.slane %v822_v22, 4 }
 0x17a   : > { %v753_v36 = vrot.slane %v752_v15, 2  ;;  %v824_v27 = vadd.f32 %v823_v42, %v822_v22 }
 0x17c   : > { %v754_v3 = vadd.f32 %v753_v36, %v752_v15  ;;  %v825_v21 = vrot.slane %v824_v27, 2 }
 0x17e   : > { %v755_v23 = vrot.slane %v754_v3, 1  ;;  %v826_v29 = vadd.f32 %v825_v21, %v824_v27 }
 0x180   : > { %v756_v26 = vadd.f32 %v755_v23, %v754_v3  ;;  %v827_v32 = vrot.slane %v826_v29, 1 }
 0x182   : > { %v757_v48 = vadd.f32 %v756_v26, %v719_v11  ;;  %v828_v34 = vadd.f32 %v827_v32, %v826_v29 }
 0x184   : > { %758 = vst [vmem:[%s1541_s3] sm:$0x1] %v757_v48  ;;  %v829_v35 = vadd.f32 %v828_v34, %v759_v33 }
 0x186   : > { %830 = vst [vmem:[%s1542_s4] sm:$0x1] %v829_v35 }
 0x187 PF: > { %s15_s15 = sadd.s32 1, %s1168_s15  }
 0x188   : > { %p12_p5 = scmp.ge.s32.totalorder %s15_s15, 34  }
 0x18a   :  { %14 = sbr.rel (!%p12_p5) target bundleno = 1 (0x1), region = 78 }

// kernel: resize_forward.21
= control target key start
LH: loop header
LB: loop body
LE: loop exit
PB: predicated region body
PF: predicated region fallthrough
CT: control target
= control target key end

     0   :  { %s453_s12 = smov 0   ;;  %s612_s0 = inlined_call_operand.vmem [shape: f32[8192,128], index: 0, kind: input, shape index: {}]   ;;  %s613_s1 = inlined_call_operand.vmem [shape: f32[1,128], index: 1, kind: input, shape index: {}]   ;;  %s614_s2 = inlined_call_operand.vmem [shape: f32[1,128], index: 2, kind: input, shape index: {}]   ;;  %s615_s3 = inlined_call_operand.vmem [shape: f32[8192,128], index: 3, kind: output, shape index: {}]  }
   0x1 LB: > { %s404_s13 = sadd.s32 4294967295, %s431_s12   ;;  %p408_p0 = scmp.ge.s32.totalorder %s431_s12, 1  ;;  %s431_s12 = sphi %s453_s12, %s13_s12  }
   0x2   : > { %p138_p1 = scmp.lt.s32.totalorder %s431_s12, 33 }
   0x4   : > { %p139_p2 = pnand %p408_p0, %p138_p1 }
   0x5   : > { %s409_s14 = sshll.u32 (!%p139_p2), %s404_s13, 5  ;;  %v464_v0 = vld [vmem:[%s613_s1] ss:$0 sm:$0xff] (!%p139_p2) }
   0x6   : > { %142 = sbr.rel (%p139_p2) target bundleno = 46 (0x2e), region = 32  ;;  %p163_p3 = scmp.lt.s32.totalorder (!%p139_p2), %s409_s14, 1023  ;;  %v474_v1 = vld [vmem:[%s614_s2] ss:$0 sm:$0xff] (!%p139_p2) }
   0xd   : > { %s617_s14 = smov (!%p163_p3, %s409_s14), 1023 }
   0xe   : > { %s410_s15 = sshll.u32 %s617_s14, 3 }
   0xf   : > { %s469_s20 = scalar_lea.vmem %s612_s0, %s410_s15  ;;  %s497_s25 = scalar_lea.vmem %s615_s3, %s410_s15 }
  0x10   : > { %v174_v2 = vld [vmem:[%s469_s20] sm:$0xff]  ;;  %v175_v3 = vld [vmem:[%s469_s20 + $0x8] sm:$0xff]  ;;  %v176_v4 = vld [vmem:[%s469_s20 + $0x10] sm:$0xff] }
  0x11   : > { %v213_v5 = vmul.f32 %v464_v0, %v174_v2  ;;  %v214_v6 = vmul.f32 %v464_v0, %v175_v3  ;;  %v215_v7 = vmul.f32 %v464_v0, %v176_v4  ;;  %v177_v8 = vld [vmem:[%s469_s20 + $0x18] sm:$0xff]  ;;  %v178_v9 = vld [vmem:[%s469_s20 + $0x20] sm:$0xff]  ;;  %v179_v10 = vld [vmem:[%s469_s20 + $0x28] sm:$0xff] }
  0x12   : > { %v216_v11 = vmul.f32 %v464_v0, %v177_v8  ;;  %v217_v12 = vmul.f32 %v464_v0, %v178_v9  ;;  %v218_v13 = vmul.f32 %v464_v0, %v179_v10  ;;  %v180_v14 = vld [vmem:[%s469_s20 + $0x30] sm:$0xff]  ;;  %v181_v15 = vld [vmem:[%s469_s20 + $0x38] sm:$0xff]  ;;  %v182_v24 = vld [vmem:[%s469_s20 + $0x40] sm:$0xff] }
  0x13   : > { %v252_v16 = vadd.f32 %v474_v1, %v213_v5  ;;  %v253_v17 = vadd.f32 %v474_v1, %v214_v6  ;;  %v254_v18 = vadd.f32 %v474_v1, %v215_v7  ;;  %v219_v19 = vmul.f32 %v464_v0, %v180_v14  ;;  %v183_v25 = vld [vmem:[%s469_s20 + $0x48] sm:$0xff]  ;;  %v184_v26 = vld [vmem:[%s469_s20 + $0x50] sm:$0xff]  ;;  %v185_v31 = vld [vmem:[%s469_s20 + $0x58] sm:$0xff] }
  0x14   : > { %v255_v20 = vadd.f32 %v474_v1, %v216_v11  ;;  %v256_v21 = vadd.f32 %v474_v1, %v217_v12  ;;  %v257_v22 = vadd.f32 %v474_v1, %v218_v13  ;;  %v220_v23 = vmul.f32 %v464_v0, %v181_v15  ;;  %v186_v32 = vld [vmem:[%s469_s20 + $0x60] sm:$0xff]  ;;  %v187_v33 = vld [vmem:[%s469_s20 + $0x68] sm:$0xff]  ;;  %v188_v38 = vld [vmem:[%s469_s20 + $0x70] sm:$0xff] }
  0x15   : > { %v284_v27 = vmax.f32 %v252_v16, 0.0  ;;  %v285_v28 = vmax.f32 %v253_v17, 0.0  ;;  %v286_v29 = vmax.f32 %v254_v18, 0.0  ;;  %v258_v30 = vadd.f32 %v474_v1, %v219_v19  ;;  %v189_v43 = vld [vmem:[%s469_s20 + $0x78] sm:$0xff]  ;;  %v190_v56 = vld [vmem:[%s469_s20 + $0x80] sm:$0xff]  ;;  %v191_v57 = vld [vmem:[%s469_s20 + $0x88] sm:$0xff] }
  0x16   : > { %v287_v34 = vmax.f32 %v255_v20, 0.0  ;;  %v288_v35 = vmax.f32 %v256_v21, 0.0  ;;  %v289_v36 = vmax.f32 %v257_v22, 0.0  ;;  %v259_v37 = vadd.f32 %v474_v1, %v220_v23  ;;  %v192_v58 = vld [vmem:[%s469_s20 + $0x90] sm:$0xff]  ;;  %v193_v63 = vld [vmem:[%s469_s20 + $0x98] sm:$0xff]  ;;  %v194_v2 = vld [vmem:[%s469_s20 + $0xa0] sm:$0xff] }
  0x17   : > { %316 = vst [vmem:[%s497_s25] sm:$0xff] %v284_v27  ;;  %317 = vst [vmem:[%s497_s25 + $0x8] sm:$0xff] %v285_v28  ;;  %v290_v39 = vmax.f32 %v258_v30, 0.0  ;;  %v221_v40 = vmul.f32 %v464_v0, %v182_v24  ;;  %v222_v41 = vmul.f32 %v464_v0, %v183_v25  ;;  %v223_v42 = vmul.f32 %v464_v0, %v184_v26  ;;  %v195_v3 = vld [vmem:[%s469_s20 + $0xa8] sm:$0xff]  ;;  %v196_v8 = vld [vmem:[%s469_s20 + $0xb0] sm:$0xff] }
  0x18   : > { %318 = vst [vmem:[%s497_s25 + $0x10] sm:$0xff] %v286_v29  ;;  %319 = vst [vmem:[%s497_s25 + $0x18] sm:$0xff] %v287_v34  ;;  %v291_v44 = vmax.f32 %v259_v37, 0.0  ;;  %v224_v45 = vmul.f32 %v464_v0, %v185_v31  ;;  %v225_v46 = vmul.f32 %v464_v0, %v186_v32  ;;  %v226_v47 = vmul.f32 %v464_v0, %v187_v33  ;;  %v197_v13 = vld [vmem:[%s469_s20 + $0xb8] sm:$0xff]  ;;  %v198_v26 = vld [vmem:[%s469_s20 + $0xc0] sm:$0xff] }
  0x19   : > { %320 = vst [vmem:[%s497_s25 + $0x20] sm:$0xff] %v288_v35  ;;  %321 = vst [vmem:[%s497_s25 + $0x28] sm:$0xff] %v289_v36  ;;  %v260_v48 = vadd.f32 %v474_v1, %v221_v40  ;;  %v261_v49 = vadd.f32 %v474_v1, %v222_v41  ;;  %v262_v50 = vadd.f32 %v474_v1, %v223_v42  ;;  %v199_v27 = vld [vmem:[%s469_s20 + $0xc8] sm:$0xff]  ;;  %v200_v28 = vld [vmem:[%s469_s20 + $0xd0] sm:$0xff] }
  0x1a   : > { %322 = vst [vmem:[%s497_s25 + $0x30] sm:$0xff] %v290_v39  ;;  %v227_v51 = vmul.f32 %v464_v0, %v188_v38  ;;  %323 = vst [vmem:[%s497_s25 + $0x38] sm:$0xff] %v291_v44  ;;  %v263_v52 = vadd.f32 %v474_v1, %v224_v45  ;;  %v264_v53 = vadd.f32 %v474_v1, %v225_v46  ;;  %v201_v33 = vld [vmem:[%s469_s20 + $0xd8] sm:$0xff]  ;;  %v202_v34 = vld [vmem:[%s469_s20 + $0xe0] sm:$0xff] }
  0x1b   : > { %v265_v54 = vadd.f32 %v474_v1, %v226_v47  ;;  %v228_v55 = vmul.f32 %v464_v0, %v189_v43  ;;  %v292_v59 = vmax.f32 %v260_v48, 0.0  ;;  %v293_v60 = vmax.f32 %v261_v49, 0.0  ;;  %v203_v35 = vld [vmem:[%s469_s20 + $0xe8] sm:$0xff]  ;;  %v204_v40 = vld [vmem:[%s469_s20 + $0xf0] sm:$0xff]  ;;  %v205_v45 = vld [vmem:[%s469_s20 + $0xf8] sm:$0xff] }
  0x1c   : > { %v294_v61 = vmax.f32 %v262_v50, 0.0  ;;  %v266_v62 = vadd.f32 %v474_v1, %v227_v51  ;;  %v295_v4 = vmax.f32 %v263_v52, 0.0  ;;  %v296_v5 = vmax.f32 %v264_v53, 0.0 }
  0x1d   : > { %v297_v6 = vmax.f32 %v265_v54, 0.0  ;;  %v267_v7 = vadd.f32 %v474_v1, %v228_v55  ;;  %324 = vst [vmem:[%s497_s25 + $0x40] sm:$0xff] %v292_v59  ;;  %325 = vst [vmem:[%s497_s25 + $0x48] sm:$0xff] %v293_v60  ;;  %v229_v10 = vmul.f32 %v464_v0, %v190_v56  ;;  %v230_v11 = vmul.f32 %v464_v0, %v191_v57 }
  0x1e   : > { %326 = vst [vmem:[%s497_s25 + $0x50] sm:$0xff] %v294_v61  ;;  %v298_v9 = vmax.f32 %v266_v62, 0.0  ;;  %v231_v12 = vmul.f32 %v464_v0, %v192_v58  ;;  %327 = vst [vmem:[%s497_s25 + $0x58] sm:$0xff] %v295_v4  ;;  %v232_v15 = vmul.f32 %v464_v0, %v193_v63  ;;  %v233_v16 = vmul.f32 %v464_v0, %v194_v2 }
  0x1f   : > { %328 = vst [vmem:[%s497_s25 + $0x60] sm:$0xff] %v296_v5  ;;  %329 = vst [vmem:[%s497_s25 + $0x68] sm:$0xff] %v297_v6  ;;  %v299_v14 = vmax.f32 %v267_v7, 0.0  ;;  %v234_v17 = vmul.f32 %v464_v0, %v195_v3  ;;  %v268_v18 = vadd.f32 %v474_v1, %v229_v10  ;;  %v269_v19 = vadd.f32 %v474_v1, %v230_v11 }
  0x20   : > { %330 = vst [vmem:[%s497_s25 + $0x70] sm:$0xff] %v298_v9  ;;  %v270_v20 = vadd.f32 %v474_v1, %v231_v12  ;;  %v235_v21 = vmul.f32 %v464_v0, %v196_v8  ;;  %v271_v22 = vadd.f32 %v474_v1, %v232_v15  ;;  %v272_v23 = vadd.f32 %v474_v1, %v233_v16 }
  0x21   : > { %331 = vst [vmem:[%s497_s25 + $0x78] sm:$0xff] %v299_v14  ;;  %v273_v24 = vadd.f32 %v474_v1, %v234_v17  ;;  %v236_v25 = vmul.f32 %v464_v0, %v197_v13  ;;  %v300_v29 = vmax.f32 %v268_v18, 0.0  ;;  %v301_v30 = vmax.f32 %v269_v19, 0.0 }
  0x22   : > { %v302_v31 = vmax.f32 %v270_v20, 0.0  ;;  %v274_v32 = vadd.f32 %v474_v1, %v235_v21  ;;  %v303_v36 = vmax.f32 %v271_v22, 0.0  ;;  %v304_v37 = vmax.f32 %v272_v23, 0.0 }
  0x23   : > { %v305_v38 = vmax.f32 %v273_v24, 0.0  ;;  %v275_v39 = vadd.f32 %v474_v1, %v236_v25  ;;  %332 = vst [vmem:[%s497_s25 + $0x80] sm:$0xff] %v300_v29  ;;  %333 = vst [vmem:[%s497_s25 + $0x88] sm:$0xff] %v301_v30  ;;  %v237_v42 = vmul.f32 %v464_v0, %v198_v26  ;;  %v238_v43 = vmul.f32 %v464_v0, %v199_v27 }
  0x24   : > { %334 = vst [vmem:[%s497_s25 + $0x90] sm:$0xff] %v302_v31  ;;  %v306_v41 = vmax.f32 %v274_v32, 0.0  ;;  %v239_v44 = vmul.f32 %v464_v0, %v200_v28  ;;  %335 = vst [vmem:[%s497_s25 + $0x98] sm:$0xff] %v303_v36  ;;  %v240_v47 = vmul.f32 %v464_v0, %v201_v33  ;;  %v241_v48 = vmul.f32 %v464_v0, %v202_v34 }
  0x25   : > { %336 = vst [vmem:[%s497_s25 + $0xa0] sm:$0xff] %v304_v37  ;;  %337 = vst [vmem:[%s497_s25 + $0xa8] sm:$0xff] %v305_v38  ;;  %v307_v46 = vmax.f32 %v275_v39, 0.0  ;;  %v242_v49 = vmul.f32 %v464_v0, %v203_v35  ;;  %v276_v50 = vadd.f32 %v474_v1, %v237_v42  ;;  %v277_v51 = vadd.f32 %v474_v1, %v238_v43 }
  0x26   : > { %338 = vst [vmem:[%s497_s25 + $0xb0] sm:$0xff] %v306_v41  ;;  %v278_v52 = vadd.f32 %v474_v1, %v239_v44  ;;  %v243_v53 = vmul.f32 %v464_v0, %v204_v40  ;;  %v279_v54 = vadd.f32 %v474_v1, %v240_v47  ;;  %v280_v55 = vadd.f32 %v474_v1, %v241_v48 }
  0x27   : > { %339 = vst [vmem:[%s497_s25 + $0xb8] sm:$0xff] %v307_v46  ;;  %v281_v56 = vadd.f32 %v474_v1, %v242_v49  ;;  %v244_v57 = vmul.f32 %v464_v0, %v205_v45  ;;  %v308_v58 = vmax.f32 %v276_v50, 0.0  ;;  %v309_v59 = vmax.f32 %v277_v51, 0.0 }
  0x28   : > { %v310_v60 = vmax.f32 %v278_v52, 0.0  ;;  %v282_v61 = vadd.f32 %v474_v1, %v243_v53  ;;  %v311_v62 = vmax.f32 %v279_v54, 0.0  ;;  %v312_v63 = vmax.f32 %v280_v55, 0.0 }
  0x29   : > { %v313_v2 = vmax.f32 %v281_v56, 0.0  ;;  %v283_v3 = vadd.f32 %v474_v1, %v244_v57  ;;  %340 = vst [vmem:[%s497_s25 + $0xc0] sm:$0xff] %v308_v58  ;;  %341 = vst [vmem:[%s497_s25 + $0xc8] sm:$0xff] %v309_v59 }
  0x2a   : > { %342 = vst [vmem:[%s497_s25 + $0xd0] sm:$0xff] %v310_v60  ;;  %v314_v4 = vmax.f32 %v282_v61, 0.0  ;;  %343 = vst [vmem:[%s497_s25 + $0xd8] sm:$0xff] %v311_v62 }
  0x2b   : > { %344 = vst [vmem:[%s497_s25 + $0xe0] sm:$0xff] %v312_v63  ;;  %345 = vst [vmem:[%s497_s25 + $0xe8] sm:$0xff] %v313_v2  ;;  %v315_v0 = vmax.f32 %v283_v3, 0.0 }
  0x2c   : > { %346 = vst [vmem:[%s497_s25 + $0xf0] sm:$0xff] %v314_v4 }
  0x2d   : > { %347 = vst [vmem:[%s497_s25 + $0xf8] sm:$0xff] %v315_v0 }
  0x2e PF: > { %s13_s12 = sadd.s32 1, %s431_s12  }
  0x2f   : > { %p10_p4 = scmp.ge.s32.totalorder %s13_s12, 34  }
  0x31   :  { %12 = sbr.rel (!%p10_p4) target bundleno = 1 (0x1), region = 62 }

// kernel: resize_forward.22
= control target key start
LH: loop header
LB: loop body
LE: loop exit
PB: predicated region body
PF: predicated region fallthrough
CT: control target
= control target key end

     0   :  { %s959_s15 = smov 0   ;;  %s1216_s0 = inlined_call_operand.vmem [shape: bf16[8192,128], index: 0, kind: input, shape index: {}]   ;;  %s1217_s1 = inlined_call_operand.vmem [shape: bf16[128,128], index: 1, kind: input, shape index: {}]   ;;  %s1218_s2 = inlined_call_operand.vmem [shape: f32[8192,128], index: 2, kind: output, shape index: {0}]   ;;  %s1219_s3 = inlined_call_operand.vmem [shape: f32[1,128], index: 3, kind: output, shape index: {1}]   ;;  %s1220_s4 = inlined_call_operand.vmem [shape: f32[1,128], index: 4, kind: output, shape index: {2}]  }
   0x1 LB: > { %s768_s16 = sadd.s32 4294967295, %s931_s15   ;;  %p772_p0 = scmp.ge.s32.totalorder %s931_s15, 1  ;;  %s931_s15 = sphi %s959_s15, %s15_s15  }
   0x2   : > { %p158_p1 = scmp.lt.s32.totalorder %s931_s15, 33 }
   0x4   : > { %p159_p2 = pnand %p772_p0, %p158_p1 }
   0x5   : > { %v901_v0 = vld [vmem:[%s1217_s1] sm:$0xff] (!%p159_p2)   ;;  %s773_s19 = sshll.u32 (!%p159_p2), %s768_s16, 5  ;;  %v902_v1 = vld [vmem:[%s1217_s1 + $0x8] sm:$0xff] (!%p159_p2)   ;;  %v903_v2 = vld [vmem:[%s1217_s1 + $0x10] sm:$0xff] (!%p159_p2)   ;;  %p801_p4 = scmp.ne.s32.totalorder (!%p159_p2), %s768_s16, 0 }
   0x6   : > { %162 = sbr.rel (%p159_p2) target bundleno = 357 (0x165), region = 28  ;;  %p185_p3 = scmp.lt.s32.totalorder (!%p159_p2), %s773_s19, 1023  ;;  %828 = vmatprep.subr.bf16.mxu0 (!%p159_p2), %v901_v0  ;;  %876 = vmatprep.subr.bf16.mxu1 (!%p159_p2), %v901_v0  ;;  %v904_v3 = vld [vmem:[%s1217_s1 + $0x18] sm:$0xff] (!%p159_p2)   ;;  %v905_v6 = vld [vmem:[%s1217_s1 + $0x20] sm:$0xff] (!%p159_p2)   ;;  %v906_v7 = vld [vmem:[%s1217_s1 + $0x28] sm:$0xff] (!%p159_p2)  }
   0x7   : > { %829 = vmatpush3.bf16.msra.mxu0 (!%p159_p2), %v901_v0  ;;  %884 = vmatpush3.bf16.msra.mxu1 (!%p159_p2), %v901_v0  ;;  %v907_v8 = vld [vmem:[%s1217_s1 + $0x30] sm:$0xff] (!%p159_p2)   ;;  %v908_v9 = vld [vmem:[%s1217_s1 + $0x38] sm:$0xff] (!%p159_p2)  }
   0x8   : > { %830 = vmatprep.subr.bf16.mxu0 (!%p159_p2), %v902_v1  ;;  %877 = vmatprep.subr.bf16.mxu1 (!%p159_p2), %v902_v1 }
   0xb   : > { %831 = vmatpush3.bf16.msra.mxu0 (!%p159_p2), %v902_v1  ;;  %885 = vmatpush3.bf16.msra.mxu1 (!%p159_p2), %v902_v1 }
   0xc   : > { %832 = vmatprep.subr.bf16.mxu0 (!%p159_p2), %v903_v2  ;;  %878 = vmatprep.subr.bf16.mxu1 (!%p159_p2), %v903_v2 }
   0xd   : > { %s1222_s19 = smov (!%p185_p3, %s773_s19), 1023  ;;  %v933_v56 = vmov (!%p801_p4), 0.0  }
   0xe   : > { %s774_s24 = sshll.u32 %s1222_s19, 2  ;;  %s776_s12 = sshll.u32 %s1222_s19, 3  ;;  %586 = vst [vmem:[%s1219_s3] sm:$0x1] (!%p801_p4), %v933_v56  ;;  %587 = vst [vmem:[%s1220_s4] sm:$0x1] (!%p801_p4), %v933_v56 }
   0xf   : > { %s984_s27 = scalar_lea.vmem %s1216_s0, %s774_s24  ;;  %833 = vmatpush3.bf16.msra.mxu0 %v903_v2  ;;  %886 = vmatpush3.bf16.msra.mxu1 %v903_v2  ;;  %s1021_s17 = scalar_lea.vmem %s1218_s2, %s776_s12 }
  0x10   : > { %v909_v4 = vld [vmem:[%s984_s27] sm:$0xff]   ;;  %834 = vmatprep.subr.bf16.mxu0 %v904_v3  ;;  %879 = vmatprep.subr.bf16.mxu1 %v904_v3  ;;  %v911_v10 = vld [vmem:[%s984_s27 + $0x8] sm:$0xff]   ;;  %v913_v12 = vld [vmem:[%s984_s27 + $0x10] sm:$0xff]  }
  0x11   : > { %v910_v5 = vld [vmem:[%s984_s27 + $0x40] sm:$0xff]   ;;  %844 = vmatprep.mubr.bf16.mxu0 %v909_v4  ;;  %v912_v11 = vld [vmem:[%s984_s27 + $0x48] sm:$0xff]   ;;  %v914_v13 = vld [vmem:[%s984_s27 + $0x50] sm:$0xff]  }
  0x12   : > { %860 = vmatprep.mubr.bf16.mxu1 %v910_v5  ;;  %v915_v14 = vld [vmem:[%s984_s27 + $0x18] sm:$0xff]   ;;  %v917_v16 = vld [vmem:[%s984_s27 + $0x20] sm:$0xff]   ;;  %v919_v18 = vld [vmem:[%s984_s27 + $0x28] sm:$0xff]  }
  0x13   : > { %835 = vmatpush3.bf16.msra.mxu0 %v904_v3  ;;  %887 = vmatpush3.bf16.msra.mxu1 %v904_v3  ;;  %v916_v15 = vld [vmem:[%s984_s27 + $0x58] sm:$0xff]   ;;  %v918_v17 = vld [vmem:[%s984_s27 + $0x60] sm:$0xff]   ;;  %v920_v19 = vld [vmem:[%s984_s27 + $0x68] sm:$0xff]  }
  0x14   : > { %836 = vmatprep.subr.bf16.mxu0 %v905_v6  ;;  %880 = vmatprep.subr.bf16.mxu1 %v905_v6  ;;  %v921_v20 = vld [vmem:[%s984_s27 + $0x30] sm:$0xff]   ;;  %v923_v22 = vld [vmem:[%s984_s27 + $0x38] sm:$0xff]  }
  0x15   : > { %v922_v21 = vld [vmem:[%s984_s27 + $0x70] sm:$0xff]   ;;  %v924_v23 = vld [vmem:[%s984_s27 + $0x78] sm:$0xff]  }
  0x17   : > { %837 = vmatpush3.bf16.msra.mxu0 %v905_v6  ;;  %888 = vmatpush3.bf16.msra.mxu1 %v905_v6 }
  0x18   : > { %838 = vmatprep.subr.bf16.mxu0 %v906_v7  ;;  %881 = vmatprep.subr.bf16.mxu1 %v906_v7 }
  0x1b   : > { %839 = vmatpush3.bf16.msra.mxu0 %v906_v7  ;;  %889 = vmatpush3.bf16.msra.mxu1 %v906_v7 }
  0x1c   : > { %840 = vmatprep.subr.bf16.mxu0 %v907_v8  ;;  %882 = vmatprep.subr.bf16.mxu1 %v907_v8 }
  0x1f   : > { %841 = vmatpush3.bf16.msra.mxu0 %v907_v8  ;;  %890 = vmatpush3.bf16.msra.mxu1 %v907_v8 }
  0x20   : > { %842 = vmatprep.subr.bf16.mxu0 %v908_v9  ;;  %883 = vmatprep.subr.bf16.mxu1 %v908_v9 }
  0x23   : > { %843 = vmatpush3.bf16.msra.mxu0 %v908_v9  ;;  %891 = vmatpush3.bf16.msra.mxu1 %v908_v9 }
  0x26   : > { %845 = vmatmul.mubr.bf16.vlgmr.msra.gmra.mrb[0].mxu0 %v911_v10  ;;  %861 = vmatmul.mubr.bf16.vlgmr.msra.gmra.mrb[0].mxu1 %v912_v11 }
  0x27   : > { %848 = vmatprep.mubr.bf16.mxu0 %v913_v12  ;;  %864 = vmatprep.mubr.bf16.mxu1 %v914_v13 }
  0x2e   : > { %849 = vmatmul.mubr.bf16.gmra.mrb[4].mxu0 %v915_v14  ;;  %865 = vmatmul.mubr.bf16.gmra.mrb[4].mxu1 %v916_v15 }
  0x2f   : > { %852 = vmatprep.mubr.bf16.mxu0 %v917_v16  ;;  %868 = vmatprep.mubr.bf16.mxu1 %v918_v17 }
  0x36   : > { %853 = vmatmul.mubr.bf16.gmra.mrb[8].mxu0 %v919_v18  ;;  %869 = vmatmul.mubr.bf16.gmra.mrb[8].mxu1 %v920_v19 }
  0x37   : > { %856 = vmatprep.mubr.bf16.mxu0 %v921_v20  ;;  %872 = vmatprep.mubr.bf16.mxu1 %v922_v21 }
  0x3e   : > { %857 = vmatmul.mubr.bf16.gmra.mrb[12].mxu0 %v923_v22  ;;  %873 = vmatmul.mubr.bf16.gmra.mrb[12].mxu1 %v924_v23 }
  0xf9   : > { %v1023_v24 = vpop.f32.mrb[0].mxu0  ;;  %v1025_v25 = vpop.f32.mrb[0].mxu1 }
  0xfa   : > { %552 = vst [vmem:[%s1021_s17 + $0x10] sm:$0xff] %v1023_v24  ;;  %568 = vst [vmem:[%s1021_s17 + $0x90] sm:$0xff] %v1025_v25  ;;  %v1031_v26 = vpop.f32.mrb[1].mxu0  ;;  %v1033_v27 = vpop.f32.mrb[1].mxu1 }
  0xfb   : > { %550 = vst [vmem:[%s1021_s17] sm:$0xff] %v1031_v26  ;;  %566 = vst [vmem:[%s1021_s17 + $0x80] sm:$0xff] %v1033_v27  ;;  %v1039_v28 = vpop.f32.mrb[2].mxu0  ;;  %v1041_v29 = vpop.f32.mrb[2].mxu1 }
  0xfc   : > { %553 = vst [vmem:[%s1021_s17 + $0x18] sm:$0xff] %v1039_v28  ;;  %569 = vst [vmem:[%s1021_s17 + $0x98] sm:$0xff] %v1041_v29  ;;  %v426_v30 = vpop.f32.mrb[3].mxu0  ;;  %v1047_v31 = vpop.f32.mrb[3].mxu1 }
  0xfd   : > { %551 = vst [vmem:[%s1021_s17 + $0x8] sm:$0xff] %v426_v30  ;;  %567 = vst [vmem:[%s1021_s17 + $0x88] sm:$0xff] %v1047_v31 }
 0x101   : > { %v1052_v32 = vpop.f32.mrb[4].mxu0  ;;  %v1054_v33 = vpop.f32.mrb[4].mxu1 }
 0x102   : > { %556 = vst [vmem:[%s1021_s17 + $0x30] sm:$0xff] %v1052_v32  ;;  %572 = vst [vmem:[%s1021_s17 + $0xb0] sm:$0xff] %v1054_v33  ;;  %v439_v34 = vpop.f32.mrb[5].mxu0  ;;  %v1060_v35 = vpop.f32.mrb[5].mxu1 }
 0x103   : > { %554 = vst [vmem:[%s1021_s17 + $0x20] sm:$0xff] %v439_v34  ;;  %570 = vst [vmem:[%s1021_s17 + $0xa0] sm:$0xff] %v1060_v35  ;;  %v1065_v36 = vpop.f32.mrb[6].mxu0  ;;  %v1067_v37 = vpop.f32.mrb[6].mxu1 }
 0x104   : > { %557 = vst [vmem:[%s1021_s17 + $0x38] sm:$0xff] %v1065_v36  ;;  %573 = vst [vmem:[%s1021_s17 + $0xb8] sm:$0xff] %v1067_v37  ;;  %v442_v38 = vpop.f32.mrb[7].mxu0  ;;  %v1073_v39 = vpop.f32.mrb[7].mxu1 }
 0x105   : > { %555 = vst [vmem:[%s1021_s17 + $0x28] sm:$0xff] %v442_v38  ;;  %571 = vst [vmem:[%s1021_s17 + $0xa8] sm:$0xff] %v1073_v39 }
 0x109   : > { %v1078_v40 = vpop.f32.mrb[8].mxu0  ;;  %v1080_v41 = vpop.f32.mrb[8].mxu1 }
 0x10a   : > { %560 = vst [vmem:[%s1021_s17 + $0x50] sm:$0xff] %v1078_v40  ;;  %576 = vst [vmem:[%s1021_s17 + $0xd0] sm:$0xff] %v1080_v41  ;;  %v455_v42 = vpop.f32.mrb[9].mxu0  ;;  %v1086_v43 = vpop.f32.mrb[9].mxu1 }
 0x10b   : > { %558 = vst [vmem:[%s1021_s17 + $0x40] sm:$0xff] %v455_v42  ;;  %574 = vst [vmem:[%s1021_s17 + $0xc0] sm:$0xff] %v1086_v43  ;;  %v855_v44 = vpop.f32.mrb[10].mxu0  ;;  %v1091_v45 = vpop.f32.mrb[10].mxu1 }
 0x10c   : > { %561 = vst [vmem:[%s1021_s17 + $0x58] sm:$0xff] %v855_v44  ;;  %577 = vst [vmem:[%s1021_s17 + $0xd8] sm:$0xff] %v1091_v45  ;;  %v458_v46 = vpop.f32.mrb[11].mxu0  ;;  %v1096_v47 = vpop.f32.mrb[11].mxu1 }
 0x10d   : > { %559 = vst [vmem:[%s1021_s17 + $0x48] sm:$0xff] %v458_v46  ;;  %575 = vst [vmem:[%s1021_s17 + $0xc8] sm:$0xff] %v1096_v47 }
 0x10f   : > { %585 = sbr.rel (%p801_p4) target bundleno = 278 (0x116), region = 32 }
 0x111   : > { %v1101_v48 = vpop.f32.mrb[12].mxu0  ;;  %v1103_v49 = vpop.f32.mrb[12].mxu1 }
 0x112   : > { %564 = vst [vmem:[%s1021_s17 + $0x70] sm:$0xff] %v1101_v48  ;;  %580 = vst [vmem:[%s1021_s17 + $0xf0] sm:$0xff] %v1103_v49  ;;  %v471_v50 = vpop.f32.mrb[13].mxu0  ;;  %v1109_v51 = vpop.f32.mrb[13].mxu1 }
 0x113   : > { %562 = vst [vmem:[%s1021_s17 + $0x60] sm:$0xff] %v471_v50  ;;  %578 = vst [vmem:[%s1021_s17 + $0xe0] sm:$0xff] %v1109_v51  ;;  %v859_v52 = vpop.f32.mrb[14].mxu0  ;;  %v1114_v53 = vpop.f32.mrb[14].mxu1 }
 0x114   : > { %565 = vst [vmem:[%s1021_s17 + $0x78] sm:$0xff] %v859_v52  ;;  %581 = vst [vmem:[%s1021_s17 + $0xf8] sm:$0xff] %v1114_v53  ;;  %v474_v54 = vpop.f32.mrb[15].mxu0  ;;  %v1119_v55 = vpop.f32.mrb[15].mxu1 }
 0x115   : > { %563 = vst [vmem:[%s1021_s17 + $0x68] sm:$0xff] %v474_v54  ;;  %579 = vst [vmem:[%s1021_s17 + $0xe8] sm:$0xff] %v1119_v55 }
 0x116 PF: > { %v589_v57 = vadd.f32 %v426_v30, %v1031_v26  ;;  %v629_v60 = vmul.f32 %v1031_v26, %v1031_v26  ;;  %v630_v61 = vmul.f32 %v426_v30, %v426_v30  ;;  %v631_v63 = vmul.f32 %v1023_v24, %v1023_v24 }
 0x117   : > { %v632_v1 = vmul.f32 %v1039_v28, %v1039_v28  ;;  %v633_v4 = vmul.f32 %v439_v34, %v439_v34  ;;  %v634_v7 = vmul.f32 %v442_v38, %v442_v38  ;;  %v635_v10 = vmul.f32 %v1052_v32, %v1052_v32 }
 0x118   : > { %v590_v58 = vadd.f32 %v1023_v24, %v589_v57  ;;  %v661_v2 = vadd.f32 %v630_v61, %v629_v60  ;;  %v636_v13 = vmul.f32 %v1065_v36, %v1065_v36  ;;  %v637_v16 = vmul.f32 %v455_v42, %v455_v42 }
 0x119   : > { %v638_v19 = vmul.f32 %v458_v46, %v458_v46  ;;  %v639_v22 = vmul.f32 %v1078_v40, %v1078_v40  ;;  %v640_v26 = vmul.f32 %v855_v44, %v855_v44  ;;  %v645_v60 = vmul.f32 %v1033_v27, %v1033_v27 }
 0x11a   : > { %v591_v59 = vadd.f32 %v1039_v28, %v590_v58  ;;  %v662_v5 = vadd.f32 %v661_v2, %v631_v63 }
 0x11c   : > { %v592_v62 = vadd.f32 %v591_v59, %v439_v34  ;;  %v663_v8 = vadd.f32 %v662_v5, %v632_v1  ;;  %v648_v1 = vmul.f32 %v1041_v29, %v1041_v29  ;;  %v650_v5 = vmul.f32 %v1073_v39, %v1073_v39 }
 0x11e   : > { %v593_v0 = vadd.f32 %v592_v62, %v442_v38  ;;  %v664_v11 = vadd.f32 %v663_v8, %v633_v4  ;;  %v642_v38 = vmul.f32 %v474_v54, %v474_v54 }
 0x120   : > { %v594_v3 = vadd.f32 %v1052_v32, %v593_v0  ;;  %v665_v14 = vadd.f32 %v664_v11, %v634_v7  ;;  %v641_v32 = vmul.f32 %v471_v50, %v471_v50  ;;  %v651_v7 = vmul.f32 %v1054_v33, %v1054_v33 }
 0x121   : > { %v653_v11 = vmul.f32 %v1086_v43, %v1086_v43 }
 0x122   : > { %v595_v6 = vadd.f32 %v1065_v36, %v594_v3  ;;  %v666_v17 = vadd.f32 %v665_v14, %v635_v10  ;;  %v649_v3 = vmul.f32 %v1060_v35, %v1060_v35 }
 0x124   : > { %v596_v9 = vadd.f32 %v595_v6, %v455_v42  ;;  %v667_v20 = vadd.f32 %v666_v17, %v636_v13  ;;  %v654_v13 = vmul.f32 %v1096_v47, %v1096_v47  ;;  %v656_v17 = vmul.f32 %v1091_v45, %v1091_v45 }
 0x126   : > { %v597_v12 = vadd.f32 %v596_v9, %v458_v46  ;;  %v668_v23 = vadd.f32 %v667_v20, %v637_v16  ;;  %v643_v46 = vmul.f32 %v1101_v48, %v1101_v48  ;;  %v652_v9 = vmul.f32 %v1067_v37, %v1067_v37 }
 0x128   : > { %v598_v15 = vadd.f32 %v1078_v40, %v597_v12  ;;  %v669_v28 = vadd.f32 %v668_v23, %v638_v19  ;;  %v644_v40 = vmul.f32 %v859_v52, %v859_v52  ;;  %v657_v19 = vmul.f32 %v1109_v51, %v1109_v51 }
 0x129   : > { %v659_v23 = vmul.f32 %v1103_v49, %v1103_v49 }
 0x12a   : > { %v599_v18 = vadd.f32 %v855_v44, %v598_v15  ;;  %v670_v34 = vadd.f32 %v669_v28, %v639_v22  ;;  %v655_v15 = vmul.f32 %v1080_v41, %v1080_v41 }
 0x12c   : > { %v600_v21 = vadd.f32 %v599_v18, %v471_v50  ;;  %v671_v56 = vadd.f32 %v670_v34, %v640_v26 }
 0x12e   : > { %v601_v24 = vadd.f32 %v600_v21, %v474_v54  ;;  %v672_v57 = vadd.f32 %v671_v56, %v641_v32  ;;  %v646_v54 = vmul.f32 %v1047_v31, %v1047_v31  ;;  %v658_v21 = vmul.f32 %v1119_v55, %v1119_v55 }
 0x130   : > { %v602_v30 = vadd.f32 %v1101_v48, %v601_v24  ;;  %v673_v59 = vadd.f32 %v672_v57, %v642_v38  ;;  %v647_v48 = vmul.f32 %v1025_v25, %v1025_v25 }
 0x132   : > { %v603_v36 = vadd.f32 %v859_v52, %v602_v30  ;;  %v674_v50 = vadd.f32 %v673_v59, %v643_v46 }
 0x134   : > { %v604_v42 = vadd.f32 %v603_v36, %v1033_v27  ;;  %v675_v62 = vadd.f32 %v674_v50, %v644_v40 }
 0x136   : > { %v605_v58 = vadd.f32 %v604_v42, %v1047_v31  ;;  %v676_v0 = vadd.f32 %v675_v62, %v645_v60 }
 0x138   : > { %v606_v44 = vadd.f32 %v1025_v25, %v605_v58  ;;  %v677_v2 = vadd.f32 %v676_v0, %v646_v54  ;;  %v628_v58 = vld [vmem:[%s1220_s4] sm:$0x1] }
 0x13a   : > { %v607_v61 = vadd.f32 %v1041_v29, %v606_v44  ;;  %v678_v4 = vadd.f32 %v677_v2, %v647_v48 }
 0x13c   : > { %v608_v63 = vadd.f32 %v607_v61, %v1060_v35  ;;  %v679_v6 = vadd.f32 %v678_v4, %v648_v1 }
 0x13e   : > { %v609_v52 = vadd.f32 %v608_v63, %v1073_v39  ;;  %v680_v8 = vadd.f32 %v679_v6, %v649_v3 }
 0x140   : > { %v610_v27 = vadd.f32 %v1054_v33, %v609_v52  ;;  %v681_v10 = vadd.f32 %v680_v8, %v650_v5 }
 0x142   : > { %v611_v31 = vadd.f32 %v1067_v37, %v610_v27  ;;  %v682_v12 = vadd.f32 %v681_v10, %v651_v7 }
 0x144   : > { %v612_v25 = vadd.f32 %v611_v31, %v1086_v43  ;;  %v683_v14 = vadd.f32 %v682_v12, %v652_v9 }
 0x146   : > { %v613_v29 = vadd.f32 %v612_v25, %v1096_v47  ;;  %v684_v16 = vadd.f32 %v683_v14, %v653_v11 }
 0x148   : > { %v614_v35 = vadd.f32 %v1080_v41, %v613_v29  ;;  %v685_v18 = vadd.f32 %v684_v16, %v654_v13 }
 0x14a   : > { %v615_v39 = vadd.f32 %v1091_v45, %v614_v35  ;;  %v686_v20 = vadd.f32 %v685_v18, %v655_v15  ;;  %v660_v45 = vmul.f32 %v1114_v53, %v1114_v53 }
 0x14c   : > { %v616_v33 = vadd.f32 %v615_v39, %v1109_v51  ;;  %v687_v22 = vadd.f32 %v686_v20, %v656_v17 }
 0x14e   : > { %v617_v37 = vadd.f32 %v616_v33, %v1119_v55  ;;  %v688_v24 = vadd.f32 %v687_v22, %v657_v19  ;;  %v588_v55 = vld [vmem:[%s1219_s3] sm:$0x1] }
 0x150   : > { %v618_v43 = vadd.f32 %v1103_v49, %v617_v37  ;;  %v689_v28 = vadd.f32 %v688_v24, %v658_v21 }
 0x152   : > { %v619_v47 = vadd.f32 %v1114_v53, %v618_v43  ;;  %v690_v32 = vadd.f32 %v689_v28, %v659_v23 }
 0x154   : > { %v620_v41 = vrot.slane %v619_v47, 4  ;;  %v691_v34 = vadd.f32 %v690_v32, %v660_v45 }
 0x156   : > { %v621_v26 = vadd.f32 %v620_v41, %v619_v47  ;;  %v692_v38 = vrot.slane %v691_v34, 4 }
 0x158   : > { %v622_v30 = vrot.slane %v621_v26, 2  ;;  %v693_v42 = vadd.f32 %v692_v38, %v691_v34 }
 0x15a   : > { %v623_v51 = vadd.f32 %v622_v30, %v621_v26  ;;  %v694_v49 = vrot.slane %v693_v42, 2 }
 0x15c   : > { %v624_v36 = vrot.slane %v623_v51, 1  ;;  %v695_v53 = vadd.f32 %v694_v49, %v693_v42 }
 0x15e   : > { %v625_v56 = vadd.f32 %v624_v36, %v623_v51  ;;  %v696_v57 = vrot.slane %v695_v53, 1 }
 0x160   : > { %v626_v46 = vadd.f32 %v625_v56, %v588_v55  ;;  %v697_v40 = vadd.f32 %v696_v57, %v695_v53 }
 0x162   : > { %627 = vst [vmem:[%s1219_s3] sm:$0x1] %v626_v46  ;;  %v698_v59 = vadd.f32 %v697_v40, %v628_v58 }
 0x164   : > { %699 = vst [vmem:[%s1220_s4] sm:$0x1] %v698_v59 }
 0x165 PF: > { %s15_s15 = sadd.s32 1, %s931_s15  }
 0x166   : > { %p12_p5 = scmp.ge.s32.totalorder %s15_s15, 34  }
 0x168   :  { %14 = sbr.rel (!%p12_p5) target bundleno = 1 (0x1), region = 78 }

// kernel: resize_forward.28
= control target key start
LH: loop header
LB: loop body
LE: loop exit
PB: predicated region body
PF: predicated region fallthrough
CT: control target
= control target key end

     0   :  { %s959_s15 = smov 0   ;;  %s1216_s0 = inlined_call_operand.vmem [shape: bf16[2048,128], index: 0, kind: input, shape index: {}]   ;;  %s1217_s1 = inlined_call_operand.vmem [shape: bf16[128,128], index: 1, kind: input, shape index: {}]   ;;  %s1218_s2 = inlined_call_operand.vmem [shape: f32[2048,128], index: 2, kind: output, shape index: {0}]   ;;  %s1219_s3 = inlined_call_operand.vmem [shape: f32[1,128], index: 3, kind: output, shape index: {1}]   ;;  %s1220_s4 = inlined_call_operand.vmem [shape: f32[1,128], index: 4, kind: output, shape index: {2}]  }
   0x1 LB: > { %s768_s16 = sadd.s32 4294967295, %s931_s15   ;;  %p772_p0 = scmp.ge.s32.totalorder %s931_s15, 1  ;;  %s931_s15 = sphi %s959_s15, %s15_s15  }
   0x2   : > { %p158_p1 = scmp.lt.s32.totalorder %s931_s15, 9 }
   0x4   : > { %p159_p2 = pnand %p772_p0, %p158_p1 }
   0x5   : > { %v901_v0 = vld [vmem:[%s1217_s1] sm:$0xff] (!%p159_p2)   ;;  %s773_s19 = sshll.u32 (!%p159_p2), %s768_s16, 5  ;;  %v902_v1 = vld [vmem:[%s1217_s1 + $0x8] sm:$0xff] (!%p159_p2)   ;;  %v903_v2 = vld [vmem:[%s1217_s1 + $0x10] sm:$0xff] (!%p159_p2)   ;;  %p801_p4 = scmp.ne.s32.totalorder (!%p159_p2), %s768_s16, 0 }
   0x6   : > { %162 = sbr.rel (%p159_p2) target bundleno = 357 (0x165), region = 28  ;;  %p185_p3 = scmp.lt.s32.totalorder (!%p159_p2), %s773_s19, 255  ;;  %828 = vmatprep.subr.bf16.mxu0 (!%p159_p2), %v901_v0  ;;  %876 = vmatprep.subr.bf16.mxu1 (!%p159_p2), %v901_v0  ;;  %v904_v3 = vld [vmem:[%s1217_s1 + $0x18] sm:$0xff] (!%p159_p2)   ;;  %v905_v6 = vld [vmem:[%s1217_s1 + $0x20] sm:$0xff] (!%p159_p2)   ;;  %v906_v7 = vld [vmem:[%s1217_s1 + $0x28] sm:$0xff] (!%p159_p2)  }
   0x7   : > { %829 = vmatpush3.bf16.msra.mxu0 (!%p159_p2), %v901_v0  ;;  %884 = vmatpush3.bf16.msra.mxu1 (!%p159_p2), %v901_v0  ;;  %v907_v8 = vld [vmem:[%s1217_s1 + $0x30] sm:$0xff] (!%p159_p2)   ;;  %v908_v9 = vld [vmem:[%s1217_s1 + $0x38] sm:$0xff] (!%p159_p2)  }
   0x8   : > { %830 = vmatprep.subr.bf16.mxu0 (!%p159_p2), %v902_v1  ;;  %877 = vmatprep.subr.bf16.mxu1 (!%p159_p2), %v902_v1 }
   0xb   : > { %831 = vmatpush3.bf16.msra.mxu0 (!%p159_p2), %v902_v1  ;;  %885 = vmatpush3.bf16.msra.mxu1 (!%p159_p2), %v902_v1 }
   0xc   : > { %832 = vmatprep.subr.bf16.mxu0 (!%p159_p2), %v903_v2  ;;  %878 = vmatprep.subr.bf16.mxu1 (!%p159_p2), %v903_v2 }
   0xd   : > { %s1222_s19 = smov (!%p185_p3, %s773_s19), 255  ;;  %v933_v56 = vmov (!%p801_p4), 0.0  }
   0xe   : > { %s774_s24 = sshll.u32 %s1222_s19, 2  ;;  %s776_s12 = sshll.u32 %s1222_s19, 3  ;;  %586 = vst [vmem:[%s1219_s3] sm:$0x1] (!%p801_p4), %v933_v56  ;;  %587 = vst [vmem:[%s1220_s4] sm:$0x1] (!%p801_p4), %v933_v56 }
   0xf   : > { %s984_s27 = scalar_lea.vmem %s1216_s0, %s774_s24  ;;  %833 = vmatpush3.bf16.msra.mxu0 %v903_v2  ;;  %886 = vmatpush3.bf16.msra.mxu1 %v903_v2  ;;  %s1021_s17 = scalar_lea.vmem %s1218_s2, %s776_s12 }
  0x10   : > { %v909_v4 = vld [vmem:[%s984_s27] sm:$0xff]   ;;  %834 = vmatprep.subr.bf16.mxu0 %v904_v3  ;;  %879 = vmatprep.subr.bf16.mxu1 %v904_v3  ;;  %v911_v10 = vld [vmem:[%s984_s27 + $0x8] sm:$0xff]   ;;  %v913_v12 = vld [vmem:[%s984_s27 + $0x10] sm:$0xff]  }
  0x11   : > { %v910_v5 = vld [vmem:[%s984_s27 + $0x40] sm:$0xff]   ;;  %844 = vmatprep.mubr.bf16.mxu0 %v909_v4  ;;  %v912_v11 = vld [vmem:[%s984_s27 + $0x48] sm:$0xff]   ;;  %v914_v13 = vld [vmem:[%s984_s27 + $0x50] sm:$0xff]  }
  0x12   : > { %860 = vmatprep.mubr.bf16.mxu1 %v910_v5  ;;  %v915_v14 = vld [vmem:[%s984_s27 + $0x18] sm:$0xff]   ;;  %v917_v16 = vld [vmem:[%s984_s27 + $0x20] sm:$0xff]   ;;  %v919_v18 = vld [vmem:[%s984_s27 + $0x28] sm:$0xff]  }
  0x13   : > { %835 = vmatpush3.bf16.msra.mxu0 %v904_v3  ;;  %887 = vmatpush3.bf16.msra.mxu1 %v904_v3  ;;  %v916_v15 = vld [vmem:[%s984_s27 + $0x58] sm:$0xff]   ;;  %v918_v17 = vld [vmem:[%s984_s27 + $0x60] sm:$0xff]   ;;  %v920_v19 = vld [vmem:[%s984_s27 + $0x68] sm:$0xff]  }
  0x14   : > { %836 = vmatprep.subr.bf16.mxu0 %v905_v6  ;;  %880 = vmatprep.subr.bf16.mxu1 %v905_v6  ;;  %v921_v20 = vld [vmem:[%s984_s27 + $0x30] sm:$0xff]   ;;  %v923_v22 = vld [vmem:[%s984_s27 + $0x38] sm:$0xff]  }
  0x15   : > { %v922_v21 = vld [vmem:[%s984_s27 + $0x70] sm:$0xff]   ;;  %v924_v23 = vld [vmem:[%s984_s27 + $0x78] sm:$0xff]  }
  0x17   : > { %837 = vmatpush3.bf16.msra.mxu0 %v905_v6  ;;  %888 = vmatpush3.bf16.msra.mxu1 %v905_v6 }
  0x18   : > { %838 = vmatprep.subr.bf16.mxu0 %v906_v7  ;;  %881 = vmatprep.subr.bf16.mxu1 %v906_v7 }
  0x1b   : > { %839 = vmatpush3.bf16.msra.mxu0 %v906_v7  ;;  %889 = vmatpush3.bf16.msra.mxu1 %v906_v7 }
  0x1c   : > { %840 = vmatprep.subr.bf16.mxu0 %v907_v8  ;;  %882 = vmatprep.subr.bf16.mxu1 %v907_v8 }
  0x1f   : > { %841 = vmatpush3.bf16.msra.mxu0 %v907_v8  ;;  %890 = vmatpush3.bf16.msra.mxu1 %v907_v8 }
  0x20   : > { %842 = vmatprep.subr.bf16.mxu0 %v908_v9  ;;  %883 = vmatprep.subr.bf16.mxu1 %v908_v9 }
  0x23   : > { %843 = vmatpush3.bf16.msra.mxu0 %v908_v9  ;;  %891 = vmatpush3.bf16.msra.mxu1 %v908_v9 }
  0x26   : > { %845 = vmatmul.mubr.bf16.vlgmr.msra.gmra.mrb[0].mxu0 %v911_v10  ;;  %861 = vmatmul.mubr.bf16.vlgmr.msra.gmra.mrb[0].mxu1 %v912_v11 }
  0x27   : > { %848 = vmatprep.mubr.bf16.mxu0 %v913_v12  ;;  %864 = vmatprep.mubr.bf16.mxu1 %v914_v13 }
  0x2e   : > { %849 = vmatmul.mubr.bf16.gmra.mrb[4].mxu0 %v915_v14  ;;  %865 = vmatmul.mubr.bf16.gmra.mrb[4].mxu1 %v916_v15 }
  0x2f   : > { %852 = vmatprep.mubr.bf16.mxu0 %v917_v16  ;;  %868 = vmatprep.mubr.bf16.mxu1 %v918_v17 }
  0x36   : > { %853 = vmatmul.mubr.bf16.gmra.mrb[8].mxu0 %v919_v18  ;;  %869 = vmatmul.mubr.bf16.gmra.mrb[8].mxu1 %v920_v19 }
  0x37   : > { %856 = vmatprep.mubr.bf16.mxu0 %v921_v20  ;;  %872 = vmatprep.mubr.bf16.mxu1 %v922_v21 }
  0x3e   : > { %857 = vmatmul.mubr.bf16.gmra.mrb[12].mxu0 %v923_v22  ;;  %873 = vmatmul.mubr.bf16.gmra.mrb[12].mxu1 %v924_v23 }
  0xf9   : > { %v1023_v24 = vpop.f32.mrb[0].mxu0  ;;  %v1025_v25 = vpop.f32.mrb[0].mxu1 }
  0xfa   : > { %552 = vst [vmem:[%s1021_s17 + $0x10] sm:$0xff] %v1023_v24  ;;  %568 = vst [vmem:[%s1021_s17 + $0x90] sm:$0xff] %v1025_v25  ;;  %v1031_v26 = vpop.f32.mrb[1].mxu0  ;;  %v1033_v27 = vpop.f32.mrb[1].mxu1 }
  0xfb   : > { %550 = vst [vmem:[%s1021_s17] sm:$0xff] %v1031_v26  ;;  %566 = vst [vmem:[%s1021_s17 + $0x80] sm:$0xff] %v1033_v27  ;;  %v1039_v28 = vpop.f32.mrb[2].mxu0  ;;  %v1041_v29 = vpop.f32.mrb[2].mxu1 }
  0xfc   : > { %553 = vst [vmem:[%s1021_s17 + $0x18] sm:$0xff] %v1039_v28  ;;  %569 = vst [vmem:[%s1021_s17 + $0x98] sm:$0xff] %v1041_v29  ;;  %v426_v30 = vpop.f32.mrb[3].mxu0  ;;  %v1047_v31 = vpop.f32.mrb[3].mxu1 }
  0xfd   : > { %551 = vst [vmem:[%s1021_s17 + $0x8] sm:$0xff] %v426_v30  ;;  %567 = vst [vmem:[%s1021_s17 + $0x88] sm:$0xff] %v1047_v31 }
 0x101   : > { %v1052_v32 = vpop.f32.mrb[4].mxu0  ;;  %v1054_v33 = vpop.f32.mrb[4].mxu1 }
 0x102   : > { %556 = vst [vmem:[%s1021_s17 + $0x30] sm:$0xff] %v1052_v32  ;;  %572 = vst [vmem:[%s1021_s17 + $0xb0] sm:$0xff] %v1054_v33  ;;  %v439_v34 = vpop.f32.mrb[5].mxu0  ;;  %v1060_v35 = vpop.f32.mrb[5].mxu1 }
 0x103   : > { %554 = vst [vmem:[%s1021_s17 + $0x20] sm:$0xff] %v439_v34  ;;  %570 = vst [vmem:[%s1021_s17 + $0xa0] sm:$0xff] %v1060_v35  ;;  %v1065_v36 = vpop.f32.mrb[6].mxu0  ;;  %v1067_v37 = vpop.f32.mrb[6].mxu1 }
 0x104   : > { %557 = vst [vmem:[%s1021_s17 + $0x38] sm:$0xff] %v1065_v36  ;;  %573 = vst [vmem:[%s1021_s17 + $0xb8] sm:$0xff] %v1067_v37  ;;  %v442_v38 = vpop.f32.mrb[7].mxu0  ;;  %v1073_v39 = vpop.f32.mrb[7].mxu1 }
 0x105   : > { %555 = vst [vmem:[%s1021_s17 + $0x28] sm:$0xff] %v442_v38  ;;  %571 = vst [vmem:[%s1021_s17 + $0xa8] sm:$0xff] %v1073_v39 }
 0x109   : > { %v1078_v40 = vpop.f32.mrb[8].mxu0  ;;  %v1080_v41 = vpop.f32.mrb[8].mxu1 }
 0x10a   : > { %560 = vst [vmem:[%s1021_s17 + $0x50] sm:$0xff] %v1078_v40  ;;  %576 = vst [vmem:[%s1021_s17 + $0xd0] sm:$0xff] %v1080_v41  ;;  %v455_v42 = vpop.f32.mrb[9].mxu0  ;;  %v1086_v43 = vpop.f32.mrb[9].mxu1 }
 0x10b   : > { %558 = vst [vmem:[%s1021_s17 + $0x40] sm:$0xff] %v455_v42  ;;  %574 = vst [vmem:[%s1021_s17 + $0xc0] sm:$0xff] %v1086_v43  ;;  %v855_v44 = vpop.f32.mrb[10].mxu0  ;;  %v1091_v45 = vpop.f32.mrb[10].mxu1 }
 0x10c   : > { %561 = vst [vmem:[%s1021_s17 + $0x58] sm:$0xff] %v855_v44  ;;  %577 = vst [vmem:[%s1021_s17 + $0xd8] sm:$0xff] %v1091_v45  ;;  %v458_v46 = vpop.f32.mrb[11].mxu0  ;;  %v1096_v47 = vpop.f32.mrb[11].mxu1 }
 0x10d   : > { %559 = vst [vmem:[%s1021_s17 + $0x48] sm:$0xff] %v458_v46  ;;  %575 = vst [vmem:[%s1021_s17 + $0xc8] sm:$0xff] %v1096_v47 }
 0x10f   : > { %585 = sbr.rel (%p801_p4) target bundleno = 278 (0x116), region = 32 }
 0x111   : > { %v1101_v48 = vpop.f32.mrb[12].mxu0  ;;  %v1103_v49 = vpop.f32.mrb[12].mxu1 }
 0x112   : > { %564 = vst [vmem:[%s1021_s17 + $0x70] sm:$0xff] %v1101_v48  ;;  %580 = vst [vmem:[%s1021_s17 + $0xf0] sm:$0xff] %v1103_v49  ;;  %v471_v50 = vpop.f32.mrb[13].mxu0  ;;  %v1109_v51 = vpop.f32.mrb[13].mxu1 }
 0x113   : > { %562 = vst [vmem:[%s1021_s17 + $0x60] sm:$0xff] %v471_v50  ;;  %578 = vst [vmem:[%s1021_s17 + $0xe0] sm:$0xff] %v1109_v51  ;;  %v859_v52 = vpop.f32.mrb[14].mxu0  ;;  %v1114_v53 = vpop.f32.mrb[14].mxu1 }
 0x114   : > { %565 = vst [vmem:[%s1021_s17 + $0x78] sm:$0xff] %v859_v52  ;;  %581 = vst [vmem:[%s1021_s17 + $0xf8] sm:$0xff] %v1114_v53  ;;  %v474_v54 = vpop.f32.mrb[15].mxu0  ;;  %v1119_v55 = vpop.f32.mrb[15].mxu1 }
 0x115   : > { %563 = vst [vmem:[%s1021_s17 + $0x68] sm:$0xff] %v474_v54  ;;  %579 = vst [vmem:[%s1021_s17 + $0xe8] sm:$0xff] %v1119_v55 }
 0x116 PF: > { %v589_v57 = vadd.f32 %v426_v30, %v1031_v26  ;;  %v629_v60 = vmul.f32 %v1031_v26, %v1031_v26  ;;  %v630_v61 = vmul.f32 %v426_v30, %v426_v30  ;;  %v631_v63 = vmul.f32 %v1023_v24, %v1023_v24 }
 0x117   : > { %v632_v1 = vmul.f32 %v1039_v28, %v1039_v28  ;;  %v633_v4 = vmul.f32 %v439_v34, %v439_v34  ;;  %v634_v7 = vmul.f32 %v442_v38, %v442_v38  ;;  %v635_v10 = vmul.f32 %v1052_v32, %v1052_v32 }
 0x118   : > { %v590_v58 = vadd.f32 %v1023_v24, %v589_v57  ;;  %v661_v2 = vadd.f32 %v630_v61, %v629_v60  ;;  %v636_v13 = vmul.f32 %v1065_v36, %v1065_v36  ;;  %v637_v16 = vmul.f32 %v455_v42, %v455_v42 }
 0x119   : > { %v638_v19 = vmul.f32 %v458_v46, %v458_v46  ;;  %v639_v22 = vmul.f32 %v1078_v40, %v1078_v40  ;;  %v640_v26 = vmul.f32 %v855_v44, %v855_v44  ;;  %v645_v60 = vmul.f32 %v1033_v27, %v1033_v27 }
 0x11a   : > { %v591_v59 = vadd.f32 %v1039_v28, %v590_v58  ;;  %v662_v5 = vadd.f32 %v661_v2, %v631_v63 }
 0x11c   : > { %v592_v62 = vadd.f32 %v591_v59, %v439_v34  ;;  %v663_v8 = vadd.f32 %v662_v5, %v632_v1  ;;  %v648_v1 = vmul.f32 %v1041_v29, %v1041_v29  ;;  %v650_v5 = vmul.f32 %v1073_v39, %v1073_v39 }
 0x11e   : > { %v593_v0 = vadd.f32 %v592_v62, %v442_v38  ;;  %v664_v11 = vadd.f32 %v663_v8, %v633_v4  ;;  %v642_v38 = vmul.f32 %v474_v54, %v474_v54 }
 0x120   : > { %v594_v3 = vadd.f32 %v1052_v32, %v593_v0  ;;  %v665_v14 = vadd.f32 %v664_v11, %v634_v7  ;;  %v641_v32 = vmul.f32 %v471_v50, %v471_v50  ;;  %v651_v7 = vmul.f32 %v1054_v33, %v1054_v33 }
 0x121   : > { %v653_v11 = vmul.f32 %v1086_v43, %v1086_v43 }
 0x122   : > { %v595_v6 = vadd.f32 %v1065_v36, %v594_v3  ;;  %v666_v17 = vadd.f32 %v665_v14, %v635_v10  ;;  %v649_v3 = vmul.f32 %v1060_v35, %v1060_v35 }
 0x124   : > { %v596_v9 = vadd.f32 %v595_v6, %v455_v42  ;;  %v667_v20 = vadd.f32 %v666_v17, %v636_v13  ;;  %v654_v13 = vmul.f32 %v1096_v47, %v1096_v47  ;;  %v656_v17 = vmul.f32 %v1091_v45, %v1091_v45 }
 0x126   : > { %v597_v12 = vadd.f32 %v596_v9, %v458_v46  ;;  %v668_v23 = vadd.f32 %v667_v20, %v637_v16  ;;  %v643_v46 = vmul.f32 %v1101_v48, %v1101_v48  ;;  %v652_v9 = vmul.f32 %v1067_v37, %v1067_v37 }
 0x128   : > { %v598_v15 = vadd.f32 %v1078_v40, %v597_v12  ;;  %v669_v28 = vadd.f32 %v668_v23, %v638_v19  ;;  %v644_v40 = vmul.f32 %v859_v52, %v859_v52  ;;  %v657_v19 = vmul.f32 %v1109_v51, %v1109_v51 }
 0x129   : > { %v659_v23 = vmul.f32 %v1103_v49, %v1103_v49 }
 0x12a   : > { %v599_v18 = vadd.f32 %v855_v44, %v598_v15  ;;  %v670_v34 = vadd.f32 %v669_v28, %v639_v22  ;;  %v655_v15 = vmul.f32 %v1080_v41, %v1080_v41 }
 0x12c   : > { %v600_v21 = vadd.f32 %v599_v18, %v471_v50  ;;  %v671_v56 = vadd.f32 %v670_v34, %v640_v26 }
 0x12e   : > { %v601_v24 = vadd.f32 %v600_v21, %v474_v54  ;;  %v672_v57 = vadd.f32 %v671_v56, %v641_v32  ;;  %v646_v54 = vmul.f32 %v1047_v31, %v1047_v31  ;;  %v658_v21 = vmul.f32 %v1119_v55, %v1119_v55 }
 0x130   : > { %v602_v30 = vadd.f32 %v1101_v48, %v601_v24  ;;  %v673_v59 = vadd.f32 %v672_v57, %v642_v38  ;;  %v647_v48 = vmul.f32 %v1025_v25, %v1025_v25 }
 0x132   : > { %v603_v36 = vadd.f32 %v859_v52, %v602_v30  ;;  %v674_v50 = vadd.f32 %v673_v59, %v643_v46 }
 0x134   : > { %v604_v42 = vadd.f32 %v603_v36, %v1033_v27  ;;  %v675_v62 = vadd.f32 %v674_v50, %v644_v40 }
 0x136   : > { %v605_v58 = vadd.f32 %v604_v42, %v1047_v31  ;;  %v676_v0 = vadd.f32 %v675_v62, %v645_v60 }
 0x138   : > { %v606_v44 = vadd.f32 %v1025_v25, %v605_v58  ;;  %v677_v2 = vadd.f32 %v676_v0, %v646_v54  ;;  %v628_v58 = vld [vmem:[%s1220_s4] sm:$0x1] }
 0x13a   : > { %v607_v61 = vadd.f32 %v1041_v29, %v606_v44  ;;  %v678_v4 = vadd.f32 %v677_v2, %v647_v48 }
 0x13c   : > { %v608_v63 = vadd.f32 %v607_v61, %v1060_v35  ;;  %v679_v6 = vadd.f32 %v678_v4, %v648_v1 }
 0x13e   : > { %v609_v52 = vadd.f32 %v608_v63, %v1073_v39  ;;  %v680_v8 = vadd.f32 %v679_v6, %v649_v3 }
 0x140   : > { %v610_v27 = vadd.f32 %v1054_v33, %v609_v52  ;;  %v681_v10 = vadd.f32 %v680_v8, %v650_v5 }
 0x142   : > { %v611_v31 = vadd.f32 %v1067_v37, %v610_v27  ;;  %v682_v12 = vadd.f32 %v681_v10, %v651_v7 }
 0x144   : > { %v612_v25 = vadd.f32 %v611_v31, %v1086_v43  ;;  %v683_v14 = vadd.f32 %v682_v12, %v652_v9 }
 0x146   : > { %v613_v29 = vadd.f32 %v612_v25, %v1096_v47  ;;  %v684_v16 = vadd.f32 %v683_v14, %v653_v11 }
 0x148   : > { %v614_v35 = vadd.f32 %v1080_v41, %v613_v29  ;;  %v685_v18 = vadd.f32 %v684_v16, %v654_v13 }
 0x14a   : > { %v615_v39 = vadd.f32 %v1091_v45, %v614_v35  ;;  %v686_v20 = vadd.f32 %v685_v18, %v655_v15  ;;  %v660_v45 = vmul.f32 %v1114_v53, %v1114_v53 }
 0x14c   : > { %v616_v33 = vadd.f32 %v615_v39, %v1109_v51  ;;  %v687_v22 = vadd.f32 %v686_v20, %v656_v17 }
 0x14e   : > { %v617_v37 = vadd.f32 %v616_v33, %v1119_v55  ;;  %v688_v24 = vadd.f32 %v687_v22, %v657_v19  ;;  %v588_v55 = vld [vmem:[%s1219_s3] sm:$0x1] }
 0x150   : > { %v618_v43 = vadd.f32 %v1103_v49, %v617_v37  ;;  %v689_v28 = vadd.f32 %v688_v24, %v658_v21 }
 0x152   : > { %v619_v47 = vadd.f32 %v1114_v53, %v618_v43  ;;  %v690_v32 = vadd.f32 %v689_v28, %v659_v23 }
 0x154   : > { %v620_v41 = vrot.slane %v619_v47, 4  ;;  %v691_v34 = vadd.f32 %v690_v32, %v660_v45 }
 0x156   : > { %v621_v26 = vadd.f32 %v620_v41, %v619_v47  ;;  %v692_v38 = vrot.slane %v691_v34, 4 }
 0x158   : > { %v622_v30 = vrot.slane %v621_v26, 2  ;;  %v693_v42 = vadd.f32 %v692_v38, %v691_v34 }
 0x15a   : > { %v623_v51 = vadd.f32 %v622_v30, %v621_v26  ;;  %v694_v49 = vrot.slane %v693_v42, 2 }
 0x15c   : > { %v624_v36 = vrot.slane %v623_v51, 1  ;;  %v695_v53 = vadd.f32 %v694_v49, %v693_v42 }
 0x15e   : > { %v625_v56 = vadd.f32 %v624_v36, %v623_v51  ;;  %v696_v57 = vrot.slane %v695_v53, 1 }
 0x160   : > { %v626_v46 = vadd.f32 %v625_v56, %v588_v55  ;;  %v697_v40 = vadd.f32 %v696_v57, %v695_v53 }
 0x162   : > { %627 = vst [vmem:[%s1219_s3] sm:$0x1] %v626_v46  ;;  %v698_v59 = vadd.f32 %v697_v40, %v628_v58 }
 0x164   : > { %699 = vst [vmem:[%s1220_s4] sm:$0x1] %v698_v59 }
 0x165 PF: > { %s15_s15 = sadd.s32 1, %s931_s15  }
 0x166   : > { %p12_p5 = scmp.ge.s32.totalorder %s15_s15, 10  }
 0x168   :  { %14 = sbr.rel (!%p12_p5) target bundleno = 1 (0x1), region = 78 }

// kernel: resize_forward.29
= control target key start
LH: loop header
LB: loop body
LE: loop exit
PB: predicated region body
PF: predicated region fallthrough
CT: control target
= control target key end

     0   :  { %s453_s12 = smov 0   ;;  %s612_s0 = inlined_call_operand.vmem [shape: f32[2048,128], index: 0, kind: input, shape index: {}]   ;;  %s613_s1 = inlined_call_operand.vmem [shape: f32[1,128], index: 1, kind: input, shape index: {}]   ;;  %s614_s2 = inlined_call_operand.vmem [shape: f32[1,128], index: 2, kind: input, shape index: {}]   ;;  %s615_s3 = inlined_call_operand.vmem [shape: f32[2048,128], index: 3, kind: output, shape index: {}]  }
   0x1 LB: > { %s404_s13 = sadd.s32 4294967295, %s431_s12   ;;  %p408_p0 = scmp.ge.s32.totalorder %s431_s12, 1  ;;  %s431_s12 = sphi %s453_s12, %s13_s12  }
   0x2   : > { %p138_p1 = scmp.lt.s32.totalorder %s431_s12, 9 }
   0x4   : > { %p139_p2 = pnand %p408_p0, %p138_p1 }
   0x5   : > { %s409_s14 = sshll.u32 (!%p139_p2), %s404_s13, 5  ;;  %v464_v0 = vld [vmem:[%s613_s1] ss:$0 sm:$0xff] (!%p139_p2) }
   0x6   : > { %142 = sbr.rel (%p139_p2) target bundleno = 46 (0x2e), region = 32  ;;  %p163_p3 = scmp.lt.s32.totalorder (!%p139_p2), %s409_s14, 255  ;;  %v474_v1 = vld [vmem:[%s614_s2] ss:$0 sm:$0xff] (!%p139_p2) }
   0xd   : > { %s617_s14 = smov (!%p163_p3, %s409_s14), 255 }
   0xe   : > { %s410_s15 = sshll.u32 %s617_s14, 3 }
   0xf   : > { %s469_s20 = scalar_lea.vmem %s612_s0, %s410_s15  ;;  %s497_s25 = scalar_lea.vmem %s615_s3, %s410_s15 }
  0x10   : > { %v174_v2 = vld [vmem:[%s469_s20] sm:$0xff]  ;;  %v175_v3 = vld [vmem:[%s469_s20 + $0x8] sm:$0xff]  ;;  %v176_v4 = vld [vmem:[%s469_s20 + $0x10] sm:$0xff] }
  0x11   : > { %v213_v5 = vmul.f32 %v464_v0, %v174_v2  ;;  %v214_v6 = vmul.f32 %v464_v0, %v175_v3  ;;  %v215_v7 = vmul.f32 %v464_v0, %v176_v4  ;;  %v177_v8 = vld [vmem:[%s469_s20 + $0x18] sm:$0xff]  ;;  %v178_v9 = vld [vmem:[%s469_s20 + $0x20] sm:$0xff]  ;;  %v179_v10 = vld [vmem:[%s469_s20 + $0x28] sm:$0xff] }
  0x12   : > { %v216_v11 = vmul.f32 %v464_v0, %v177_v8  ;;  %v217_v12 = vmul.f32 %v464_v0, %v178_v9  ;;  %v218_v13 = vmul.f32 %v464_v0, %v179_v10  ;;  %v180_v14 = vld [vmem:[%s469_s20 + $0x30] sm:$0xff]  ;;  %v181_v15 = vld [vmem:[%s469_s20 + $0x38] sm:$0xff]  ;;  %v182_v24 = vld [vmem:[%s469_s20 + $0x40] sm:$0xff] }
  0x13   : > { %v252_v16 = vadd.f32 %v474_v1, %v213_v5  ;;  %v253_v17 = vadd.f32 %v474_v1, %v214_v6  ;;  %v254_v18 = vadd.f32 %v474_v1, %v215_v7  ;;  %v219_v19 = vmul.f32 %v464_v0, %v180_v14  ;;  %v183_v25 = vld [vmem:[%s469_s20 + $0x48] sm:$0xff]  ;;  %v184_v26 = vld [vmem:[%s469_s20 + $0x50] sm:$0xff]  ;;  %v185_v31 = vld [vmem:[%s469_s20 + $0x58] sm:$0xff] }
  0x14   : > { %v255_v20 = vadd.f32 %v474_v1, %v216_v11  ;;  %v256_v21 = vadd.f32 %v474_v1, %v217_v12  ;;  %v257_v22 = vadd.f32 %v474_v1, %v218_v13  ;;  %v220_v23 = vmul.f32 %v464_v0, %v181_v15  ;;  %v186_v32 = vld [vmem:[%s469_s20 + $0x60] sm:$0xff]  ;;  %v187_v33 = vld [vmem:[%s469_s20 + $0x68] sm:$0xff]  ;;  %v188_v38 = vld [vmem:[%s469_s20 + $0x70] sm:$0xff] }
  0x15   : > { %v284_v27 = vmax.f32 %v252_v16, 0.0  ;;  %v285_v28 = vmax.f32 %v253_v17, 0.0  ;;  %v286_v29 = vmax.f32 %v254_v18, 0.0  ;;  %v258_v30 = vadd.f32 %v474_v1, %v219_v19  ;;  %v189_v43 = vld [vmem:[%s469_s20 + $0x78] sm:$0xff]  ;;  %v190_v56 = vld [vmem:[%s469_s20 + $0x80] sm:$0xff]  ;;  %v191_v57 = vld [vmem:[%s469_s20 + $0x88] sm:$0xff] }
  0x16   : > { %v287_v34 = vmax.f32 %v255_v20, 0.0  ;;  %v288_v35 = vmax.f32 %v256_v21, 0.0  ;;  %v289_v36 = vmax.f32 %v257_v22, 0.0  ;;  %v259_v37 = vadd.f32 %v474_v1, %v220_v23  ;;  %v192_v58 = vld [vmem:[%s469_s20 + $0x90] sm:$0xff]  ;;  %v193_v63 = vld [vmem:[%s469_s20 + $0x98] sm:$0xff]  ;;  %v194_v2 = vld [vmem:[%s469_s20 + $0xa0] sm:$0xff] }
  0x17   : > { %316 = vst [vmem:[%s497_s25] sm:$0xff] %v284_v27  ;;  %317 = vst [vmem:[%s497_s25 + $0x8] sm:$0xff] %v285_v28  ;;  %v290_v39 = vmax.f32 %v258_v30, 0.0  ;;  %v221_v40 = vmul.f32 %v464_v0, %v182_v24  ;;  %v222_v41 = vmul.f32 %v464_v0, %v183_v25  ;;  %v223_v42 = vmul.f32 %v464_v0, %v184_v26  ;;  %v195_v3 = vld [vmem:[%s469_s20 + $0xa8] sm:$0xff]  ;;  %v196_v8 = vld [vmem:[%s469_s20 + $0xb0] sm:$0xff] }
  0x18   : > { %318 = vst [vmem:[%s497_s25 + $0x10] sm:$0xff] %v286_v29  ;;  %319 = vst [vmem:[%s497_s25 + $0x18] sm:$0xff] %v287_v34  ;;  %v291_v44 = vmax.f32 %v259_v37, 0.0  ;;  %v224_v45 = vmul.f32 %v464_v0, %v185_v31  ;;  %v225_v46 = vmul.f32 %v464_v0, %v186_v32  ;;  %v226_v47 = vmul.f32 %v464_v0, %v187_v33  ;;  %v197_v13 = vld [vmem:[%s469_s20 + $0xb8] sm:$0xff]  ;;  %v198_v26 = vld [vmem:[%s469_s20 + $0xc0] sm:$0xff] }
  0x19   : > { %320 = vst [vmem:[%s497_s25 + $0x20] sm:$0xff] %v288_v35  ;;  %321 = vst [vmem:[%s497_s25 + $0x28] sm:$0xff] %v289_v36  ;;  %v260_v48 = vadd.f32 %v474_v1, %v221_v40  ;;  %v261_v49 = vadd.f32 %v474_v1, %v222_v41  ;;  %v262_v50 = vadd.f32 %v474_v1, %v223_v42  ;;  %v199_v27 = vld [vmem:[%s469_s20 + $0xc8] sm:$0xff]  ;;  %v200_v28 = vld [vmem:[%s469_s20 + $0xd0] sm:$0xff] }
  0x1a   : > { %322 = vst [vmem:[%s497_s25 + $0x30] sm:$0xff] %v290_v39  ;;  %v227_v51 = vmul.f32 %v464_v0, %v188_v38  ;;  %323 = vst [vmem:[%s497_s25 + $0x38] sm:$0xff] %v291_v44  ;;  %v263_v52 = vadd.f32 %v474_v1, %v224_v45  ;;  %v264_v53 = vadd.f32 %v474_v1, %v225_v46  ;;  %v201_v33 = vld [vmem:[%s469_s20 + $0xd8] sm:$0xff]  ;;  %v202_v34 = vld [vmem:[%s469_s20 + $0xe0] sm:$0xff] }
  0x1b   : > { %v265_v54 = vadd.f32 %v474_v1, %v226_v47  ;;  %v228_v55 = vmul.f32 %v464_v0, %v189_v43  ;;  %v292_v59 = vmax.f32 %v260_v48, 0.0  ;;  %v293_v60 = vmax.f32 %v261_v49, 0.0  ;;  %v203_v35 = vld [vmem:[%s469_s20 + $0xe8] sm:$0xff]  ;;  %v204_v40 = vld [vmem:[%s469_s20 + $0xf0] sm:$0xff]  ;;  %v205_v45 = vld [vmem:[%s469_s20 + $0xf8] sm:$0xff] }
  0x1c   : > { %v294_v61 = vmax.f32 %v262_v50, 0.0  ;;  %v266_v62 = vadd.f32 %v474_v1, %v227_v51  ;;  %v295_v4 = vmax.f32 %v263_v52, 0.0  ;;  %v296_v5 = vmax.f32 %v264_v53, 0.0 }
  0x1d   : > { %v297_v6 = vmax.f32 %v265_v54, 0.0  ;;  %v267_v7 = vadd.f32 %v474_v1, %v228_v55  ;;  %324 = vst [vmem:[%s497_s25 + $0x40] sm:$0xff] %v292_v59  ;;  %325 = vst [vmem:[%s497_s25 + $0x48] sm:$0xff] %v293_v60  ;;  %v229_v10 = vmul.f32 %v464_v0, %v190_v56  ;;  %v230_v11 = vmul.f32 %v464_v0, %v191_v57 }
  0x1e   : > { %326 = vst [vmem:[%s497_s25 + $0x50] sm:$0xff] %v294_v61  ;;  %v298_v9 = vmax.f32 %v266_v62, 0.0  ;;  %v231_v12 = vmul.f32 %v464_v0, %v192_v58  ;;  %327 = vst [vmem:[%s497_s25 + $0x58] sm:$0xff] %v295_v4  ;;  %v232_v15 = vmul.f32 %v464_v0, %v193_v63  ;;  %v233_v16 = vmul.f32 %v464_v0, %v194_v2 }
  0x1f   : > { %328 = vst [vmem:[%s497_s25 + $0x60] sm:$0xff] %v296_v5  ;;  %329 = vst [vmem:[%s497_s25 + $0x68] sm:$0xff] %v297_v6  ;;  %v299_v14 = vmax.f32 %v267_v7, 0.0  ;;  %v234_v17 = vmul.f32 %v464_v0, %v195_v3  ;;  %v268_v18 = vadd.f32 %v474_v1, %v229_v10  ;;  %v269_v19 = vadd.f32 %v474_v1, %v230_v11 }
  0x20   : > { %330 = vst [vmem:[%s497_s25 + $0x70] sm:$0xff] %v298_v9  ;;  %v270_v20 = vadd.f32 %v474_v1, %v231_v12  ;;  %v235_v21 = vmul.f32 %v464_v0, %v196_v8  ;;  %v271_v22 = vadd.f32 %v474_v1, %v232_v15  ;;  %v272_v23 = vadd.f32 %v474_v1, %v233_v16 }
  0x21   : > { %331 = vst [vmem:[%s497_s25 + $0x78] sm:$0xff] %v299_v14  ;;  %v273_v24 = vadd.f32 %v474_v1, %v234_v17  ;;  %v236_v25 = vmul.f32 %v464_v0, %v197_v13  ;;  %v300_v29 = vmax.f32 %v268_v18, 0.0  ;;  %v301_v30 = vmax.f32 %v269_v19, 0.0 }
  0x22   : > { %v302_v31 = vmax.f32 %v270_v20, 0.0  ;;  %v274_v32 = vadd.f32 %v474_v1, %v235_v21  ;;  %v303_v36 = vmax.f32 %v271_v22, 0.0  ;;  %v304_v37 = vmax.f32 %v272_v23, 0.0 }
  0x23   : > { %v305_v38 = vmax.f32 %v273_v24, 0.0  ;;  %v275_v39 = vadd.f32 %v474_v1, %v236_v25  ;;  %332 = vst [vmem:[%s497_s25 + $0x80] sm:$0xff] %v300_v29  ;;  %333 = vst [vmem:[%s497_s25 + $0x88] sm:$0xff] %v301_v30  ;;  %v237_v42 = vmul.f32 %v464_v0, %v198_v26  ;;  %v238_v43 = vmul.f32 %v464_v0, %v199_v27 }
  0x24   : > { %334 = vst [vmem:[%s497_s25 + $0x90] sm:$0xff] %v302_v31  ;;  %v306_v41 = vmax.f32 %v274_v32, 0.0  ;;  %v239_v44 = vmul.f32 %v464_v0, %v200_v28  ;;  %335 = vst [vmem:[%s497_s25 + $0x98] sm:$0xff] %v303_v36  ;;  %v240_v47 = vmul.f32 %v464_v0, %v201_v33  ;;  %v241_v48 = vmul.f32 %v464_v0, %v202_v34 }
  0x25   : > { %336 = vst [vmem:[%s497_s25 + $0xa0] sm:$0xff] %v304_v37  ;;  %337 = vst [vmem:[%s497_s25 + $0xa8] sm:$0xff] %v305_v38  ;;  %v307_v46 = vmax.f32 %v275_v39, 0.0  ;;  %v242_v49 = vmul.f32 %v464_v0, %v203_v35  ;;  %v276_v50 = vadd.f32 %v474_v1, %v237_v42  ;;  %v277_v51 = vadd.f32 %v474_v1, %v238_v43 }
  0x26   : > { %338 = vst [vmem:[%s497_s25 + $0xb0] sm:$0xff] %v306_v41  ;;  %v278_v52 = vadd.f32 %v474_v1, %v239_v44  ;;  %v243_v53 = vmul.f32 %v464_v0, %v204_v40  ;;  %v279_v54 = vadd.f32 %v474_v1, %v240_v47  ;;  %v280_v55 = vadd.f32 %v474_v1, %v241_v48 }
  0x27   : > { %339 = vst [vmem:[%s497_s25 + $0xb8] sm:$0xff] %v307_v46  ;;  %v281_v56 = vadd.f32 %v474_v1, %v242_v49  ;;  %v244_v57 = vmul.f32 %v464_v0, %v205_v45  ;;  %v308_v58 = vmax.f32 %v276_v50, 0.0  ;;  %v309_v59 = vmax.f32 %v277_v51, 0.0 }
  0x28   : > { %v310_v60 = vmax.f32 %v278_v52, 0.0  ;;  %v282_v61 = vadd.f32 %v474_v1, %v243_v53  ;;  %v311_v62 = vmax.f32 %v279_v54, 0.0  ;;  %v312_v63 = vmax.f32 %v280_v55, 0.0 }
  0x29   : > { %v313_v2 = vmax.f32 %v281_v56, 0.0  ;;  %v283_v3 = vadd.f32 %v474_v1, %v244_v57  ;;  %340 = vst [vmem:[%s497_s25 + $0xc0] sm:$0xff] %v308_v58  ;;  %341 = vst [vmem:[%s497_s25 + $0xc8] sm:$0xff] %v309_v59 }
  0x2a   : > { %342 = vst [vmem:[%s497_s25 + $0xd0] sm:$0xff] %v310_v60  ;;  %v314_v4 = vmax.f32 %v282_v61, 0.0  ;;  %343 = vst [vmem:[%s497_s25 + $0xd8] sm:$0xff] %v311_v62 }
  0x2b   : > { %344 = vst [vmem:[%s497_s25 + $0xe0] sm:$0xff] %v312_v63  ;;  %345 = vst [vmem:[%s497_s25 + $0xe8] sm:$0xff] %v313_v2  ;;  %v315_v0 = vmax.f32 %v283_v3, 0.0 }
  0x2c   : > { %346 = vst [vmem:[%s497_s25 + $0xf0] sm:$0xff] %v314_v4 }
  0x2d   : > { %347 = vst [vmem:[%s497_s25 + $0xf8] sm:$0xff] %v315_v0 }
  0x2e PF: > { %s13_s12 = sadd.s32 1, %s431_s12  }
  0x2f   : > { %p10_p4 = scmp.ge.s32.totalorder %s13_s12, 10  }
  0x31   :  { %12 = sbr.rel (!%p10_p4) target bundleno = 1 (0x1), region = 62 }

// kernel: resize_forward.34
= control target key start
LH: loop header
LB: loop body
LE: loop exit
PB: predicated region body
PF: predicated region fallthrough
CT: control target
= control target key end

     0   :  { %s1167_s15 = smov 0   ;;  %s1750_s0 = inlined_call_operand.vmem [shape: bf16[512,128], index: 0, kind: input, shape index: {}]   ;;  %s1751_s1 = inlined_call_operand.vmem [shape: bf16[128,256], index: 1, kind: input, shape index: {}]   ;;  %s1752_s2 = inlined_call_operand.vmem [shape: f32[512,256], index: 2, kind: output, shape index: {0}]   ;;  %s1753_s3 = inlined_call_operand.vmem [shape: f32[1,256], index: 3, kind: output, shape index: {1}]   ;;  %s1754_s4 = inlined_call_operand.vmem [shape: f32[1,256], index: 4, kind: output, shape index: {2}]  }
   0x1 LB: > { %s1018_s16 = sadd.s32 4294967295, %s1137_s15   ;;  %p1022_p0 = scmp.ge.s32.totalorder %s1137_s15, 1  ;;  %s1137_s15 = sphi %s1167_s15, %s15_s15  }
   0x2   : > { %p158_p1 = scmp.lt.s32.totalorder %s1137_s15, 3 }
   0x4   : > { %p159_p2 = pnand %p1022_p0, %p158_p1 }
   0x6   : > { %162 = sbr.rel (%p159_p2) target bundleno = 425 (0x1a9), region = 28 }
   0xd   : > { %v1091_v0 = vld [vmem:[%s1751_s1 + $0x4] ss:$8 sps:$4 sm:$0xff]   ;;  %s1023_s19 = sshll.u32 %s1018_s16, 5  ;;  %v1093_v1 = vld [vmem:[%s1751_s1] ss:$8 sps:$4 sm:$0xff]   ;;  %v1139_v2 = vmov 0  }
   0xe   : > { %455 = vmatprep.mubr.bf16.mxu0 %v1139_v2  ;;  %535 = vmatprep.mubr.bf16.mxu1 %v1139_v2  ;;  %p186_p3 = scmp.lt.s32.totalorder %s1023_s19, 63  ;;  %v1094_v3 = vld [vmem:[%s1751_s1 + $0x14] ss:$8 sps:$4 sm:$0xff]   ;;  %v1096_v4 = vld [vmem:[%s1751_s1 + $0x10] ss:$8 sps:$4 sm:$0xff]   ;;  %p1060_p4 = scmp.ne.s32.totalorder %s1018_s16, 0 }
   0xf   : > { %423 = vmatprep.subr.bf16.mxu0 %v1091_v0  ;;  %1064 = vmatprep.subr.bf16.mxu1 %v1091_v0  ;;  %v1097_v5 = vld [vmem:[%s1751_s1 + $0x24] ss:$8 sps:$4 sm:$0xff]   ;;  %v1099_v6 = vld [vmem:[%s1751_s1 + $0x20] ss:$8 sps:$4 sm:$0xff]   ;;  %v1100_v7 = vld [vmem:[%s1751_s1 + $0x34] ss:$8 sps:$4 sm:$0xff]  }
  0x10   : > { %424 = vmatpush1.bf16.msra.mxu0 %v1093_v1  ;;  %1072 = vmatpush1.bf16.msra.mxu1 %v1093_v1  ;;  %s1806_s19 = smov (!%p186_p3, %s1023_s19), 63  ;;  %v1102_v8 = vld [vmem:[%s1751_s1 + $0x30] ss:$8 sps:$4 sm:$0xff]   ;;  %v1103_v9 = vld [vmem:[%s1751_s1 + $0x44] ss:$8 sps:$4 sm:$0xff]  }
  0x11   : > { %425 = vmatprep.subr.bf16.mxu0 %v1094_v3  ;;  %1065 = vmatprep.subr.bf16.mxu1 %v1094_v3  ;;  %s1024_s28 = sshll.u32 %s1806_s19, 2  ;;  %v1105_v10 = vld [vmem:[%s1751_s1 + $0x40] ss:$8 sps:$4 sm:$0xff]   ;;  %v1106_v11 = vld [vmem:[%s1751_s1 + $0x54] ss:$8 sps:$4 sm:$0xff]   ;;  %s1063_s5 = sshll.u32 %s1806_s19, 4 }
  0x12   : > { %s1206_s9 = scalar_lea.vmem %s1750_s0, %s1024_s28  ;;  %v1108_v12 = vld [vmem:[%s1751_s1 + $0x50] ss:$8 sps:$4 sm:$0xff]   ;;  %v1109_v13 = vld [vmem:[%s1751_s1 + $0x64] ss:$8 sps:$4 sm:$0xff]   ;;  %v1111_v14 = vld [vmem:[%s1751_s1 + $0x60] ss:$8 sps:$4 sm:$0xff]   ;;  %s1269_s8 = scalar_lea.vmem %s1752_s2, %s1063_s5 }
  0x13   : > { %v1112_v15 = vld [vmem:[%s1751_s1 + $0x74] ss:$8 sps:$4 sm:$0xff]   ;;  %v1114_v16 = vld [vmem:[%s1751_s1 + $0x70] ss:$8 sps:$4 sm:$0xff]   ;;  %v1115_v17 = vld [vmem:[%s1206_s9] sm:$0xff]  }
  0x14   : > { %426 = vmatpush1.bf16.msra.mxu0 %v1096_v4  ;;  %1073 = vmatpush1.bf16.msra.mxu1 %v1096_v4  ;;  %v1116_v18 = vld [vmem:[%s1206_s9 + $0x40] sm:$0xff]   ;;  %v1117_v19 = vld [vmem:[%s1206_s9 + $0x8] sm:$0xff]   ;;  %v1119_v21 = vld [vmem:[%s1206_s9 + $0x10] sm:$0xff]  }
  0x15   : > { %427 = vmatprep.subr.bf16.mxu0 %v1097_v5  ;;  %1066 = vmatprep.subr.bf16.mxu1 %v1097_v5  ;;  %v1118_v20 = vld [vmem:[%s1206_s9 + $0x48] sm:$0xff]   ;;  %v1120_v22 = vld [vmem:[%s1206_s9 + $0x50] sm:$0xff]   ;;  %v1121_v23 = vld [vmem:[%s1206_s9 + $0x18] sm:$0xff]  }
  0x16   : > { %v1122_v24 = vld [vmem:[%s1206_s9 + $0x58] sm:$0xff]   ;;  %v1123_v25 = vld [vmem:[%s1206_s9 + $0x20] sm:$0xff]   ;;  %v1125_v27 = vld [vmem:[%s1206_s9 + $0x28] sm:$0xff]  }
  0x17   : > { %v1124_v26 = vld [vmem:[%s1206_s9 + $0x60] sm:$0xff]   ;;  %v1126_v28 = vld [vmem:[%s1206_s9 + $0x68] sm:$0xff]   ;;  %v1127_v29 = vld [vmem:[%s1206_s9 + $0x30] sm:$0xff]  }
  0x18   : > { %428 = vmatpush1.bf16.msra.mxu0 %v1099_v6  ;;  %1074 = vmatpush1.bf16.msra.mxu1 %v1099_v6  ;;  %v1128_v30 = vld [vmem:[%s1206_s9 + $0x70] sm:$0xff]   ;;  %v1129_v31 = vld [vmem:[%s1206_s9 + $0x38] sm:$0xff]  }
  0x19   : > { %429 = vmatprep.subr.bf16.mxu0 %v1100_v7  ;;  %1067 = vmatprep.subr.bf16.mxu1 %v1100_v7  ;;  %v1130_v32 = vld [vmem:[%s1206_s9 + $0x78] sm:$0xff]  }
  0x1c   : > { %430 = vmatpush1.bf16.msra.mxu0 %v1102_v8  ;;  %1075 = vmatpush1.bf16.msra.mxu1 %v1102_v8 }
  0x1d   : > { %431 = vmatprep.subr.bf16.mxu0 %v1103_v9  ;;  %1068 = vmatprep.subr.bf16.mxu1 %v1103_v9 }
  0x20   : > { %432 = vmatpush1.bf16.msra.mxu0 %v1105_v10  ;;  %1076 = vmatpush1.bf16.msra.mxu1 %v1105_v10 }
  0x21   : > { %433 = vmatprep.subr.bf16.mxu0 %v1106_v11  ;;  %1069 = vmatprep.subr.bf16.mxu1 %v1106_v11 }
  0x24   : > { %434 = vmatpush1.bf16.msra.mxu0 %v1108_v12  ;;  %1077 = vmatpush1.bf16.msra.mxu1 %v1108_v12 }
  0x25   : > { %435 = vmatprep.subr.bf16.mxu0 %v1109_v13  ;;  %1070 = vmatprep.subr.bf16.mxu1 %v1109_v13 }
  0x28   : > { %436 = vmatpush1.bf16.msra.mxu0 %v1111_v14  ;;  %1078 = vmatpush1.bf16.msra.mxu1 %v1111_v14 }
  0x29   : > { %437 = vmatprep.subr.bf16.mxu0 %v1112_v15  ;;  %1071 = vmatprep.subr.bf16.mxu1 %v1112_v15 }
  0x2c   : > { %438 = vmatpush1.bf16.msra.mxu0 %v1114_v16  ;;  %1079 = vmatpush1.bf16.msra.mxu1 %v1114_v16 }
  0x2f   : > { %456 = vmatmul.mubr.bf16.vlgmr.msra.gmra.mrb[0].mxu0 %v1115_v17  ;;  %536 = vmatmul.mubr.bf16.vlgmr.msra.gmra.mrb[0].mxu1 %v1116_v18 }
  0x30   : > { %465 = vmatprep.mubr.bf16.mxu0 %v1139_v2  ;;  %545 = vmatprep.mubr.bf16.mxu1 %v1139_v2 }
  0x37   : > { %466 = vmatmul.mubr.bf16.gmra.mrb[4].mxu0 %v1117_v19  ;;  %546 = vmatmul.mubr.bf16.gmra.mrb[4].mxu1 %v1118_v20 }
  0x38   : > { %475 = vmatprep.mubr.bf16.mxu0 %v1139_v2  ;;  %555 = vmatprep.mubr.bf16.mxu1 %v1139_v2 }
  0x3f   : > { %476 = vmatmul.mubr.bf16.gmra.mrb[8].mxu0 %v1119_v21  ;;  %556 = vmatmul.mubr.bf16.gmra.mrb[8].mxu1 %v1120_v22 }
  0x40   : > { %485 = vmatprep.mubr.bf16.mxu0 %v1139_v2  ;;  %565 = vmatprep.mubr.bf16.mxu1 %v1139_v2 }
  0x47   : > { %486 = vmatmul.mubr.bf16.gmra.mrb[12].mxu0 %v1121_v23  ;;  %566 = vmatmul.mubr.bf16.gmra.mrb[12].mxu1 %v1122_v24 }
  0x48   : > { %495 = vmatprep.mubr.bf16.mxu0 %v1139_v2  ;;  %575 = vmatprep.mubr.bf16.mxu1 %v1139_v2 }
  0x4f   : > { %496 = vmatmul.mubr.bf16.gmra.mrb[16].mxu0 %v1123_v25  ;;  %576 = vmatmul.mubr.bf16.gmra.mrb[16].mxu1 %v1124_v26 }
  0x50   : > { %505 = vmatprep.mubr.bf16.mxu0 %v1139_v2  ;;  %585 = vmatprep.mubr.bf16.mxu1 %v1139_v2 }
  0x57   : > { %506 = vmatmul.mubr.bf16.gmra.mrb[20].mxu0 %v1125_v27  ;;  %586 = vmatmul.mubr.bf16.gmra.mrb[20].mxu1 %v1126_v28 }
  0x58   : > { %515 = vmatprep.mubr.bf16.mxu0 %v1139_v2  ;;  %595 = vmatprep.mubr.bf16.mxu1 %v1139_v2 }
  0x5f   : > { %516 = vmatmul.mubr.bf16.gmra.mrb[24].mxu0 %v1127_v29  ;;  %596 = vmatmul.mubr.bf16.gmra.mrb[24].mxu1 %v1128_v30 }
  0x60   : > { %525 = vmatprep.mubr.bf16.mxu0 %v1139_v2  ;;  %605 = vmatprep.mubr.bf16.mxu1 %v1139_v2 }
  0x67   : > { %526 = vmatmul.mubr.bf16.gmra.mrb[28].mxu0 %v1129_v31  ;;  %606 = vmatmul.mubr.bf16.gmra.mrb[28].mxu1 %v1130_v32 }
 0x102   : > { %v1271_v33 = vpop.f32.mrb[0].mxu0  ;;  %v1273_v34 = vpop.f32.mrb[0].mxu1 }
 0x103   : > { %616 = vst [vmem:[%s1269_s8] sm:$0xff] %v1271_v33  ;;  %648 = vst [vmem:[%s1269_s8 + $0x100] sm:$0xff] %v1273_v34  ;;  %v1279_v35 = vpop.f32.mrb[1].mxu0  ;;  %v1281_v36 = vpop.f32.mrb[1].mxu1 }
 0x104   : > { %617 = vst [vmem:[%s1269_s8 + $0x8] sm:$0xff] %v1279_v35  ;;  %649 = vst [vmem:[%s1269_s8 + $0x108] sm:$0xff] %v1281_v36  ;;  %v1287_v37 = vpop.f32.mrb[2].mxu0  ;;  %v1289_v38 = vpop.f32.mrb[2].mxu1 }
 0x105   : > { %618 = vst [vmem:[%s1269_s8 + $0x10] sm:$0xff] %v1287_v37  ;;  %650 = vst [vmem:[%s1269_s8 + $0x110] sm:$0xff] %v1289_v38  ;;  %v1295_v39 = vpop.f32.mrb[3].mxu0  ;;  %v1297_v40 = vpop.f32.mrb[3].mxu1 }
 0x106   : > { %619 = vst [vmem:[%s1269_s8 + $0x18] sm:$0xff] %v1295_v39  ;;  %651 = vst [vmem:[%s1269_s8 + $0x118] sm:$0xff] %v1297_v40 }
 0x10a   : > { %v1303_v41 = vpop.f32.mrb[4].mxu0  ;;  %v1305_v42 = vpop.f32.mrb[4].mxu1 }
 0x10b   : > { %620 = vst [vmem:[%s1269_s8 + $0x20] sm:$0xff] %v1303_v41  ;;  %652 = vst [vmem:[%s1269_s8 + $0x120] sm:$0xff] %v1305_v42  ;;  %v1311_v43 = vpop.f32.mrb[5].mxu0  ;;  %v1313_v44 = vpop.f32.mrb[5].mxu1 }
 0x10c   : > { %621 = vst [vmem:[%s1269_s8 + $0x28] sm:$0xff] %v1311_v43  ;;  %653 = vst [vmem:[%s1269_s8 + $0x128] sm:$0xff] %v1313_v44  ;;  %v1319_v45 = vpop.f32.mrb[6].mxu0  ;;  %v1321_v46 = vpop.f32.mrb[6].mxu1 }
 0x10d   : > { %622 = vst [vmem:[%s1269_s8 + $0x30] sm:$0xff] %v1319_v45  ;;  %654 = vst [vmem:[%s1269_s8 + $0x130] sm:$0xff] %v1321_v46  ;;  %v1327_v47 = vpop.f32.mrb[7].mxu0  ;;  %v1329_v48 = vpop.f32.mrb[7].mxu1 }
 0x10e   : > { %623 = vst [vmem:[%s1269_s8 + $0x38] sm:$0xff] %v1327_v47  ;;  %655 = vst [vmem:[%s1269_s8 + $0x138] sm:$0xff] %v1329_v48 }
 0x112   : > { %v1335_v49 = vpop.f32.mrb[8].mxu0  ;;  %v1337_v50 = vpop.f32.mrb[8].mxu1 }
 0x113   : > { %624 = vst [vmem:[%s1269_s8 + $0x40] sm:$0xff] %v1335_v49  ;;  %656 = vst [vmem:[%s1269_s8 + $0x140] sm:$0xff] %v1337_v50  ;;  %v1343_v51 = vpop.f32.mrb[9].mxu0  ;;  %v1345_v52 = vpop.f32.mrb[9].mxu1 }
 0x114   : > { %625 = vst [vmem:[%s1269_s8 + $0x48] sm:$0xff] %v1343_v51  ;;  %657 = vst [vmem:[%s1269_s8 + $0x148] sm:$0xff] %v1345_v52  ;;  %v1351_v53 = vpop.f32.mrb[10].mxu0  ;;  %v1353_v54 = vpop.f32.mrb[10].mxu1 }
 0x115   : > { %626 = vst [vmem:[%s1269_s8 + $0x50] sm:$0xff] %v1351_v53  ;;  %658 = vst [vmem:[%s1269_s8 + $0x150] sm:$0xff] %v1353_v54  ;;  %v1359_v55 = vpop.f32.mrb[11].mxu0  ;;  %v1361_v56 = vpop.f32.mrb[11].mxu1 }
 0x116   : > { %627 = vst [vmem:[%s1269_s8 + $0x58] sm:$0xff] %v1359_v55  ;;  %659 = vst [vmem:[%s1269_s8 + $0x158] sm:$0xff] %v1361_v56 }
 0x11a   : > { %v1367_v57 = vpop.f32.mrb[12].mxu0  ;;  %v1369_v58 = vpop.f32.mrb[12].mxu1 }
 0x11b   : > { %628 = vst [vmem:[%s1269_s8 + $0x60] sm:$0xff] %v1367_v57  ;;  %660 = vst [vmem:[%s1269_s8 + $0x160] sm:$0xff] %v1369_v58  ;;  %v1375_v59 = vpop.f32.mrb[13].mxu0  ;;  %v1377_v60 = vpop.f32.mrb[13].mxu1 }
 0x11c   : > { %629 = vst [vmem:[%s1269_s8 + $0x68] sm:$0xff] %v1375_v59  ;;  %661 = vst [vmem:[%s1269_s8 + $0x168] sm:$0xff] %v1377_v60  ;;  %v1383_v61 = vpop.f32.mrb[14].mxu0  ;;  %v1385_v62 = vpop.f32.mrb[14].mxu1 }
 0x11d   : > { %630 = vst [vmem:[%s1269_s8 + $0x70] sm:$0xff] %v1383_v61  ;;  %662 = vst [vmem:[%s1269_s8 + $0x170] sm:$0xff] %v1385_v62  ;;  %v1391_v63 = vpop.f32.mrb[15].mxu0  ;;  %v1393_v0 = vpop.f32.mrb[15].mxu1 }
 0x11e   : > { %631 = vst [vmem:[%s1269_s8 + $0x78] sm:$0xff] %v1391_v63  ;;  %663 = vst [vmem:[%s1269_s8 + $0x178] sm:$0xff] %v1393_v0 }
 0x122   : > { %v1399_v1 = vpop.f32.mrb[16].mxu0  ;;  %v1401_v2 = vpop.f32.mrb[16].mxu1 }
 0x123   : > { %632 = vst [vmem:[%s1269_s8 + $0x80] sm:$0xff] %v1399_v1  ;;  %664 = vst [vmem:[%s1269_s8 + $0x180] sm:$0xff] %v1401_v2  ;;  %v1407_v3 = vpop.f32.mrb[17].mxu0  ;;  %v1409_v4 = vpop.f32.mrb[17].mxu1 }
 0x124   : > { %633 = vst [vmem:[%s1269_s8 + $0x88] sm:$0xff] %v1407_v3  ;;  %665 = vst [vmem:[%s1269_s8 + $0x188] sm:$0xff] %v1409_v4  ;;  %v1415_v5 = vpop.f32.mrb[18].mxu0  ;;  %v1417_v6 = vpop.f32.mrb[18].mxu1 }
 0x125   : > { %634 = vst [vmem:[%s1269_s8 + $0x90] sm:$0xff] %v1415_v5  ;;  %666 = vst [vmem:[%s1269_s8 + $0x190] sm:$0xff] %v1417_v6  ;;  %v1423_v7 = vpop.f32.mrb[19].mxu0  ;;  %v1425_v8 = vpop.f32.mrb[19].mxu1 }
 0x126   : > { %635 = vst [vmem:[%s1269_s8 + $0x98] sm:$0xff] %v1423_v7  ;;  %667 = vst [vmem:[%s1269_s8 + $0x198] sm:$0xff] %v1425_v8 }
 0x12a   : > { %v1431_v9 = vpop.f32.mrb[20].mxu0  ;;  %v1433_v10 = vpop.f32.mrb[20].mxu1 }
 0x12b   : > { %1779 = vst [vmem:[#allocation2_spill] sm:$0xff] %v1433_v10  ;;  %636 = vst [vmem:[%s1269_s8 + $0xa0] sm:$0xff] %v1431_v9  ;;  %v1439_v11 = vpop.f32.mrb[21].mxu0  ;;  %v1441_v12 = vpop.f32.mrb[21].mxu1 }
 0x12c   : > { %668 = vst [vmem:[%s1269_s8 + $0x1a0] sm:$0xff] %v1433_v10  ;;  %1780 = vst [vmem:[#allocation3_spill] sm:$0xff] %v1441_v12  ;;  %v1447_v13 = vpop.f32.mrb[22].mxu0  ;;  %v1449_v14 = vpop.f32.mrb[22].mxu1 }
 0x12d   : > { %637 = vst [vmem:[%s1269_s8 + $0xa8] sm:$0xff] %v1439_v11  ;;  %669 = vst [vmem:[%s1269_s8 + $0x1a8] sm:$0xff] %v1441_v12  ;;  %v1455_v15 = vpop.f32.mrb[23].mxu0  ;;  %v1457_v16 = vpop.f32.mrb[23].mxu1 }
 0x12e   : > { %1781 = vst [vmem:[#allocation4_spill] sm:$0xff] %v1449_v14  ;;  %638 = vst [vmem:[%s1269_s8 + $0xb0] sm:$0xff] %v1447_v13 }
 0x12f   : > { %670 = vst [vmem:[%s1269_s8 + $0x1b0] sm:$0xff] %v1449_v14  ;;  %1782 = vst [vmem:[#allocation5_spill] sm:$0xff] %v1457_v16 }
 0x130   : > { %639 = vst [vmem:[%s1269_s8 + $0xb8] sm:$0xff] %v1455_v15  ;;  %671 = vst [vmem:[%s1269_s8 + $0x1b8] sm:$0xff] %v1457_v16 }
 0x132   : > { %v1463_v17 = vpop.f32.mrb[24].mxu0  ;;  %v1465_v18 = vpop.f32.mrb[24].mxu1 }
 0x133   : > { %1783 = vst [vmem:[#allocation6_spill] sm:$0xff] %v1465_v18  ;;  %640 = vst [vmem:[%s1269_s8 + $0xc0] sm:$0xff] %v1463_v17  ;;  %v1471_v19 = vpop.f32.mrb[25].mxu0  ;;  %v1473_v20 = vpop.f32.mrb[25].mxu1 }
 0x134   : > { %672 = vst [vmem:[%s1269_s8 + $0x1c0] sm:$0xff] %v1465_v18  ;;  %1784 = vst [vmem:[#allocation7_spill] sm:$0xff] %v1473_v20  ;;  %v1479_v21 = vpop.f32.mrb[26].mxu0  ;;  %v1481_v22 = vpop.f32.mrb[26].mxu1 }
 0x135   : > { %641 = vst [vmem:[%s1269_s8 + $0xc8] sm:$0xff] %v1471_v19  ;;  %673 = vst [vmem:[%s1269_s8 + $0x1c8] sm:$0xff] %v1473_v20  ;;  %v1487_v23 = vpop.f32.mrb[27].mxu0  ;;  %v1489_v24 = vpop.f32.mrb[27].mxu1 }
 0x136   : > { %1785 = vst [vmem:[#allocation8_spill] sm:$0xff] %v1481_v22  ;;  %642 = vst [vmem:[%s1269_s8 + $0xd0] sm:$0xff] %v1479_v21 }
 0x137   : > { %674 = vst [vmem:[%s1269_s8 + $0x1d0] sm:$0xff] %v1481_v22  ;;  %1786 = vst [vmem:[#allocation9_spill] sm:$0xff] %v1489_v24 }
 0x138   : > { %643 = vst [vmem:[%s1269_s8 + $0xd8] sm:$0xff] %v1487_v23  ;;  %675 = vst [vmem:[%s1269_s8 + $0x1d8] sm:$0xff] %v1489_v24 }
 0x13a   : > { %v1495_v25 = vpop.f32.mrb[28].mxu0  ;;  %v1497_v26 = vpop.f32.mrb[28].mxu1  ;;  %683 = sbr.rel (%p1060_p4) target bundleno = 322 (0x142), region = 32 }
 0x13b   : > { %1787 = vst [vmem:[#allocation10_spill] sm:$0xff] %v1497_v26  ;;  %644 = vst [vmem:[%s1269_s8 + $0xe0] sm:$0xff] %v1495_v25  ;;  %v1503_v27 = vpop.f32.mrb[29].mxu0  ;;  %v1505_v28 = vpop.f32.mrb[29].mxu1 }
 0x13c   : > { %676 = vst [vmem:[%s1269_s8 + $0x1e0] sm:$0xff] %v1497_v26  ;;  %1788 = vst [vmem:[#allocation11_spill] sm:$0xff] %v1505_v28  ;;  %v1511_v29 = vpop.f32.mrb[30].mxu0  ;;  %v1513_v30 = vpop.f32.mrb[30].mxu1  ;;  %v1140_v26 = vmov (!%p1060_p4), 0.0  }
 0x13d   : > { %645 = vst [vmem:[%s1269_s8 + $0xe8] sm:$0xff] %v1503_v27  ;;  %677 = vst [vmem:[%s1269_s8 + $0x1e8] sm:$0xff] %v1505_v28  ;;  %v1519_v31 = vpop.f32.mrb[31].mxu0  ;;  %v1521_v32 = vpop.f32.mrb[31].mxu1  ;;  %v684_v28 = vlaneseq (!%p1060_p4) }
 0x13e   : > { %1789 = vst [vmem:[#allocation12_spill] sm:$0xff] %v1513_v30  ;;  %646 = vst [vmem:[%s1269_s8 + $0xf0] sm:$0xff] %v1511_v29 }
 0x13f   : > { %678 = vst [vmem:[%s1269_s8 + $0x1f0] sm:$0xff] %v1513_v30  ;;  %1790 = vst [vmem:[#allocation13_spill] sm:$0xff] %v1521_v32  ;;  %vm686_vm0 = vcmp.lt.s32.totalorder (!%p1060_p4), %v684_v28, 256 }
 0x140   : > { %647 = vst [vmem:[%s1269_s8 + $0xf8] sm:$0xff] %v1519_v31  ;;  %679 = vst [vmem:[%s1269_s8 + $0x1f8] sm:$0xff] %v1521_v32 }
 0x141   : > { %688 = vst.msk [vmem:[%s1753_s3] sm:$0x3] %vm686_vm0, %v1140_v26  ;;  %689 = vst.msk [vmem:[%s1754_s4] sm:$0x3] %vm686_vm0, %v1140_v26 }
 0x142 PF: > { %v691_v30 = vadd.f32 %v1287_v37, %v1271_v33  ;;  %v728_v32 = vadd.f32 %v1295_v39, %v1279_v35 }
 0x144   : > { %v692_v24 = vadd.f32 %v691_v30, %v1303_v41  ;;  %v729_v28 = vadd.f32 %v728_v32, %v1311_v43 }
 0x146   : > { %v693_v22 = vadd.f32 %v692_v24, %v1319_v45  ;;  %v730_v20 = vadd.f32 %v729_v28, %v1327_v47 }
 0x148   : > { %v694_v18 = vadd.f32 %v693_v22, %v1335_v49  ;;  %v731_v16 = vadd.f32 %v730_v20, %v1343_v51 }
 0x14a   : > { %v695_v26 = vadd.f32 %v694_v18, %v1351_v53  ;;  %v732_v14 = vadd.f32 %v731_v16, %v1359_v55 }
 0x14c   : > { %v696_v12 = vadd.f32 %v695_v26, %v1367_v57  ;;  %v733_v10 = vadd.f32 %v732_v14, %v1375_v59  ;;  %v790_v26 = vmul.f32 %v1271_v33, %v1271_v33 }
 0x14e   : > { %v697_v30 = vadd.f32 %v696_v12, %v1383_v61  ;;  %v734_v32 = vadd.f32 %v733_v10, %v1391_v63  ;;  %v792_v12 = vmul.f32 %v1287_v37, %v1287_v37  ;;  %v795_v37 = vmul.f32 %v1311_v43, %v1311_v43 }
 0x150   : > { %v698_v24 = vadd.f32 %v697_v30, %v1399_v1  ;;  %v735_v28 = vadd.f32 %v734_v32, %v1407_v3  ;;  %v791_v30 = vmul.f32 %v1279_v35, %v1279_v35  ;;  %v793_v32 = vmul.f32 %v1295_v39, %v1295_v39 }
 0x151   : > { %v797_v39 = vmul.f32 %v1327_v47, %v1327_v47 }
 0x152   : > { %v699_v22 = vadd.f32 %v698_v24, %v1415_v5  ;;  %v736_v20 = vadd.f32 %v735_v28, %v1423_v7  ;;  %v794_v24 = vmul.f32 %v1303_v41, %v1303_v41  ;;  %v798_v41 = vmul.f32 %v1335_v49, %v1335_v49 }
 0x153   : > { %v801_v49 = vmul.f32 %v1359_v55, %v1359_v55 }
 0x154   : > { %v700_v18 = vadd.f32 %v699_v22, %v1431_v9  ;;  %v737_v16 = vadd.f32 %v736_v20, %v1439_v11  ;;  %v796_v22 = vmul.f32 %v1319_v45, %v1319_v45  ;;  %v854_v20 = vadd.f32 %v792_v12, %v790_v26 }
 0x155   : > { %v799_v45 = vmul.f32 %v1343_v51, %v1343_v51  ;;  %v800_v12 = vmul.f32 %v1351_v53, %v1351_v53  ;;  %v803_v53 = vmul.f32 %v1375_v59, %v1375_v59 }
 0x156   : > { %v701_v10 = vadd.f32 %v700_v18, %v1447_v13  ;;  %v738_v14 = vadd.f32 %v737_v16, %v1455_v15  ;;  %v891_v16 = vadd.f32 %v793_v32, %v791_v30  ;;  %v802_v32 = vmul.f32 %v1367_v57, %v1367_v57 }
 0x157   : > { %v805_v57 = vmul.f32 %v1391_v63, %v1391_v63 }
 0x158   : > { %v702_v28 = vadd.f32 %v701_v10, %v1463_v17  ;;  %v739_v33 = vadd.f32 %v738_v14, %v1471_v19  ;;  %v855_v10 = vadd.f32 %v854_v20, %v794_v24  ;;  %v892_v26 = vadd.f32 %v891_v16, %v795_v37 }
 0x159   : > { %v806_v16 = vmul.f32 %v1399_v1, %v1399_v1  ;;  %v809_v1 = vmul.f32 %v1423_v7, %v1423_v7 }
 0x15a   : > { %v703_v18 = vadd.f32 %v702_v28, %v1479_v21  ;;  %v740_v35 = vadd.f32 %v739_v33, %v1487_v23  ;;  %v856_v28 = vadd.f32 %v855_v10, %v796_v22  ;;  %v893_v30 = vadd.f32 %v892_v26, %v797_v39 }
 0x15b   : > { %v804_v22 = vmul.f32 %v1383_v61, %v1383_v61  ;;  %v807_v61 = vmul.f32 %v1407_v3, %v1407_v3 }
 0x15c   : > { %v704_v14 = vadd.f32 %v703_v18, %v1495_v25  ;;  %v741_v43 = vadd.f32 %v740_v35, %v1503_v27  ;;  %v857_v24 = vadd.f32 %v856_v28, %v798_v41  ;;  %v894_v37 = vadd.f32 %v893_v30, %v799_v45 }
 0x15d   : > { %v810_v28 = vmul.f32 %v1431_v9, %v1431_v9  ;;  %v812_v30 = vmul.f32 %v1447_v13, %v1447_v13  ;;  %v813_v9 = vmul.f32 %v1455_v15, %v1455_v15  ;;  %v815_v13 = vmul.f32 %v1471_v19, %v1471_v19 }
 0x15e   : > { %v705_v33 = vadd.f32 %v704_v14, %v1511_v29  ;;  %v742_v47 = vadd.f32 %v741_v43, %v1519_v31  ;;  %v858_v18 = vadd.f32 %v857_v24, %v800_v12  ;;  %v895_v39 = vadd.f32 %v894_v37, %v801_v49 }
 0x15f   : > { %v808_v43 = vmul.f32 %v1415_v5, %v1415_v5  ;;  %v811_v5 = vmul.f32 %v1439_v11, %v1439_v11 }
 0x160   : > { %v706_v20 = vadd.f32 %v705_v33, %v1273_v34  ;;  %v743_v51 = vadd.f32 %v742_v47, %v1281_v36  ;;  %v859_v41 = vadd.f32 %v858_v18, %v802_v32  ;;  %v896_v14 = vadd.f32 %v895_v39, %v803_v53 }
 0x161   : > { %v816_v18 = vmul.f32 %v1479_v21, %v1479_v21  ;;  %v818_v39 = vmul.f32 %v1495_v25, %v1495_v25  ;;  %v819_v21 = vmul.f32 %v1503_v27, %v1503_v27  ;;  %v821_v25 = vmul.f32 %v1519_v31, %v1519_v31  ;;  %v1792_v27 = vld [vmem:[#allocation3_spill] sm:$0xff]  ;;  %v1794_v31 = vld [vmem:[#allocation5_spill] sm:$0xff] }
 0x162   : > { %v707_v35 = vadd.f32 %v706_v20, %v1289_v38  ;;  %v744_v55 = vadd.f32 %v743_v51, %v1297_v40  ;;  %v860_v45 = vadd.f32 %v859_v41, %v804_v22  ;;  %v897_v12 = vadd.f32 %v896_v14, %v805_v57 }
 0x163   : > { %v814_v51 = vmul.f32 %v1463_v17, %v1463_v17  ;;  %v817_v17 = vmul.f32 %v1487_v23, %v1487_v23 }
 0x164   : > { %v708_v10 = vadd.f32 %v707_v35, %v1305_v42  ;;  %v745_v59 = vadd.f32 %v744_v55, %v1313_v44  ;;  %v861_v33 = vadd.f32 %v860_v45, %v806_v16  ;;  %v898_v49 = vadd.f32 %v897_v12, %v807_v61 }
 0x165   : > { %v822_v45 = vmul.f32 %v1273_v34, %v1273_v34  ;;  %v825_v34 = vmul.f32 %v1297_v40, %v1297_v40  ;;  %v1798_v40 = vld [vmem:[#allocation9_spill] sm:$0xff] }
 0x166   : > { %v709_v26 = vadd.f32 %v708_v10, %v1321_v46  ;;  %v746_v63 = vadd.f32 %v745_v59, %v1329_v48  ;;  %v862_v32 = vadd.f32 %v861_v33, %v808_v43  ;;  %v899_v20 = vadd.f32 %v898_v49, %v809_v1 }
 0x167   : > { %v820_v59 = vmul.f32 %v1511_v29, %v1511_v29  ;;  %v823_v29 = vmul.f32 %v1281_v36, %v1281_v36  ;;  %v824_v33 = vmul.f32 %v1289_v38, %v1289_v38  ;;  %v1796_v36 = vld [vmem:[#allocation7_spill] sm:$0xff]  ;;  %v827_v38 = vmul.f32 %v1313_v44, %v1313_v44 }
 0x168   : > { %v710_v47 = vadd.f32 %v709_v26, %v1337_v50  ;;  %v747_v3 = vadd.f32 %v746_v63, %v1345_v52  ;;  %v863_v53 = vadd.f32 %v862_v32, %v810_v28  ;;  %v900_v22 = vadd.f32 %v899_v20, %v811_v5  ;;  %v1791_v63 = vld [vmem:[#allocation2_spill] sm:$0xff]  ;;  %v1800_v44 = vld [vmem:[#allocation11_spill] sm:$0xff] }
 0x169   : > { %v826_v32 = vmul.f32 %v1305_v42, %v1305_v42  ;;  %v829_v42 = vmul.f32 %v1329_v48, %v1329_v48  ;;  %v1802_v48 = vld [vmem:[#allocation13_spill] sm:$0xff] }
 0x16a   : > { %v711_v24 = vadd.f32 %v710_v47, %v1353_v54  ;;  %v748_v7 = vadd.f32 %v747_v3, %v1361_v56  ;;  %v864_v35 = vadd.f32 %v863_v53, %v812_v30  ;;  %v901_v57 = vadd.f32 %v900_v22, %v813_v9  ;;  %v1793_v3 = vld [vmem:[#allocation4_spill] sm:$0xff] }
 0x16b   : > { %v828_v53 = vmul.f32 %v1321_v46, %v1321_v46  ;;  %v831_v46 = vmul.f32 %v1345_v52, %v1345_v52  ;;  %v835_v52 = vmul.f32 %v1377_v60, %v1377_v60 }
 0x16c   : > { %v712_v37 = vadd.f32 %v711_v24, %v1369_v58  ;;  %v749_v11 = vadd.f32 %v748_v7, %v1377_v60  ;;  %v865_v16 = vadd.f32 %v864_v35, %v814_v51  ;;  %v902_v10 = vadd.f32 %v901_v57, %v815_v13  ;;  %v1795_v7 = vld [vmem:[#allocation6_spill] sm:$0xff] }
 0x16d   : > { %v830_v35 = vmul.f32 %v1337_v50, %v1337_v50  ;;  %v833_v50 = vmul.f32 %v1361_v56, %v1361_v56 }
 0x16e   : > { %v713_v55 = vadd.f32 %v712_v37, %v1385_v62  ;;  %v750_v15 = vadd.f32 %v749_v11, %v1393_v0  ;;  %v866_v61 = vadd.f32 %v865_v16, %v816_v18  ;;  %v903_v43 = vadd.f32 %v902_v10, %v817_v17  ;;  %v1797_v11 = vld [vmem:[#allocation8_spill] sm:$0xff] }
 0x16f   : > { %v832_v16 = vmul.f32 %v1353_v54, %v1353_v54  ;;  %v1141_v54 = vmov 1966171168  }
 0x170   : > { %v714_v41 = vadd.f32 %v713_v55, %v1401_v2  ;;  %v751_v19 = vadd.f32 %v750_v15, %v1409_v4  ;;  %v867_v26 = vadd.f32 %v866_v61, %v818_v39  ;;  %v904_v28 = vadd.f32 %v903_v43, %v819_v21  ;;  %v1799_v15 = vld [vmem:[#allocation10_spill] sm:$0xff] }
 0x171   : > { %v834_v61 = vmul.f32 %v1369_v58, %v1369_v58 }
 0x172   : > { %v715_v14 = vadd.f32 %v714_v41, %v1417_v6  ;;  %v752_v23 = vadd.f32 %v751_v19, %v1425_v8  ;;  %v868_v47 = vadd.f32 %v867_v26, %v820_v59  ;;  %v905_v30 = vadd.f32 %v904_v28, %v821_v25  ;;  %v1801_v19 = vld [vmem:[#allocation12_spill] sm:$0xff] }
 0x173   : > { %v771_v26 = vlaneseq  ;;  %v837_v28 = vmul.f32 %v1393_v0, %v1393_v0  ;;  %v841_v0 = vmul.f32 %v1425_v8, %v1425_v8  ;;  %v845_v8 = vmul.f32 %v1794_v31, %v1794_v31 }
 0x174   : > { %v716_v1 = vadd.f32 %v715_v14, %v1791_v63  ;;  %v753_v12 = vadd.f32 %v752_v23, %v1792_v27  ;;  %v869_v24 = vadd.f32 %v868_v47, %v822_v45  ;;  %v906_v51 = vadd.f32 %v905_v30, %v823_v29 }
 0x175   : > { %v769_v45 = vunpack.c.l.s4 %v1141_v54  ;;  %vm1726_vm1 = vcmp.lt.s32.totalorder %v771_v26, 256 }
 0x176   : > { %v717_v5 = vadd.f32 %v716_v1, %v1793_v3  ;;  %v754_v49 = vadd.f32 %v753_v12, %v1794_v31  ;;  %v870_v37 = vadd.f32 %v869_v24, %v824_v33  ;;  %v907_v18 = vadd.f32 %v906_v51, %v825_v34  ;;  %v690_v31 = vld [vmem:[%s1753_s3] sm:$0x3] }
 0x177   : > { %v836_v1 = vmul.f32 %v1385_v62, %v1385_v62  ;;  %v838_v33 = vmul.f32 %v1401_v2, %v1401_v2  ;;  %v770_v30 = vunpack.c.0.s8 %v769_v45  ;;  %v840_v62 = vmul.f32 %v1417_v6, %v1417_v6 }
 0x178   : > { %v718_v9 = vadd.f32 %v717_v5, %v1795_v7  ;;  %v755_v20 = vadd.f32 %v754_v49, %v1796_v36  ;;  %v871_v55 = vadd.f32 %v870_v37, %v826_v32  ;;  %v908_v39 = vadd.f32 %v907_v18, %v827_v38 }
 0x179   : > { %v839_v49 = vmul.f32 %v1409_v4, %v1409_v4  ;;  %v772_v32 = vshrl.u32 %v771_v26, 7  ;;  %v842_v2 = vmul.f32 %v1791_v63, %v1791_v63  ;;  %v843_v4 = vmul.f32 %v1792_v27, %v1792_v27 }
 0x17a   : > { %v719_v13 = vadd.f32 %v718_v9, %v1797_v11  ;;  %v756_v22 = vadd.f32 %v755_v20, %v1798_v40  ;;  %v872_v41 = vadd.f32 %v871_v55, %v828_v53  ;;  %v909_v59 = vadd.f32 %v908_v39, %v829_v42 }
 0x17b   : > { %v844_v6 = vmul.f32 %v1793_v3, %v1793_v3  ;;  %v846_v63 = vmul.f32 %v1795_v7, %v1795_v7  ;;  %v847_v27 = vmul.f32 %v1796_v36, %v1796_v36  ;;  %v848_v39 = vmul.f32 %v1797_v11, %v1797_v11 }
 0x17c   : > { %v720_v17 = vadd.f32 %v719_v13, %v1799_v15  ;;  %v757_v57 = vadd.f32 %v756_v22, %v1800_v44  ;;  %v873_v14 = vadd.f32 %v872_v41, %v830_v35  ;;  %v910_v43 = vadd.f32 %v909_v59, %v831_v46 }
 0x17d   : > { %v773_v22 = vsub.s32 %v770_v30, %v772_v32  ;;  %v849_v41 = vmul.f32 %v1798_v40, %v1798_v40  ;;  %v850_v7 = vmul.f32 %v1799_v15, %v1799_v15  ;;  %v851_v36 = vmul.f32 %v1800_v44, %v1800_v44 }
 0x17e   : > { %v721_v21 = vadd.f32 %v720_v17, %v1801_v19  ;;  %v758_v10 = vadd.f32 %v757_v57, %v1802_v48  ;;  %v874_v12 = vadd.f32 %v873_v14, %v832_v16  ;;  %v911_v58 = vadd.f32 %v910_v43, %v833_v50 }
 0x17f   : > { %v852_v40 = vmul.f32 %v1801_v19, %v1801_v19 }
 0x180   : > { %v722_v23 = vrot.slane %v721_v21, 4  ;;  %v759_v25 = vrot.slane %v758_v10, 4  ;;  %v875_v47 = vadd.f32 %v874_v12, %v834_v61  ;;  %v912_v34 = vadd.f32 %v911_v58, %v835_v52 }
 0x182   : > { %v723_v29 = vadd.f32 %v722_v23, %v721_v21  ;;  %v760_v56 = vadd.f32 %v759_v25, %v758_v10  ;;  %v876_v24 = vadd.f32 %v875_v47, %v836_v1  ;;  %v913_v38 = vadd.f32 %v912_v34, %v837_v28 }
 0x183   : > { %v853_v23 = vmul.f32 %v1802_v48, %v1802_v48 }
 0x184   : > { %v724_v5 = vrot.slane %v723_v29, 2  ;;  %v761_v60 = vrot.slane %v760_v56, 2  ;;  %v877_v51 = vadd.f32 %v876_v24, %v838_v33  ;;  %v914_v13 = vadd.f32 %v913_v38, %v839_v49 }
 0x186   : > { %v725_v9 = vadd.f32 %v724_v5, %v723_v29  ;;  %v762_v20 = vadd.f32 %v761_v60, %v760_v56  ;;  %v878_v42 = vadd.f32 %v877_v51, %v840_v62  ;;  %v915_v55 = vadd.f32 %v914_v13, %v841_v0  ;;  %v789_v60 = vld [vmem:[%s1754_s4] sm:$0x3] }
 0x188   : > { %v726_v53 = vrot.slane %v725_v9, 1  ;;  %v763_v37 = vrot.slane %v762_v20, 1  ;;  %v879_v17 = vadd.f32 %v878_v42, %v842_v2  ;;  %v916_v46 = vadd.f32 %v915_v55, %v843_v4 }
 0x18a   : > { %v727_v18 = vadd.f32 %v726_v53, %v725_v9  ;;  %v764_v35 = vadd.f32 %v763_v37, %v762_v20  ;;  %v880_v3 = vadd.f32 %v879_v17, %v844_v6  ;;  %v917_v21 = vadd.f32 %v916_v46, %v845_v8 }
 0x18c   : > { %v767_v57 = vcombine.low %v727_v18, %v764_v35  ;;  %v881_v10 = vadd.f32 %v880_v3, %v846_v63  ;;  %v918_v59 = vadd.f32 %v917_v21, %v847_v27 }
 0x18e   : > { %v774_v16 = vrot.slane %v767_v57, %v773_v22  ;;  %v882_v61 = vadd.f32 %v881_v10, %v848_v39  ;;  %v919_v25 = vadd.f32 %v918_v59, %v849_v41 }
 0x190   : > { %v781_v50 = vrot.slane %v774_v16, %v773_v22  ;;  %v883_v15 = vadd.f32 %v882_v61, %v850_v7  ;;  %v920_v44 = vadd.f32 %v919_v25, %v851_v36 }
 0x192   : > { %v783_v14 = vadd.f32 %v781_v50, %v690_v31  ;;  %v884_v52 = vadd.f32 %v883_v15, %v852_v40  ;;  %v921_v43 = vadd.f32 %v920_v44, %v853_v23 }
 0x194   : > { %788 = vst.msk [vmem:[%s1753_s3] sm:$0x3] %vm1726_vm1, %v783_v14  ;;  %v885_v54 = vrot.slane %v884_v52, 4  ;;  %v922_v45 = vrot.slane %v921_v43, 4 }
 0x196   : > { %v886_v26 = vadd.f32 %v885_v54, %v884_v52  ;;  %v923_v19 = vadd.f32 %v922_v45, %v921_v43 }
 0x198   : > { %v887_v1 = vrot.slane %v886_v26, 2  ;;  %v924_v12 = vrot.slane %v923_v19, 2 }
 0x19a   : > { %v888_v29 = vadd.f32 %v887_v1, %v886_v26  ;;  %v925_v56 = vadd.f32 %v924_v12, %v923_v19 }
 0x19c   : > { %v889_v48 = vrot.slane %v888_v29, 1  ;;  %v926_v28 = vrot.slane %v925_v56, 1 }
 0x19e   : > { %v890_v58 = vadd.f32 %v889_v48, %v888_v29  ;;  %v927_v33 = vadd.f32 %v926_v28, %v925_v56 }
 0x1a0   : > { %v930_v47 = vcombine.low %v890_v58, %v927_v33 }
 0x1a2   : > { %v937_v5 = vrot.slane %v930_v47, %v773_v22 }
 0x1a4   : > { %v944_v49 = vrot.slane %v937_v5, %v773_v22 }
 0x1a6   : > { %v946_v34 = vadd.f32 %v944_v49, %v789_v60 }
 0x1a8   : > { %947 = vst.msk [vmem:[%s1754_s4] sm:$0x3] %vm1726_vm1, %v946_v34 }
 0x1a9 PF: > { %s15_s15 = sadd.s32 1, %s1137_s15  }
 0x1aa   : > { %p12_p5 = scmp.ge.s32.totalorder %s15_s15, 4  }
 0x1ac   :  { %14 = sbr.rel (!%p12_p5) target bundleno = 1 (0x1), region = 78 }

// kernel: resize_forward.35
= control target key start
LH: loop header
LB: loop body
LE: loop exit
PB: predicated region body
PF: predicated region fallthrough
CT: control target
= control target key end

     0   :  { %s632_s12 = smov 0   ;;  %s926_s0 = inlined_call_operand.vmem [shape: f32[512,256], index: 0, kind: input, shape index: {}]   ;;  %s927_s1 = inlined_call_operand.vmem [shape: f32[1,256], index: 1, kind: input, shape index: {}]   ;;  %s928_s2 = inlined_call_operand.vmem [shape: f32[1,256], index: 2, kind: input, shape index: {}]   ;;  %s929_s3 = inlined_call_operand.vmem [shape: f32[512,256], index: 3, kind: output, shape index: {}]  }
   0x1 LB: > { %s581_s13 = sadd.s32 4294967295, %s610_s12   ;;  %p585_p0 = scmp.ge.s32.totalorder %s610_s12, 1  ;;  %s610_s12 = sphi %s632_s12, %s13_s12  }
   0x2   : > { %p139_p1 = scmp.lt.s32.totalorder %s610_s12, 3 }
   0x4   : > { %p140_p2 = pnand %p585_p0, %p139_p1 }
   0x5   : > { %s586_s14 = sshll.u32 (!%p140_p2), %s581_s13, 5  ;;  %v245_v0 = vlaneseq (!%p140_p2)  ;;  %v243_v2 = vld [vmem:[%s927_s1] sm:$0x3] (!%p140_p2) }
   0x6   : > { %143 = sbr.rel (%p140_p2) target bundleno = 70 (0x46), region = 32  ;;  %p166_p3 = scmp.lt.s32.totalorder (!%p140_p2), %s586_s14, 63  ;;  %v319_v3 = vld [vmem:[%s928_s2] sm:$0x3] (!%p140_p2) }
   0x7   : > { %v246_v1 = vshrl.u32 (!%p140_p2), %v245_v0, 7 }
   0x9   : > { %v247_v4 = vsub.s32 (!%p140_p2), 0, %v246_v1  ;;  %v251_v5 = vsub.s32 (!%p140_p2), 1, %v246_v1 }
   0xb   : > { %v654_v6 = vrot.slane (!%p140_p2), %v243_v2, %v247_v4  ;;  %v656_v7 = vrot.slane (!%p140_p2), %v319_v3, %v247_v4  ;;  %v658_v8 = vrot.slane (!%p140_p2), %v243_v2, %v251_v5  ;;  %v660_v9 = vrot.slane (!%p140_p2), %v319_v3, %v251_v5 }
   0xd   : > { %s931_s14 = smov (!%p166_p3, %s586_s14), 63 }
   0xe   : > { %s594_s19 = sshll.u32 %s931_s14, 4 }
   0xf   : > { %s652_s22 = scalar_lea.vmem %s926_s0, %s594_s19  ;;  %s683_s25 = scalar_lea.vmem %s929_s3, %s594_s19 }
  0x10   : > { %v179_v10 = vld [vmem:[%s652_s22] sm:$0xff]  ;;  %v180_v11 = vld [vmem:[%s652_s22 + $0x8] sm:$0xff]  ;;  %v181_v12 = vld [vmem:[%s652_s22 + $0x10] sm:$0xff] }
  0x11   : > { %v255_v13 = vmul.f32 %v654_v6, %v179_v10  ;;  %v256_v14 = vmul.f32 %v658_v8, %v180_v11  ;;  %v257_v15 = vmul.f32 %v654_v6, %v181_v12  ;;  %v182_v16 = vld [vmem:[%s652_s22 + $0x18] sm:$0xff]  ;;  %v183_v17 = vld [vmem:[%s652_s22 + $0x20] sm:$0xff]  ;;  %v184_v18 = vld [vmem:[%s652_s22 + $0x28] sm:$0xff] }
  0x12   : > { %v258_v19 = vmul.f32 %v658_v8, %v182_v16  ;;  %v259_v20 = vmul.f32 %v654_v6, %v183_v17  ;;  %v260_v21 = vmul.f32 %v658_v8, %v184_v18  ;;  %v185_v22 = vld [vmem:[%s652_s22 + $0x30] sm:$0xff]  ;;  %v186_v23 = vld [vmem:[%s652_s22 + $0x38] sm:$0xff]  ;;  %v187_v32 = vld [vmem:[%s652_s22 + $0x40] sm:$0xff] }
  0x13   : > { %v331_v24 = vadd.f32 %v656_v7, %v255_v13  ;;  %v332_v25 = vadd.f32 %v660_v9, %v256_v14  ;;  %v333_v26 = vadd.f32 %v656_v7, %v257_v15  ;;  %v261_v27 = vmul.f32 %v654_v6, %v185_v22  ;;  %v188_v33 = vld [vmem:[%s652_s22 + $0x48] sm:$0xff]  ;;  %v189_v34 = vld [vmem:[%s652_s22 + $0x50] sm:$0xff]  ;;  %v190_v39 = vld [vmem:[%s652_s22 + $0x58] sm:$0xff] }
  0x14   : > { %v334_v28 = vadd.f32 %v660_v9, %v258_v19  ;;  %v335_v29 = vadd.f32 %v656_v7, %v259_v20  ;;  %v336_v30 = vadd.f32 %v660_v9, %v260_v21  ;;  %v262_v31 = vmul.f32 %v658_v8, %v186_v23  ;;  %v191_v40 = vld [vmem:[%s652_s22 + $0x60] sm:$0xff]  ;;  %v192_v41 = vld [vmem:[%s652_s22 + $0x68] sm:$0xff]  ;;  %v193_v46 = vld [vmem:[%s652_s22 + $0x70] sm:$0xff] }
  0x15   : > { %v395_v35 = vmax.f32 %v331_v24, 0.0  ;;  %v396_v36 = vmax.f32 %v332_v25, 0.0  ;;  %v397_v37 = vmax.f32 %v333_v26, 0.0  ;;  %v337_v38 = vadd.f32 %v656_v7, %v261_v27  ;;  %v194_v51 = vld [vmem:[%s652_s22 + $0x78] sm:$0xff]  ;;  %v195_v0 = vld [vmem:[%s652_s22 + $0x80] sm:$0xff]  ;;  %v196_v1 = vld [vmem:[%s652_s22 + $0x88] sm:$0xff] }
  0x16   : > { %v398_v42 = vmax.f32 %v334_v28, 0.0  ;;  %v399_v43 = vmax.f32 %v335_v29, 0.0  ;;  %v400_v44 = vmax.f32 %v336_v30, 0.0  ;;  %v338_v45 = vadd.f32 %v660_v9, %v262_v31  ;;  %v197_v2 = vld [vmem:[%s652_s22 + $0x90] sm:$0xff]  ;;  %v198_v11 = vld [vmem:[%s652_s22 + $0x98] sm:$0xff]  ;;  %v199_v12 = vld [vmem:[%s652_s22 + $0xa0] sm:$0xff] }
  0x17   : > { %459 = vst [vmem:[%s683_s25] sm:$0xff] %v395_v35  ;;  %460 = vst [vmem:[%s683_s25 + $0x8] sm:$0xff] %v396_v36  ;;  %v401_v47 = vmax.f32 %v337_v38, 0.0  ;;  %v263_v48 = vmul.f32 %v654_v6, %v187_v32  ;;  %v264_v49 = vmul.f32 %v658_v8, %v188_v33  ;;  %v265_v50 = vmul.f32 %v654_v6, %v189_v34  ;;  %v200_v13 = vld [vmem:[%s652_s22 + $0xa8] sm:$0xff]  ;;  %v201_v18 = vld [vmem:[%s652_s22 + $0xb0] sm:$0xff] }
  0x18   : > { %461 = vst [vmem:[%s683_s25 + $0x10] sm:$0xff] %v397_v37  ;;  %462 = vst [vmem:[%s683_s25 + $0x18] sm:$0xff] %v398_v42  ;;  %v402_v52 = vmax.f32 %v338_v45, 0.0  ;;  %v266_v53 = vmul.f32 %v658_v8, %v190_v39  ;;  %v267_v54 = vmul.f32 %v654_v6, %v191_v40  ;;  %v268_v55 = vmul.f32 %v658_v8, %v192_v41  ;;  %v202_v23 = vld [vmem:[%s652_s22 + $0xb8] sm:$0xff]  ;;  %v203_v36 = vld [vmem:[%s652_s22 + $0xc0] sm:$0xff] }
  0x19   : > { %463 = vst [vmem:[%s683_s25 + $0x20] sm:$0xff] %v399_v43  ;;  %464 = vst [vmem:[%s683_s25 + $0x28] sm:$0xff] %v400_v44  ;;  %v339_v56 = vadd.f32 %v656_v7, %v263_v48  ;;  %v340_v57 = vadd.f32 %v660_v9, %v264_v49  ;;  %v341_v58 = vadd.f32 %v656_v7, %v265_v50  ;;  %v204_v37 = vld [vmem:[%s652_s22 + $0xc8] sm:$0xff]  ;;  %v205_v38 = vld [vmem:[%s652_s22 + $0xd0] sm:$0xff] }
  0x1a   : > { %465 = vst [vmem:[%s683_s25 + $0x30] sm:$0xff] %v401_v47  ;;  %v269_v59 = vmul.f32 %v654_v6, %v193_v46  ;;  %466 = vst [vmem:[%s683_s25 + $0x38] sm:$0xff] %v402_v52  ;;  %v342_v60 = vadd.f32 %v660_v9, %v266_v53  ;;  %v343_v61 = vadd.f32 %v656_v7, %v267_v54  ;;  %v206_v43 = vld [vmem:[%s652_s22 + $0xd8] sm:$0xff]  ;;  %v207_v44 = vld [vmem:[%s652_s22 + $0xe0] sm:$0xff] }
  0x1b   : > { %v344_v62 = vadd.f32 %v660_v9, %v268_v55  ;;  %v270_v63 = vmul.f32 %v658_v8, %v194_v51  ;;  %v403_v3 = vmax.f32 %v339_v56, 0.0  ;;  %v404_v4 = vmax.f32 %v340_v57, 0.0  ;;  %v208_v45 = vld [vmem:[%s652_s22 + $0xe8] sm:$0xff]  ;;  %v209_v50 = vld [vmem:[%s652_s22 + $0xf0] sm:$0xff]  ;;  %v210_v55 = vld [vmem:[%s652_s22 + $0xf8] sm:$0xff] }
  0x1c   : > { %v405_v5 = vmax.f32 %v341_v58, 0.0  ;;  %v345_v10 = vadd.f32 %v656_v7, %v269_v59  ;;  %v406_v14 = vmax.f32 %v342_v60, 0.0  ;;  %v407_v15 = vmax.f32 %v343_v61, 0.0 }
  0x1d   : > { %v408_v16 = vmax.f32 %v344_v62, 0.0  ;;  %v346_v17 = vadd.f32 %v660_v9, %v270_v63  ;;  %467 = vst [vmem:[%s683_s25 + $0x40] sm:$0xff] %v403_v3  ;;  %468 = vst [vmem:[%s683_s25 + $0x48] sm:$0xff] %v404_v4  ;;  %v271_v20 = vmul.f32 %v654_v6, %v195_v0  ;;  %v272_v21 = vmul.f32 %v658_v8, %v196_v1  ;;  %v211_v4 = vld [vmem:[%s652_s22 + $0x100] sm:$0xff] }
  0x1e   : > { %469 = vst [vmem:[%s683_s25 + $0x50] sm:$0xff] %v405_v5  ;;  %v409_v19 = vmax.f32 %v345_v10, 0.0  ;;  %v273_v22 = vmul.f32 %v654_v6, %v197_v2  ;;  %470 = vst [vmem:[%s683_s25 + $0x58] sm:$0xff] %v406_v14  ;;  %v274_v25 = vmul.f32 %v658_v8, %v198_v11  ;;  %v275_v26 = vmul.f32 %v654_v6, %v199_v12  ;;  %v212_v5 = vld [vmem:[%s652_s22 + $0x108] sm:$0xff]  ;;  %v213_v10 = vld [vmem:[%s652_s22 + $0x110] sm:$0xff] }
  0x1f   : > { %471 = vst [vmem:[%s683_s25 + $0x60] sm:$0xff] %v407_v15  ;;  %472 = vst [vmem:[%s683_s25 + $0x68] sm:$0xff] %v408_v16  ;;  %v410_v24 = vmax.f32 %v346_v17, 0.0  ;;  %v276_v27 = vmul.f32 %v658_v8, %v200_v13  ;;  %v347_v28 = vadd.f32 %v656_v7, %v271_v20  ;;  %v348_v29 = vadd.f32 %v660_v9, %v272_v21  ;;  %v214_v15 = vld [vmem:[%s652_s22 + $0x118] sm:$0xff]  ;;  %v215_v16 = vld [vmem:[%s652_s22 + $0x120] sm:$0xff] }
  0x20   : > { %473 = vst [vmem:[%s683_s25 + $0x70] sm:$0xff] %v409_v19  ;;  %v349_v30 = vadd.f32 %v656_v7, %v273_v22  ;;  %v277_v31 = vmul.f32 %v654_v6, %v201_v18  ;;  %v350_v32 = vadd.f32 %v660_v9, %v274_v25  ;;  %v351_v33 = vadd.f32 %v656_v7, %v275_v26  ;;  %v216_v17 = vld [vmem:[%s652_s22 + $0x128] sm:$0xff]  ;;  %v217_v22 = vld [vmem:[%s652_s22 + $0x130] sm:$0xff] }
  0x21   : > { %474 = vst [vmem:[%s683_s25 + $0x78] sm:$0xff] %v410_v24  ;;  %v352_v34 = vadd.f32 %v660_v9, %v276_v27  ;;  %v278_v35 = vmul.f32 %v658_v8, %v202_v23  ;;  %v411_v39 = vmax.f32 %v347_v28, 0.0  ;;  %v412_v40 = vmax.f32 %v348_v29, 0.0  ;;  %v218_v27 = vld [vmem:[%s652_s22 + $0x138] sm:$0xff] }
  0x22   : > { %v413_v41 = vmax.f32 %v349_v30, 0.0  ;;  %v353_v42 = vadd.f32 %v656_v7, %v277_v31  ;;  %v414_v46 = vmax.f32 %v350_v32, 0.0  ;;  %v415_v47 = vmax.f32 %v351_v33, 0.0 }
  0x23   : > { %v416_v48 = vmax.f32 %v352_v34, 0.0  ;;  %v354_v49 = vadd.f32 %v660_v9, %v278_v35  ;;  %475 = vst [vmem:[%s683_s25 + $0x80] sm:$0xff] %v411_v39  ;;  %476 = vst [vmem:[%s683_s25 + $0x88] sm:$0xff] %v412_v40  ;;  %v279_v52 = vmul.f32 %v654_v6, %v203_v36  ;;  %v280_v53 = vmul.f32 %v658_v8, %v204_v37  ;;  %v219_v40 = vld [vmem:[%s652_s22 + $0x140] sm:$0xff] }
  0x24   : > { %477 = vst [vmem:[%s683_s25 + $0x90] sm:$0xff] %v413_v41  ;;  %v417_v51 = vmax.f32 %v353_v42, 0.0  ;;  %v281_v54 = vmul.f32 %v654_v6, %v205_v38  ;;  %478 = vst [vmem:[%s683_s25 + $0x98] sm:$0xff] %v414_v46  ;;  %v282_v57 = vmul.f32 %v658_v8, %v206_v43  ;;  %v283_v58 = vmul.f32 %v654_v6, %v207_v44  ;;  %v220_v41 = vld [vmem:[%s652_s22 + $0x148] sm:$0xff]  ;;  %v221_v42 = vld [vmem:[%s652_s22 + $0x150] sm:$0xff] }
  0x25   : > { %479 = vst [vmem:[%s683_s25 + $0xa0] sm:$0xff] %v415_v47  ;;  %480 = vst [vmem:[%s683_s25 + $0xa8] sm:$0xff] %v416_v48  ;;  %v418_v56 = vmax.f32 %v354_v49, 0.0  ;;  %v284_v59 = vmul.f32 %v658_v8, %v208_v45  ;;  %v355_v60 = vadd.f32 %v656_v7, %v279_v52  ;;  %v356_v61 = vadd.f32 %v660_v9, %v280_v53  ;;  %v222_v47 = vld [vmem:[%s652_s22 + $0x158] sm:$0xff]  ;;  %v223_v48 = vld [vmem:[%s652_s22 + $0x160] sm:$0xff] }
  0x26   : > { %481 = vst [vmem:[%s683_s25 + $0xb0] sm:$0xff] %v417_v51  ;;  %v357_v62 = vadd.f32 %v656_v7, %v281_v54  ;;  %v285_v63 = vmul.f32 %v654_v6, %v209_v50  ;;  %v358_v0 = vadd.f32 %v660_v9, %v282_v57  ;;  %v359_v1 = vadd.f32 %v656_v7, %v283_v58  ;;  %v224_v49 = vld [vmem:[%s652_s22 + $0x168] sm:$0xff]  ;;  %v225_v54 = vld [vmem:[%s652_s22 + $0x170] sm:$0xff] }
  0x27   : > { %482 = vst [vmem:[%s683_s25 + $0xb8] sm:$0xff] %v418_v56  ;;  %v360_v2 = vadd.f32 %v660_v9, %v284_v59  ;;  %v286_v3 = vmul.f32 %v658_v8, %v210_v55  ;;  %v419_v11 = vmax.f32 %v355_v60, 0.0  ;;  %v420_v12 = vmax.f32 %v356_v61, 0.0  ;;  %v226_v59 = vld [vmem:[%s652_s22 + $0x178] sm:$0xff] }
  0x28   : > { %v421_v13 = vmax.f32 %v357_v62, 0.0  ;;  %v361_v14 = vadd.f32 %v656_v7, %v285_v63  ;;  %v422_v18 = vmax.f32 %v358_v0, 0.0  ;;  %v423_v19 = vmax.f32 %v359_v1, 0.0 }
  0x29   : > { %v424_v20 = vmax.f32 %v360_v2, 0.0  ;;  %v362_v21 = vadd.f32 %v660_v9, %v286_v3  ;;  %483 = vst [vmem:[%s683_s25 + $0xc0] sm:$0xff] %v419_v11  ;;  %484 = vst [vmem:[%s683_s25 + $0xc8] sm:$0xff] %v420_v12  ;;  %v287_v24 = vmul.f32 %v654_v6, %v211_v4  ;;  %v288_v25 = vmul.f32 %v658_v8, %v212_v5  ;;  %v227_v12 = vld [vmem:[%s652_s22 + $0x180] sm:$0xff] }
  0x2a   : > { %485 = vst [vmem:[%s683_s25 + $0xd0] sm:$0xff] %v421_v13  ;;  %v425_v23 = vmax.f32 %v361_v14, 0.0  ;;  %v289_v26 = vmul.f32 %v654_v6, %v213_v10  ;;  %486 = vst [vmem:[%s683_s25 + $0xd8] sm:$0xff] %v422_v18  ;;  %v290_v29 = vmul.f32 %v658_v8, %v214_v15  ;;  %v291_v30 = vmul.f32 %v654_v6, %v215_v16  ;;  %v228_v13 = vld [vmem:[%s652_s22 + $0x188] sm:$0xff]  ;;  %v229_v14 = vld [vmem:[%s652_s22 + $0x190] sm:$0xff] }
  0x2b   : > { %487 = vst [vmem:[%s683_s25 + $0xe0] sm:$0xff] %v423_v19  ;;  %488 = vst [vmem:[%s683_s25 + $0xe8] sm:$0xff] %v424_v20  ;;  %v426_v28 = vmax.f32 %v362_v21, 0.0  ;;  %v292_v31 = vmul.f32 %v658_v8, %v216_v17  ;;  %v363_v32 = vadd.f32 %v656_v7, %v287_v24  ;;  %v364_v33 = vadd.f32 %v660_v9, %v288_v25  ;;  %v230_v19 = vld [vmem:[%s652_s22 + $0x198] sm:$0xff]  ;;  %v231_v20 = vld [vmem:[%s652_s22 + $0x1a0] sm:$0xff] }
  0x2c   : > { %489 = vst [vmem:[%s683_s25 + $0xf0] sm:$0xff] %v425_v23  ;;  %v365_v34 = vadd.f32 %v656_v7, %v289_v26  ;;  %v293_v35 = vmul.f32 %v654_v6, %v217_v22  ;;  %v366_v36 = vadd.f32 %v660_v9, %v290_v29  ;;  %v367_v37 = vadd.f32 %v656_v7, %v291_v30  ;;  %v232_v21 = vld [vmem:[%s652_s22 + $0x1a8] sm:$0xff]  ;;  %v233_v26 = vld [vmem:[%s652_s22 + $0x1b0] sm:$0xff] }
  0x2d   : > { %490 = vst [vmem:[%s683_s25 + $0xf8] sm:$0xff] %v426_v28  ;;  %v368_v38 = vadd.f32 %v660_v9, %v292_v31  ;;  %v294_v39 = vmul.f32 %v658_v8, %v218_v27  ;;  %v427_v43 = vmax.f32 %v363_v32, 0.0  ;;  %v428_v44 = vmax.f32 %v364_v33, 0.0  ;;  %v234_v31 = vld [vmem:[%s652_s22 + $0x1b8] sm:$0xff] }
  0x2e   : > { %v429_v45 = vmax.f32 %v365_v34, 0.0  ;;  %v369_v46 = vadd.f32 %v656_v7, %v293_v35  ;;  %v430_v50 = vmax.f32 %v366_v36, 0.0  ;;  %v431_v51 = vmax.f32 %v367_v37, 0.0 }
  0x2f   : > { %v432_v52 = vmax.f32 %v368_v38, 0.0  ;;  %v370_v53 = vadd.f32 %v660_v9, %v294_v39  ;;  %491 = vst [vmem:[%s683_s25 + $0x100] sm:$0xff] %v427_v43  ;;  %492 = vst [vmem:[%s683_s25 + $0x108] sm:$0xff] %v428_v44  ;;  %v295_v56 = vmul.f32 %v654_v6, %v219_v40  ;;  %v296_v57 = vmul.f32 %v658_v8, %v220_v41  ;;  %v235_v44 = vld [vmem:[%s652_s22 + $0x1c0] sm:$0xff] }
  0x30   : > { %493 = vst [vmem:[%s683_s25 + $0x110] sm:$0xff] %v429_v45  ;;  %v433_v55 = vmax.f32 %v369_v46, 0.0  ;;  %v297_v58 = vmul.f32 %v654_v6, %v221_v42  ;;  %494 = vst [vmem:[%s683_s25 + $0x118] sm:$0xff] %v430_v50  ;;  %v298_v61 = vmul.f32 %v658_v8, %v222_v47  ;;  %v299_v62 = vmul.f32 %v654_v6, %v223_v48  ;;  %v236_v45 = vld [vmem:[%s652_s22 + $0x1c8] sm:$0xff]  ;;  %v237_v46 = vld [vmem:[%s652_s22 + $0x1d0] sm:$0xff] }
  0x31   : > { %495 = vst [vmem:[%s683_s25 + $0x120] sm:$0xff] %v431_v51  ;;  %496 = vst [vmem:[%s683_s25 + $0x128] sm:$0xff] %v432_v52  ;;  %v434_v60 = vmax.f32 %v370_v53, 0.0  ;;  %v300_v63 = vmul.f32 %v658_v8, %v224_v49  ;;  %v371_v0 = vadd.f32 %v656_v7, %v295_v56  ;;  %v372_v1 = vadd.f32 %v660_v9, %v296_v57  ;;  %v238_v51 = vld [vmem:[%s652_s22 + $0x1d8] sm:$0xff]  ;;  %v239_v52 = vld [vmem:[%s652_s22 + $0x1e0] sm:$0xff] }
  0x32   : > { %497 = vst [vmem:[%s683_s25 + $0x130] sm:$0xff] %v433_v55  ;;  %v373_v2 = vadd.f32 %v656_v7, %v297_v58  ;;  %v301_v3 = vmul.f32 %v654_v6, %v225_v54  ;;  %v374_v4 = vadd.f32 %v660_v9, %v298_v61  ;;  %v375_v5 = vadd.f32 %v656_v7, %v299_v62  ;;  %v240_v53 = vld [vmem:[%s652_s22 + $0x1e8] sm:$0xff]  ;;  %v241_v58 = vld [vmem:[%s652_s22 + $0x1f0] sm:$0xff] }
  0x33   : > { %498 = vst [vmem:[%s683_s25 + $0x138] sm:$0xff] %v434_v60  ;;  %v376_v10 = vadd.f32 %v660_v9, %v300_v63  ;;  %v302_v11 = vmul.f32 %v658_v8, %v226_v59  ;;  %v435_v15 = vmax.f32 %v371_v0, 0.0  ;;  %v436_v16 = vmax.f32 %v372_v1, 0.0  ;;  %v242_v63 = vld [vmem:[%s652_s22 + $0x1f8] sm:$0xff] }
  0x34   : > { %v437_v17 = vmax.f32 %v373_v2, 0.0  ;;  %v377_v18 = vadd.f32 %v656_v7, %v301_v3  ;;  %v438_v22 = vmax.f32 %v374_v4, 0.0  ;;  %v439_v23 = vmax.f32 %v375_v5, 0.0 }
  0x35   : > { %v440_v24 = vmax.f32 %v376_v10, 0.0  ;;  %v378_v25 = vadd.f32 %v660_v9, %v302_v11  ;;  %499 = vst [vmem:[%s683_s25 + $0x140] sm:$0xff] %v435_v15  ;;  %500 = vst [vmem:[%s683_s25 + $0x148] sm:$0xff] %v436_v16  ;;  %v303_v28 = vmul.f32 %v654_v6, %v227_v12  ;;  %v304_v29 = vmul.f32 %v658_v8, %v228_v13 }
  0x36   : > { %501 = vst [vmem:[%s683_s25 + $0x150] sm:$0xff] %v437_v17  ;;  %v441_v27 = vmax.f32 %v377_v18, 0.0  ;;  %v305_v30 = vmul.f32 %v654_v6, %v229_v14  ;;  %502 = vst [vmem:[%s683_s25 + $0x158] sm:$0xff] %v438_v22  ;;  %v306_v33 = vmul.f32 %v658_v8, %v230_v19  ;;  %v307_v34 = vmul.f32 %v654_v6, %v231_v20 }
  0x37   : > { %503 = vst [vmem:[%s683_s25 + $0x160] sm:$0xff] %v439_v23  ;;  %504 = vst [vmem:[%s683_s25 + $0x168] sm:$0xff] %v440_v24  ;;  %v442_v32 = vmax.f32 %v378_v25, 0.0  ;;  %v308_v35 = vmul.f32 %v658_v8, %v232_v21  ;;  %v379_v36 = vadd.f32 %v656_v7, %v303_v28  ;;  %v380_v37 = vadd.f32 %v660_v9, %v304_v29 }
  0x38   : > { %505 = vst [vmem:[%s683_s25 + $0x170] sm:$0xff] %v441_v27  ;;  %v381_v38 = vadd.f32 %v656_v7, %v305_v30  ;;  %v309_v39 = vmul.f32 %v654_v6, %v233_v26  ;;  %v382_v40 = vadd.f32 %v660_v9, %v306_v33  ;;  %v383_v41 = vadd.f32 %v656_v7, %v307_v34 }
  0x39   : > { %506 = vst [vmem:[%s683_s25 + $0x178] sm:$0xff] %v442_v32  ;;  %v384_v42 = vadd.f32 %v660_v9, %v308_v35  ;;  %v310_v43 = vmul.f32 %v658_v8, %v234_v31  ;;  %v443_v47 = vmax.f32 %v379_v36, 0.0  ;;  %v444_v48 = vmax.f32 %v380_v37, 0.0 }
  0x3a   : > { %v445_v49 = vmax.f32 %v381_v38, 0.0  ;;  %v385_v50 = vadd.f32 %v656_v7, %v309_v39  ;;  %v446_v54 = vmax.f32 %v382_v40, 0.0  ;;  %v447_v55 = vmax.f32 %v383_v41, 0.0 }
  0x3b   : > { %v448_v56 = vmax.f32 %v384_v42, 0.0  ;;  %v386_v57 = vadd.f32 %v660_v9, %v310_v43  ;;  %507 = vst [vmem:[%s683_s25 + $0x180] sm:$0xff] %v443_v47  ;;  %508 = vst [vmem:[%s683_s25 + $0x188] sm:$0xff] %v444_v48  ;;  %v311_v60 = vmul.f32 %v654_v6, %v235_v44  ;;  %v312_v61 = vmul.f32 %v658_v8, %v236_v45 }
  0x3c   : > { %509 = vst [vmem:[%s683_s25 + $0x190] sm:$0xff] %v445_v49  ;;  %v449_v59 = vmax.f32 %v385_v50, 0.0  ;;  %v313_v62 = vmul.f32 %v654_v6, %v237_v46  ;;  %510 = vst [vmem:[%s683_s25 + $0x198] sm:$0xff] %v446_v54  ;;  %v314_v1 = vmul.f32 %v658_v8, %v238_v51  ;;  %v315_v2 = vmul.f32 %v654_v6, %v239_v52 }
  0x3d   : > { %511 = vst [vmem:[%s683_s25 + $0x1a0] sm:$0xff] %v447_v55  ;;  %512 = vst [vmem:[%s683_s25 + $0x1a8] sm:$0xff] %v448_v56  ;;  %v450_v0 = vmax.f32 %v386_v57, 0.0  ;;  %v316_v3 = vmul.f32 %v658_v8, %v240_v53  ;;  %v387_v4 = vadd.f32 %v656_v7, %v311_v60  ;;  %v388_v5 = vadd.f32 %v660_v9, %v312_v61 }
  0x3e   : > { %513 = vst [vmem:[%s683_s25 + $0x1b0] sm:$0xff] %v449_v59  ;;  %v389_v10 = vadd.f32 %v656_v7, %v313_v62  ;;  %v317_v11 = vmul.f32 %v654_v6, %v241_v58  ;;  %v390_v12 = vadd.f32 %v660_v9, %v314_v1  ;;  %v391_v13 = vadd.f32 %v656_v7, %v315_v2 }
  0x3f   : > { %514 = vst [vmem:[%s683_s25 + $0x1b8] sm:$0xff] %v450_v0  ;;  %v392_v14 = vadd.f32 %v660_v9, %v316_v3  ;;  %v318_v15 = vmul.f32 %v658_v8, %v242_v63  ;;  %v451_v16 = vmax.f32 %v387_v4, 0.0  ;;  %v452_v17 = vmax.f32 %v388_v5, 0.0 }
  0x40   : > { %v453_v18 = vmax.f32 %v389_v10, 0.0  ;;  %v393_v6 = vadd.f32 %v656_v7, %v317_v11  ;;  %v454_v19 = vmax.f32 %v390_v12, 0.0  ;;  %v455_v20 = vmax.f32 %v391_v13, 0.0 }
  0x41   : > { %v456_v21 = vmax.f32 %v392_v14, 0.0  ;;  %v394_v22 = vadd.f32 %v660_v9, %v318_v15  ;;  %515 = vst [vmem:[%s683_s25 + $0x1c0] sm:$0xff] %v451_v16  ;;  %516 = vst [vmem:[%s683_s25 + $0x1c8] sm:$0xff] %v452_v17 }
  0x42   : > { %517 = vst [vmem:[%s683_s25 + $0x1d0] sm:$0xff] %v453_v18  ;;  %v457_v23 = vmax.f32 %v393_v6, 0.0  ;;  %518 = vst [vmem:[%s683_s25 + $0x1d8] sm:$0xff] %v454_v19 }
  0x43   : > { %519 = vst [vmem:[%s683_s25 + $0x1e0] sm:$0xff] %v455_v20  ;;  %520 = vst [vmem:[%s683_s25 + $0x1e8] sm:$0xff] %v456_v21  ;;  %v458_v8 = vmax.f32 %v394_v22, 0.0 }
  0x44   : > { %521 = vst [vmem:[%s683_s25 + $0x1f0] sm:$0xff] %v457_v23 }
  0x45   : > { %522 = vst [vmem:[%s683_s25 + $0x1f8] sm:$0xff] %v458_v8 }
  0x46 PF: > { %s13_s12 = sadd.s32 1, %s610_s12  }
  0x47   : > { %p10_p4 = scmp.ge.s32.totalorder %s13_s12, 4  }
  0x49   :  { %12 = sbr.rel (!%p10_p4) target bundleno = 1 (0x1), region = 62 }

// kernel: resize_forward.36
= control target key start
LH: loop header
LB: loop body
LE: loop exit
PB: predicated region body
PF: predicated region fallthrough
CT: control target
= control target key end

     0   :  { %s1196_s15 = smov 0   ;;  %s1538_s0 = inlined_call_operand.vmem [shape: bf16[512,256], index: 0, kind: input, shape index: {}]   ;;  %s1539_s1 = inlined_call_operand.vmem [shape: bf16[256,128], index: 1, kind: input, shape index: {}]   ;;  %s1540_s2 = inlined_call_operand.vmem [shape: f32[512,128], index: 2, kind: output, shape index: {0}]   ;;  %s1541_s3 = inlined_call_operand.vmem [shape: f32[1,128], index: 3, kind: output, shape index: {1}]   ;;  %s1542_s4 = inlined_call_operand.vmem [shape: f32[1,128], index: 4, kind: output, shape index: {2}]  }
   0x1 LB: > { %s899_s16 = sadd.s32 4294967295, %s1168_s15   ;;  %p903_p0 = scmp.ge.s32.totalorder %s1168_s15, 1  ;;  %s1168_s15 = sphi %s1196_s15, %s15_s15  }
   0x2   : > { %p159_p1 = scmp.lt.s32.totalorder %s1168_s15, 3 }
   0x4   : > { %p160_p2 = pnand %p903_p0, %p159_p1 }
   0x5   : > { %v1098_v0 = vld [vmem:[%s1539_s1 + $0x40] sm:$0xff] (!%p160_p2)   ;;  %s904_s19 = sshll.u32 (!%p160_p2), %s899_s16, 5  ;;  %v1100_v2 = vld [vmem:[%s1539_s1 + $0x48] sm:$0xff] (!%p160_p2)   ;;  %v1102_v4 = vld [vmem:[%s1539_s1 + $0x50] sm:$0xff] (!%p160_p2)   ;;  %p957_p4 = scmp.ne.s32.totalorder (!%p160_p2), %s899_s16, 0 }
   0x6   : > { %163 = sbr.rel (%p160_p2) target bundleno = 391 (0x187), region = 28  ;;  %v1099_v1 = vld [vmem:[%s1539_s1] sm:$0xff] (!%p160_p2)   ;;  %961 = vmatprep.subr.bf16.mxu0 (!%p160_p2), %v1098_v0  ;;  %1073 = vmatprep.subr.bf16.mxu1 (!%p160_p2), %v1098_v0  ;;  %v1101_v3 = vld [vmem:[%s1539_s1 + $0x8] sm:$0xff] (!%p160_p2)   ;;  %p187_p3 = scmp.lt.s32.totalorder (!%p160_p2), %s904_s19, 63  ;;  %v1103_v5 = vld [vmem:[%s1539_s1 + $0x10] sm:$0xff] (!%p160_p2)  }
   0x7   : > { %962 = vmatpush3.bf16.msra.mxu0 (!%p160_p2), %v1099_v1  ;;  %1081 = vmatpush3.bf16.msra.mxu1 (!%p160_p2), %v1099_v1  ;;  %v1104_v6 = vld [vmem:[%s1539_s1 + $0x58] sm:$0xff] (!%p160_p2)   ;;  %v1106_v8 = vld [vmem:[%s1539_s1 + $0x60] sm:$0xff] (!%p160_p2)   ;;  %v1108_v10 = vld [vmem:[%s1539_s1 + $0x68] sm:$0xff] (!%p160_p2)  }
   0x8   : > { %963 = vmatprep.subr.bf16.mxu0 (!%p160_p2), %v1100_v2  ;;  %1074 = vmatprep.subr.bf16.mxu1 (!%p160_p2), %v1100_v2  ;;  %v1105_v7 = vld [vmem:[%s1539_s1 + $0x18] sm:$0xff] (!%p160_p2)   ;;  %v1107_v9 = vld [vmem:[%s1539_s1 + $0x20] sm:$0xff] (!%p160_p2)   ;;  %v1109_v13 = vld [vmem:[%s1539_s1 + $0x28] sm:$0xff] (!%p160_p2)  }
   0x9   : > { %v1110_v14 = vld [vmem:[%s1539_s1 + $0x70] sm:$0xff] (!%p160_p2)   ;;  %v1112_v16 = vld [vmem:[%s1539_s1 + $0x78] sm:$0xff] (!%p160_p2)  }
   0xa   : > { %v1111_v15 = vld [vmem:[%s1539_s1 + $0x30] sm:$0xff] (!%p160_p2)   ;;  %v1113_v17 = vld [vmem:[%s1539_s1 + $0x38] sm:$0xff] (!%p160_p2)  }
   0xb   : > { %964 = vmatpush3.bf16.msra.mxu0 (!%p160_p2), %v1101_v3  ;;  %1082 = vmatpush3.bf16.msra.mxu1 (!%p160_p2), %v1101_v3 }
   0xc   : > { %965 = vmatprep.subr.bf16.mxu0 (!%p160_p2), %v1102_v4  ;;  %1075 = vmatprep.subr.bf16.mxu1 (!%p160_p2), %v1102_v4 }
   0xd   : > { %s1544_s19 = smov (!%p187_p3, %s904_s19), 63 }
   0xe   : > { %s960_s8 = sshll.u32 %s1544_s19, 3 }
   0xf   : > { %966 = vmatpush3.bf16.msra.mxu0 %v1103_v5  ;;  %1083 = vmatpush3.bf16.msra.mxu1 %v1103_v5  ;;  %s1241_s13 = scalar_lea.vmem %s1538_s0, %s960_s8  ;;  %s1301_s7 = scalar_lea.vmem %s1540_s2, %s960_s8 }
  0x10   : > { %967 = vmatprep.subr.bf16.mxu0 %v1104_v6  ;;  %1076 = vmatprep.subr.bf16.mxu1 %v1104_v6  ;;  %v1116_v11 = vld [vmem:[%s1241_s13 + $0x4] ss:$8 sps:$4 sm:$0xff]   ;;  %v1114_v18 = vld [vmem:[%s1241_s13] ss:$8 sps:$4 sm:$0xff]   ;;  %v1120_v20 = vld [vmem:[%s1241_s13 + $0x14] ss:$8 sps:$4 sm:$0xff]  }
  0x11   : > { %v1119_v12 = vld [vmem:[%s1241_s13 + $0x84] ss:$8 sps:$4 sm:$0xff]   ;;  %552 = vmatprep.mubr.bf16.mxu0 %v1116_v11  ;;  %v1117_v19 = vld [vmem:[%s1241_s13 + $0x80] ss:$8 sps:$4 sm:$0xff]   ;;  %v1122_v21 = vld [vmem:[%s1241_s13 + $0x94] ss:$8 sps:$4 sm:$0xff]  }
  0x12   : > { %616 = vmatprep.mubr.bf16.mxu1 %v1119_v12  ;;  %v1124_v22 = vld [vmem:[%s1241_s13 + $0x10] ss:$8 sps:$4 sm:$0xff]   ;;  %v1126_v24 = vld [vmem:[%s1241_s13 + $0x24] ss:$8 sps:$4 sm:$0xff]   ;;  %v1130_v26 = vld [vmem:[%s1241_s13 + $0x20] ss:$8 sps:$4 sm:$0xff]  }
  0x13   : > { %968 = vmatpush3.bf16.msra.mxu0 %v1105_v7  ;;  %1084 = vmatpush3.bf16.msra.mxu1 %v1105_v7  ;;  %v1125_v23 = vld [vmem:[%s1241_s13 + $0x90] ss:$8 sps:$4 sm:$0xff]   ;;  %v1128_v25 = vld [vmem:[%s1241_s13 + $0xa4] ss:$8 sps:$4 sm:$0xff]   ;;  %v1131_v27 = vld [vmem:[%s1241_s13 + $0xa0] ss:$8 sps:$4 sm:$0xff]  }
  0x14   : > { %969 = vmatprep.subr.bf16.mxu0 %v1106_v8  ;;  %1077 = vmatprep.subr.bf16.mxu1 %v1106_v8  ;;  %v1132_v28 = vld [vmem:[%s1241_s13 + $0x34] ss:$8 sps:$4 sm:$0xff]   ;;  %v1136_v30 = vld [vmem:[%s1241_s13 + $0x30] ss:$8 sps:$4 sm:$0xff]   ;;  %v1138_v32 = vld [vmem:[%s1241_s13 + $0x44] ss:$8 sps:$4 sm:$0xff]  }
  0x15   : > { %v1134_v29 = vld [vmem:[%s1241_s13 + $0xb4] ss:$8 sps:$4 sm:$0xff]   ;;  %v1137_v31 = vld [vmem:[%s1241_s13 + $0xb0] ss:$8 sps:$4 sm:$0xff]   ;;  %v1140_v33 = vld [vmem:[%s1241_s13 + $0xc4] ss:$8 sps:$4 sm:$0xff]  }
  0x16   : > { %v1142_v34 = vld [vmem:[%s1241_s13 + $0x40] ss:$8 sps:$4 sm:$0xff]   ;;  %v1144_v36 = vld [vmem:[%s1241_s13 + $0x54] ss:$8 sps:$4 sm:$0xff]   ;;  %v1148_v38 = vld [vmem:[%s1241_s13 + $0x50] ss:$8 sps:$4 sm:$0xff]  }
  0x17   : > { %970 = vmatpush3.bf16.msra.mxu0 %v1107_v9  ;;  %1085 = vmatpush3.bf16.msra.mxu1 %v1107_v9  ;;  %v1143_v35 = vld [vmem:[%s1241_s13 + $0xc0] ss:$8 sps:$4 sm:$0xff]   ;;  %v1146_v37 = vld [vmem:[%s1241_s13 + $0xd4] ss:$8 sps:$4 sm:$0xff]   ;;  %v1149_v39 = vld [vmem:[%s1241_s13 + $0xd0] ss:$8 sps:$4 sm:$0xff]  }
  0x18   : > { %971 = vmatprep.subr.bf16.mxu0 %v1108_v10  ;;  %1078 = vmatprep.subr.bf16.mxu1 %v1108_v10  ;;  %v1150_v40 = vld [vmem:[%s1241_s13 + $0x64] ss:$8 sps:$4 sm:$0xff]   ;;  %v1154_v42 = vld [vmem:[%s1241_s13 + $0x60] ss:$8 sps:$4 sm:$0xff]   ;;  %v1156_v44 = vld [vmem:[%s1241_s13 + $0x74] ss:$8 sps:$4 sm:$0xff]  }
  0x19   : > { %v1152_v41 = vld [vmem:[%s1241_s13 + $0xe4] ss:$8 sps:$4 sm:$0xff]   ;;  %v1155_v43 = vld [vmem:[%s1241_s13 + $0xe0] ss:$8 sps:$4 sm:$0xff]   ;;  %v1158_v45 = vld [vmem:[%s1241_s13 + $0xf4] ss:$8 sps:$4 sm:$0xff]  }
  0x1a   : > { %v1160_v46 = vld [vmem:[%s1241_s13 + $0x70] ss:$8 sps:$4 sm:$0xff]  }
  0x1b   : > { %972 = vmatpush3.bf16.msra.mxu0 %v1109_v13  ;;  %1086 = vmatpush3.bf16.msra.mxu1 %v1109_v13  ;;  %v1161_v47 = vld [vmem:[%s1241_s13 + $0xf0] ss:$8 sps:$4 sm:$0xff]  }
  0x1c   : > { %973 = vmatprep.subr.bf16.mxu0 %v1110_v14  ;;  %1079 = vmatprep.subr.bf16.mxu1 %v1110_v14 }
  0x1f   : > { %974 = vmatpush3.bf16.msra.mxu0 %v1111_v15  ;;  %1087 = vmatpush3.bf16.msra.mxu1 %v1111_v15 }
  0x20   : > { %975 = vmatprep.subr.bf16.mxu0 %v1112_v16  ;;  %1080 = vmatprep.subr.bf16.mxu1 %v1112_v16 }
  0x23   : > { %976 = vmatpush3.bf16.msra.mxu0 %v1113_v17  ;;  %1088 = vmatpush3.bf16.msra.mxu1 %v1113_v17 }
  0x26   : > { %553 = vmatmul.mubr.bf16.vlgmr.msra.gmra.mrb[0].mxu0 %v1114_v18  ;;  %617 = vmatmul.mubr.bf16.vlgmr.msra.gmra.mrb[0].mxu1 %v1117_v19 }
  0x27   : > { %560 = vmatprep.mubr.bf16.mxu0 %v1120_v20  ;;  %624 = vmatprep.mubr.bf16.mxu1 %v1122_v21 }
  0x2e   : > { %561 = vmatmul.mubr.bf16.gmra.mrb[4].mxu0 %v1124_v22  ;;  %625 = vmatmul.mubr.bf16.gmra.mrb[4].mxu1 %v1125_v23 }
  0x2f   : > { %568 = vmatprep.mubr.bf16.mxu0 %v1126_v24  ;;  %632 = vmatprep.mubr.bf16.mxu1 %v1128_v25 }
  0x36   : > { %569 = vmatmul.mubr.bf16.gmra.mrb[8].mxu0 %v1130_v26  ;;  %633 = vmatmul.mubr.bf16.gmra.mrb[8].mxu1 %v1131_v27 }
  0x37   : > { %576 = vmatprep.mubr.bf16.mxu0 %v1132_v28  ;;  %640 = vmatprep.mubr.bf16.mxu1 %v1134_v29 }
  0x3e   : > { %577 = vmatmul.mubr.bf16.gmra.mrb[12].mxu0 %v1136_v30  ;;  %641 = vmatmul.mubr.bf16.gmra.mrb[12].mxu1 %v1137_v31 }
  0x3f   : > { %584 = vmatprep.mubr.bf16.mxu0 %v1138_v32  ;;  %648 = vmatprep.mubr.bf16.mxu1 %v1140_v33 }
  0x46   : > { %585 = vmatmul.mubr.bf16.gmra.mrb[16].mxu0 %v1142_v34  ;;  %649 = vmatmul.mubr.bf16.gmra.mrb[16].mxu1 %v1143_v35 }
  0x47   : > { %592 = vmatprep.mubr.bf16.mxu0 %v1144_v36  ;;  %656 = vmatprep.mubr.bf16.mxu1 %v1146_v37 }
  0x4e   : > { %593 = vmatmul.mubr.bf16.gmra.mrb[20].mxu0 %v1148_v38  ;;  %657 = vmatmul.mubr.bf16.gmra.mrb[20].mxu1 %v1149_v39 }
  0x4f   : > { %600 = vmatprep.mubr.bf16.mxu0 %v1150_v40  ;;  %664 = vmatprep.mubr.bf16.mxu1 %v1152_v41 }
  0x56   : > { %601 = vmatmul.mubr.bf16.gmra.mrb[24].mxu0 %v1154_v42  ;;  %665 = vmatmul.mubr.bf16.gmra.mrb[24].mxu1 %v1155_v43 }
  0x57   : > { %608 = vmatprep.mubr.bf16.mxu0 %v1156_v44  ;;  %672 = vmatprep.mubr.bf16.mxu1 %v1158_v45 }
  0x5e   : > { %609 = vmatmul.mubr.bf16.gmra.mrb[28].mxu0 %v1160_v46  ;;  %673 = vmatmul.mubr.bf16.gmra.mrb[28].mxu1 %v1161_v47 }
  0xf9   : > { %v977_v48 = vpop.f32.mrb[0].mxu0  ;;  %v1025_v49 = vpop.f32.mrb[0].mxu1 }
  0xfa   : > { %v978_v50 = vpop.f32.mrb[1].mxu0  ;;  %v1026_v51 = vpop.f32.mrb[1].mxu1 }
  0xfb   : > { %v1303_v52 = vadd.f32 %v978_v50, %v977_v48  ;;  %v1305_v53 = vadd.f32 %v1026_v51, %v1025_v49  ;;  %v980_v54 = vpop.f32.mrb[2].mxu0  ;;  %v1028_v55 = vpop.f32.mrb[2].mxu1 }
  0xfc   : > { %v981_v56 = vpop.f32.mrb[3].mxu0  ;;  %v1029_v57 = vpop.f32.mrb[3].mxu1 }
  0xfd   : > { %681 = vst [vmem:[%s1301_s7] sm:$0xff] %v1303_v52  ;;  %697 = vst [vmem:[%s1301_s7 + $0x80] sm:$0xff] %v1305_v53  ;;  %v1311_v58 = vadd.f32 %v981_v56, %v980_v54  ;;  %v1313_v59 = vadd.f32 %v1029_v57, %v1028_v55 }
  0xff   : > { %682 = vst [vmem:[%s1301_s7 + $0x8] sm:$0xff] %v1311_v58  ;;  %698 = vst [vmem:[%s1301_s7 + $0x88] sm:$0xff] %v1313_v59 }
 0x101   : > { %v983_v60 = vpop.f32.mrb[4].mxu0  ;;  %v1031_v61 = vpop.f32.mrb[4].mxu1 }
 0x102   : > { %v984_v62 = vpop.f32.mrb[5].mxu0  ;;  %v1032_v63 = vpop.f32.mrb[5].mxu1 }
 0x103   : > { %v1319_v0 = vadd.f32 %v984_v62, %v983_v60  ;;  %v1321_v1 = vadd.f32 %v1032_v63, %v1031_v61  ;;  %v986_v2 = vpop.f32.mrb[6].mxu0  ;;  %v1034_v3 = vpop.f32.mrb[6].mxu1 }
 0x104   : > { %v987_v4 = vpop.f32.mrb[7].mxu0  ;;  %v1035_v5 = vpop.f32.mrb[7].mxu1 }
 0x105   : > { %683 = vst [vmem:[%s1301_s7 + $0x10] sm:$0xff] %v1319_v0  ;;  %699 = vst [vmem:[%s1301_s7 + $0x90] sm:$0xff] %v1321_v1  ;;  %v1327_v6 = vadd.f32 %v987_v4, %v986_v2  ;;  %v1329_v7 = vadd.f32 %v1035_v5, %v1034_v3 }
 0x107   : > { %684 = vst [vmem:[%s1301_s7 + $0x18] sm:$0xff] %v1327_v6  ;;  %700 = vst [vmem:[%s1301_s7 + $0x98] sm:$0xff] %v1329_v7 }
 0x109   : > { %v989_v8 = vpop.f32.mrb[8].mxu0  ;;  %v1037_v9 = vpop.f32.mrb[8].mxu1 }
 0x10a   : > { %v990_v10 = vpop.f32.mrb[9].mxu0  ;;  %v1038_v11 = vpop.f32.mrb[9].mxu1 }
 0x10b   : > { %v1335_v12 = vadd.f32 %v990_v10, %v989_v8  ;;  %v1337_v13 = vadd.f32 %v1038_v11, %v1037_v9  ;;  %v992_v14 = vpop.f32.mrb[10].mxu0  ;;  %v1040_v15 = vpop.f32.mrb[10].mxu1 }
 0x10c   : > { %v993_v16 = vpop.f32.mrb[11].mxu0  ;;  %v1041_v17 = vpop.f32.mrb[11].mxu1 }
 0x10d   : > { %685 = vst [vmem:[%s1301_s7 + $0x20] sm:$0xff] %v1335_v12  ;;  %701 = vst [vmem:[%s1301_s7 + $0xa0] sm:$0xff] %v1337_v13  ;;  %v1343_v18 = vadd.f32 %v993_v16, %v992_v14  ;;  %v1345_v19 = vadd.f32 %v1041_v17, %v1040_v15 }
 0x10f   : > { %686 = vst [vmem:[%s1301_s7 + $0x28] sm:$0xff] %v1343_v18  ;;  %702 = vst [vmem:[%s1301_s7 + $0xa8] sm:$0xff] %v1345_v19 }
 0x111   : > { %v995_v20 = vpop.f32.mrb[12].mxu0  ;;  %v1043_v21 = vpop.f32.mrb[12].mxu1 }
 0x112   : > { %v996_v22 = vpop.f32.mrb[13].mxu0  ;;  %v1044_v23 = vpop.f32.mrb[13].mxu1 }
 0x113   : > { %v1351_v24 = vadd.f32 %v996_v22, %v995_v20  ;;  %v1353_v25 = vadd.f32 %v1044_v23, %v1043_v21  ;;  %v998_v26 = vpop.f32.mrb[14].mxu0  ;;  %v1046_v27 = vpop.f32.mrb[14].mxu1 }
 0x114   : > { %v999_v28 = vpop.f32.mrb[15].mxu0  ;;  %v1047_v29 = vpop.f32.mrb[15].mxu1 }
 0x115   : > { %687 = vst [vmem:[%s1301_s7 + $0x30] sm:$0xff] %v1351_v24  ;;  %703 = vst [vmem:[%s1301_s7 + $0xb0] sm:$0xff] %v1353_v25  ;;  %v1359_v30 = vadd.f32 %v999_v28, %v998_v26  ;;  %v1361_v31 = vadd.f32 %v1047_v29, %v1046_v27 }
 0x117   : > { %688 = vst [vmem:[%s1301_s7 + $0x38] sm:$0xff] %v1359_v30  ;;  %704 = vst [vmem:[%s1301_s7 + $0xb8] sm:$0xff] %v1361_v31 }
 0x119   : > { %v1001_v32 = vpop.f32.mrb[16].mxu0  ;;  %v1049_v33 = vpop.f32.mrb[16].mxu1 }
 0x11a   : > { %v1002_v34 = vpop.f32.mrb[17].mxu0  ;;  %v1050_v35 = vpop.f32.mrb[17].mxu1 }
 0x11b   : > { %v1367_v36 = vadd.f32 %v1002_v34, %v1001_v32  ;;  %v1369_v37 = vadd.f32 %v1050_v35, %v1049_v33  ;;  %v1004_v38 = vpop.f32.mrb[18].mxu0  ;;  %v1052_v39 = vpop.f32.mrb[18].mxu1  ;;  %v1170_v32 = vmov (!%p957_p4), 0.0  }
 0x11c   : > { %v1005_v40 = vpop.f32.mrb[19].mxu0  ;;  %v1053_v41 = vpop.f32.mrb[19].mxu1  ;;  %717 = vst [vmem:[%s1541_s3] sm:$0x1] (!%p957_p4), %v1170_v32  ;;  %718 = vst [vmem:[%s1542_s4] sm:$0x1] (!%p957_p4), %v1170_v32 }
 0x11d   : > { %689 = vst [vmem:[%s1301_s7 + $0x40] sm:$0xff] %v1367_v36  ;;  %705 = vst [vmem:[%s1301_s7 + $0xc0] sm:$0xff] %v1369_v37  ;;  %v1375_v42 = vadd.f32 %v1005_v40, %v1004_v38  ;;  %v1377_v43 = vadd.f32 %v1053_v41, %v1052_v39 }
 0x11f   : > { %690 = vst [vmem:[%s1301_s7 + $0x48] sm:$0xff] %v1375_v42  ;;  %706 = vst [vmem:[%s1301_s7 + $0xc8] sm:$0xff] %v1377_v43 }
 0x121   : > { %v1007_v44 = vpop.f32.mrb[20].mxu0  ;;  %v1055_v45 = vpop.f32.mrb[20].mxu1 }
 0x122   : > { %v1008_v46 = vpop.f32.mrb[21].mxu0  ;;  %v1056_v47 = vpop.f32.mrb[21].mxu1 }
 0x123   : > { %v1383_v48 = vadd.f32 %v1008_v46, %v1007_v44  ;;  %v1385_v49 = vadd.f32 %v1056_v47, %v1055_v45  ;;  %v1010_v50 = vpop.f32.mrb[22].mxu0  ;;  %v1058_v51 = vpop.f32.mrb[22].mxu1 }
 0x124   : > { %v1011_v54 = vpop.f32.mrb[23].mxu0  ;;  %v1059_v55 = vpop.f32.mrb[23].mxu1 }
 0x125   : > { %691 = vst [vmem:[%s1301_s7 + $0x50] sm:$0xff] %v1383_v48  ;;  %707 = vst [vmem:[%s1301_s7 + $0xd0] sm:$0xff] %v1385_v49  ;;  %v1391_v56 = vadd.f32 %v1011_v54, %v1010_v50  ;;  %v1393_v57 = vadd.f32 %v1059_v55, %v1058_v51 }
 0x127   : > { %692 = vst [vmem:[%s1301_s7 + $0x58] sm:$0xff] %v1391_v56  ;;  %708 = vst [vmem:[%s1301_s7 + $0xd8] sm:$0xff] %v1393_v57 }
 0x129   : > { %v1013_v60 = vpop.f32.mrb[24].mxu0  ;;  %v1061_v61 = vpop.f32.mrb[24].mxu1 }
 0x12a   : > { %v1014_v62 = vpop.f32.mrb[25].mxu0  ;;  %v1062_v63 = vpop.f32.mrb[25].mxu1 }
 0x12b   : > { %v1399_v2 = vadd.f32 %v1014_v62, %v1013_v60  ;;  %v1401_v3 = vadd.f32 %v1062_v63, %v1061_v61  ;;  %v1016_v4 = vpop.f32.mrb[26].mxu0  ;;  %v1064_v5 = vpop.f32.mrb[26].mxu1 }
 0x12c   : > { %v1017_v8 = vpop.f32.mrb[27].mxu0  ;;  %v1065_v9 = vpop.f32.mrb[27].mxu1 }
 0x12d   : > { %693 = vst [vmem:[%s1301_s7 + $0x60] sm:$0xff] %v1399_v2  ;;  %709 = vst [vmem:[%s1301_s7 + $0xe0] sm:$0xff] %v1401_v3  ;;  %v1407_v10 = vadd.f32 %v1017_v8, %v1016_v4  ;;  %v1409_v11 = vadd.f32 %v1065_v9, %v1064_v5 }
 0x12f   : > { %694 = vst [vmem:[%s1301_s7 + $0x68] sm:$0xff] %v1407_v10  ;;  %710 = vst [vmem:[%s1301_s7 + $0xe8] sm:$0xff] %v1409_v11 }
 0x131   : > { %v1019_v14 = vpop.f32.mrb[28].mxu0  ;;  %v1067_v15 = vpop.f32.mrb[28].mxu1  ;;  %716 = sbr.rel (%p957_p4) target bundleno = 312 (0x138), region = 32 }
 0x132   : > { %v1020_v16 = vpop.f32.mrb[29].mxu0  ;;  %v1068_v17 = vpop.f32.mrb[29].mxu1 }
 0x133   : > { %v1021_v20 = vadd.f32 %v1020_v16, %v1019_v14  ;;  %v1415_v21 = vadd.f32 %v1068_v17, %v1067_v15  ;;  %v1022_v22 = vpop.f32.mrb[30].mxu0  ;;  %v1070_v23 = vpop.f32.mrb[30].mxu1 }
 0x134   : > { %v1023_v26 = vpop.f32.mrb[31].mxu0  ;;  %v1071_v27 = vpop.f32.mrb[31].mxu1 }
 0x135   : > { %695 = vst [vmem:[%s1301_s7 + $0x70] sm:$0xff] %v1021_v20  ;;  %711 = vst [vmem:[%s1301_s7 + $0xf0] sm:$0xff] %v1415_v21  ;;  %v1024_v28 = vadd.f32 %v1023_v26, %v1022_v22  ;;  %v1420_v29 = vadd.f32 %v1071_v27, %v1070_v23 }
 0x137   : > { %696 = vst [vmem:[%s1301_s7 + $0x78] sm:$0xff] %v1024_v28  ;;  %712 = vst [vmem:[%s1301_s7 + $0xf8] sm:$0xff] %v1420_v29 }
 0x138 PF: > { %v720_v33 = vadd.f32 %v1311_v58, %v1303_v52  ;;  %v760_v38 = vmul.f32 %v1303_v52, %v1303_v52  ;;  %v761_v39 = vmul.f32 %v1311_v58, %v1311_v58  ;;  %v762_v41 = vmul.f32 %v1319_v0, %v1319_v0 }
 0x139   : > { %v763_v45 = vmul.f32 %v1327_v6, %v1327_v6  ;;  %v764_v50 = vmul.f32 %v1335_v12, %v1335_v12  ;;  %v765_v58 = vmul.f32 %v1343_v18, %v1343_v18  ;;  %v766_v55 = vmul.f32 %v1351_v24, %v1351_v24 }
 0x13a   : > { %v721_v34 = vadd.f32 %v1319_v0, %v720_v33  ;;  %v792_v46 = vadd.f32 %v761_v39, %v760_v38  ;;  %v767_v61 = vmul.f32 %v1359_v30, %v1359_v30  ;;  %v768_v63 = vmul.f32 %v1367_v36, %v1367_v36 }
 0x13b   : > { %v769_v5 = vmul.f32 %v1375_v42, %v1375_v42  ;;  %v770_v9 = vmul.f32 %v1383_v48, %v1383_v48  ;;  %v771_v15 = vmul.f32 %v1391_v56, %v1391_v56  ;;  %v772_v17 = vmul.f32 %v1399_v2, %v1399_v2 }
 0x13c   : > { %v722_v35 = vadd.f32 %v1327_v6, %v721_v34  ;;  %v793_v52 = vadd.f32 %v792_v46, %v762_v41  ;;  %v775_v34 = vmul.f32 %v1024_v28, %v1024_v28  ;;  %v776_v38 = vmul.f32 %v1305_v53, %v1305_v53 }
 0x13e   : > { %v723_v40 = vadd.f32 %v1335_v12, %v722_v35  ;;  %v794_v54 = vadd.f32 %v793_v52, %v763_v45  ;;  %v779_v45 = vmul.f32 %v1329_v7, %v1329_v7  ;;  %v781_v52 = vmul.f32 %v1345_v19, %v1345_v19 }
 0x140   : > { %v724_v44 = vadd.f32 %v1343_v18, %v723_v40  ;;  %v795_v60 = vadd.f32 %v794_v54, %v764_v50 }
 0x142   : > { %v725_v47 = vadd.f32 %v1351_v24, %v724_v44  ;;  %v796_v62 = vadd.f32 %v795_v60, %v765_v58  ;;  %v782_v58 = vmul.f32 %v1353_v25, %v1353_v25  ;;  %v784_v60 = vmul.f32 %v1369_v37, %v1369_v37 }
 0x144   : > { %v726_v51 = vadd.f32 %v1359_v30, %v725_v47  ;;  %v797_v4 = vadd.f32 %v796_v62, %v766_v55  ;;  %v780_v47 = vmul.f32 %v1337_v13, %v1337_v13 }
 0x146   : > { %v727_v0 = vadd.f32 %v1367_v36, %v726_v51  ;;  %v798_v8 = vadd.f32 %v797_v4, %v767_v61  ;;  %v785_v61 = vmul.f32 %v1377_v43, %v1377_v43  ;;  %v787_v4 = vmul.f32 %v1393_v57, %v1393_v57 }
 0x148   : > { %v728_v6 = vadd.f32 %v1375_v42, %v727_v0  ;;  %v799_v14 = vadd.f32 %v798_v8, %v768_v63  ;;  %v773_v42 = vmul.f32 %v1407_v10, %v1407_v10  ;;  %v783_v0 = vmul.f32 %v1361_v31, %v1361_v31 }
 0x14a   : > { %v729_v12 = vadd.f32 %v1383_v48, %v728_v6  ;;  %v800_v16 = vadd.f32 %v799_v14, %v769_v5  ;;  %v774_v48 = vmul.f32 %v1021_v20, %v1021_v20  ;;  %v788_v5 = vmul.f32 %v1401_v3, %v1401_v3 }
 0x14b   : > { %v790_v14 = vmul.f32 %v1415_v21, %v1415_v21 }
 0x14c   : > { %v730_v18 = vadd.f32 %v1391_v56, %v729_v12  ;;  %v801_v22 = vadd.f32 %v800_v16, %v770_v9  ;;  %v786_v12 = vmul.f32 %v1385_v49, %v1385_v49 }
 0x14e   : > { %v731_v24 = vadd.f32 %v1399_v2, %v730_v18  ;;  %v802_v26 = vadd.f32 %v801_v22, %v771_v15 }
 0x150   : > { %v732_v30 = vadd.f32 %v1407_v10, %v731_v24  ;;  %v803_v32 = vadd.f32 %v802_v26, %v772_v17  ;;  %v777_v10 = vmul.f32 %v1313_v59, %v1313_v59  ;;  %v789_v24 = vmul.f32 %v1409_v11, %v1409_v11 }
 0x152   : > { %v733_v36 = vadd.f32 %v1021_v20, %v732_v30  ;;  %v804_v35 = vadd.f32 %v803_v32, %v773_v42  ;;  %v778_v20 = vmul.f32 %v1321_v1, %v1321_v1 }
 0x154   : > { %v734_v23 = vadd.f32 %v1024_v28, %v733_v36  ;;  %v805_v2 = vadd.f32 %v804_v35, %v774_v48 }
 0x156   : > { %v735_v27 = vadd.f32 %v1305_v53, %v734_v23  ;;  %v806_v40 = vadd.f32 %v805_v2, %v775_v34 }
 0x158   : > { %v736_v33 = vadd.f32 %v1313_v59, %v735_v27  ;;  %v807_v44 = vadd.f32 %v806_v40, %v776_v38 }
 0x15a   : > { %v737_v56 = vadd.f32 %v1321_v1, %v736_v33  ;;  %v808_v46 = vadd.f32 %v807_v44, %v777_v10  ;;  %v759_v33 = vld [vmem:[%s1542_s4] sm:$0x1] }
 0x15c   : > { %v738_v39 = vadd.f32 %v1329_v7, %v737_v56  ;;  %v809_v50 = vadd.f32 %v808_v46, %v778_v20 }
 0x15e   : > { %v739_v41 = vadd.f32 %v1337_v13, %v738_v39  ;;  %v810_v51 = vadd.f32 %v809_v50, %v779_v45 }
 0x160   : > { %v740_v28 = vadd.f32 %v1345_v19, %v739_v41  ;;  %v811_v54 = vadd.f32 %v810_v51, %v780_v47 }
 0x162   : > { %v741_v53 = vadd.f32 %v1353_v25, %v740_v28  ;;  %v812_v55 = vadd.f32 %v811_v54, %v781_v52 }
 0x164   : > { %v742_v59 = vadd.f32 %v1361_v31, %v741_v53  ;;  %v813_v6 = vadd.f32 %v812_v55, %v782_v58 }
 0x166   : > { %v743_v1 = vadd.f32 %v1369_v37, %v742_v59  ;;  %v814_v62 = vadd.f32 %v813_v6, %v783_v0 }
 0x168   : > { %v744_v7 = vadd.f32 %v1377_v43, %v743_v1  ;;  %v815_v63 = vadd.f32 %v814_v62, %v784_v60 }
 0x16a   : > { %v745_v13 = vadd.f32 %v1385_v49, %v744_v7  ;;  %v816_v18 = vadd.f32 %v815_v63, %v785_v61 }
 0x16c   : > { %v746_v19 = vadd.f32 %v1393_v57, %v745_v13  ;;  %v817_v8 = vadd.f32 %v816_v18, %v786_v12  ;;  %v791_v57 = vmul.f32 %v1420_v29, %v1420_v29 }
 0x16e   : > { %v747_v25 = vadd.f32 %v1401_v3, %v746_v19  ;;  %v818_v9 = vadd.f32 %v817_v8, %v787_v4 }
 0x170   : > { %v748_v31 = vadd.f32 %v1409_v11, %v747_v25  ;;  %v819_v30 = vadd.f32 %v818_v9, %v788_v5  ;;  %v719_v11 = vld [vmem:[%s1541_s3] sm:$0x1] }
 0x172   : > { %v749_v37 = vadd.f32 %v1415_v21, %v748_v31  ;;  %v820_v16 = vadd.f32 %v819_v30, %v789_v24 }
 0x174   : > { %v750_v43 = vadd.f32 %v1420_v29, %v749_v37  ;;  %v821_v17 = vadd.f32 %v820_v16, %v790_v14 }
 0x176   : > { %v751_v49 = vrot.slane %v750_v43, 4  ;;  %v822_v22 = vadd.f32 %v821_v17, %v791_v57 }
 0x178   : > { %v752_v15 = vadd.f32 %v751_v49, %v750_v43  ;;  %v823_v42 = vrot.slane %v822_v22, 4 }
 0x17a   : > { %v753_v36 = vrot.slane %v752_v15, 2  ;;  %v824_v27 = vadd.f32 %v823_v42, %v822_v22 }
 0x17c   : > { %v754_v3 = vadd.f32 %v753_v36, %v752_v15  ;;  %v825_v21 = vrot.slane %v824_v27, 2 }
 0x17e   : > { %v755_v23 = vrot.slane %v754_v3, 1  ;;  %v826_v29 = vadd.f32 %v825_v21, %v824_v27 }
 0x180   : > { %v756_v26 = vadd.f32 %v755_v23, %v754_v3  ;;  %v827_v32 = vrot.slane %v826_v29, 1 }
 0x182   : > { %v757_v48 = vadd.f32 %v756_v26, %v719_v11  ;;  %v828_v34 = vadd.f32 %v827_v32, %v826_v29 }
 0x184   : > { %758 = vst [vmem:[%s1541_s3] sm:$0x1] %v757_v48  ;;  %v829_v35 = vadd.f32 %v828_v34, %v759_v33 }
 0x186   : > { %830 = vst [vmem:[%s1542_s4] sm:$0x1] %v829_v35 }
 0x187 PF: > { %s15_s15 = sadd.s32 1, %s1168_s15  }
 0x188   : > { %p12_p5 = scmp.ge.s32.totalorder %s15_s15, 4  }
 0x18a   :  { %14 = sbr.rel (!%p12_p5) target bundleno = 1 (0x1), region = 78 }

// kernel: resize_forward.37
= control target key start
LH: loop header
LB: loop body
LE: loop exit
PB: predicated region body
PF: predicated region fallthrough
CT: control target
= control target key end

     0   :  { %s453_s12 = smov 0   ;;  %s612_s0 = inlined_call_operand.vmem [shape: f32[512,128], index: 0, kind: input, shape index: {}]   ;;  %s613_s1 = inlined_call_operand.vmem [shape: f32[1,128], index: 1, kind: input, shape index: {}]   ;;  %s614_s2 = inlined_call_operand.vmem [shape: f32[1,128], index: 2, kind: input, shape index: {}]   ;;  %s615_s3 = inlined_call_operand.vmem [shape: f32[512,128], index: 3, kind: output, shape index: {}]  }
   0x1 LB: > { %s404_s13 = sadd.s32 4294967295, %s431_s12   ;;  %p408_p0 = scmp.ge.s32.totalorder %s431_s12, 1  ;;  %s431_s12 = sphi %s453_s12, %s13_s12  }
   0x2   : > { %p138_p1 = scmp.lt.s32.totalorder %s431_s12, 3 }
   0x4   : > { %p139_p2 = pnand %p408_p0, %p138_p1 }
   0x5   : > { %s409_s14 = sshll.u32 (!%p139_p2), %s404_s13, 5  ;;  %v464_v0 = vld [vmem:[%s613_s1] ss:$0 sm:$0xff] (!%p139_p2) }
   0x6   : > { %142 = sbr.rel (%p139_p2) target bundleno = 46 (0x2e), region = 32  ;;  %p163_p3 = scmp.lt.s32.totalorder (!%p139_p2), %s409_s14, 63  ;;  %v474_v1 = vld [vmem:[%s614_s2] ss:$0 sm:$0xff] (!%p139_p2) }
   0xd   : > { %s617_s14 = smov (!%p163_p3, %s409_s14), 63 }
   0xe   : > { %s410_s15 = sshll.u32 %s617_s14, 3 }
   0xf   : > { %s469_s20 = scalar_lea.vmem %s612_s0, %s410_s15  ;;  %s497_s25 = scalar_lea.vmem %s615_s3, %s410_s15 }
  0x10   : > { %v174_v2 = vld [vmem:[%s469_s20] sm:$0xff]  ;;  %v175_v3 = vld [vmem:[%s469_s20 + $0x8] sm:$0xff]  ;;  %v176_v4 = vld [vmem:[%s469_s20 + $0x10] sm:$0xff] }
  0x11   : > { %v213_v5 = vmul.f32 %v464_v0, %v174_v2  ;;  %v214_v6 = vmul.f32 %v464_v0, %v175_v3  ;;  %v215_v7 = vmul.f32 %v464_v0, %v176_v4  ;;  %v177_v8 = vld [vmem:[%s469_s20 + $0x18] sm:$0xff]  ;;  %v178_v9 = vld [vmem:[%s469_s20 + $0x20] sm:$0xff]  ;;  %v179_v10 = vld [vmem:[%s469_s20 + $0x28] sm:$0xff] }
  0x12   : > { %v216_v11 = vmul.f32 %v464_v0, %v177_v8  ;;  %v217_v12 = vmul.f32 %v464_v0, %v178_v9  ;;  %v218_v13 = vmul.f32 %v464_v0, %v179_v10  ;;  %v180_v14 = vld [vmem:[%s469_s20 + $0x30] sm:$0xff]  ;;  %v181_v15 = vld [vmem:[%s469_s20 + $0x38] sm:$0xff]  ;;  %v182_v24 = vld [vmem:[%s469_s20 + $0x40] sm:$0xff] }
  0x13   : > { %v252_v16 = vadd.f32 %v474_v1, %v213_v5  ;;  %v253_v17 = vadd.f32 %v474_v1, %v214_v6  ;;  %v254_v18 = vadd.f32 %v474_v1, %v215_v7  ;;  %v219_v19 = vmul.f32 %v464_v0, %v180_v14  ;;  %v183_v25 = vld [vmem:[%s469_s20 + $0x48] sm:$0xff]  ;;  %v184_v26 = vld [vmem:[%s469_s20 + $0x50] sm:$0xff]  ;;  %v185_v31 = vld [vmem:[%s469_s20 + $0x58] sm:$0xff] }
  0x14   : > { %v255_v20 = vadd.f32 %v474_v1, %v216_v11  ;;  %v256_v21 = vadd.f32 %v474_v1, %v217_v12  ;;  %v257_v22 = vadd.f32 %v474_v1, %v218_v13  ;;  %v220_v23 = vmul.f32 %v464_v0, %v181_v15  ;;  %v186_v32 = vld [vmem:[%s469_s20 + $0x60] sm:$0xff]  ;;  %v187_v33 = vld [vmem:[%s469_s20 + $0x68] sm:$0xff]  ;;  %v188_v38 = vld [vmem:[%s469_s20 + $0x70] sm:$0xff] }
  0x15   : > { %v284_v27 = vmax.f32 %v252_v16, 0.0  ;;  %v285_v28 = vmax.f32 %v253_v17, 0.0  ;;  %v286_v29 = vmax.f32 %v254_v18, 0.0  ;;  %v258_v30 = vadd.f32 %v474_v1, %v219_v19  ;;  %v189_v43 = vld [vmem:[%s469_s20 + $0x78] sm:$0xff]  ;;  %v190_v56 = vld [vmem:[%s469_s20 + $0x80] sm:$0xff]  ;;  %v191_v57 = vld [vmem:[%s469_s20 + $0x88] sm:$0xff] }
  0x16   : > { %v287_v34 = vmax.f32 %v255_v20, 0.0  ;;  %v288_v35 = vmax.f32 %v256_v21, 0.0  ;;  %v289_v36 = vmax.f32 %v257_v22, 0.0  ;;  %v259_v37 = vadd.f32 %v474_v1, %v220_v23  ;;  %v192_v58 = vld [vmem:[%s469_s20 + $0x90] sm:$0xff]  ;;  %v193_v63 = vld [vmem:[%s469_s20 + $0x98] sm:$0xff]  ;;  %v194_v2 = vld [vmem:[%s469_s20 + $0xa0] sm:$0xff] }
  0x17   : > { %316 = vst [vmem:[%s497_s25] sm:$0xff] %v284_v27  ;;  %317 = vst [vmem:[%s497_s25 + $0x8] sm:$0xff] %v285_v28  ;;  %v290_v39 = vmax.f32 %v258_v30, 0.0  ;;  %v221_v40 = vmul.f32 %v464_v0, %v182_v24  ;;  %v222_v41 = vmul.f32 %v464_v0, %v183_v25  ;;  %v223_v42 = vmul.f32 %v464_v0, %v184_v26  ;;  %v195_v3 = vld [vmem:[%s469_s20 + $0xa8] sm:$0xff]  ;;  %v196_v8 = vld [vmem:[%s469_s20 + $0xb0] sm:$0xff] }
  0x18   : > { %318 = vst [vmem:[%s497_s25 + $0x10] sm:$0xff] %v286_v29  ;;  %319 = vst [vmem:[%s497_s25 + $0x18] sm:$0xff] %v287_v34  ;;  %v291_v44 = vmax.f32 %v259_v37, 0.0  ;;  %v224_v45 = vmul.f32 %v464_v0, %v185_v31  ;;  %v225_v46 = vmul.f32 %v464_v0, %v186_v32  ;;  %v226_v47 = vmul.f32 %v464_v0, %v187_v33  ;;  %v197_v13 = vld [vmem:[%s469_s20 + $0xb8] sm:$0xff]  ;;  %v198_v26 = vld [vmem:[%s469_s20 + $0xc0] sm:$0xff] }
  0x19   : > { %320 = vst [vmem:[%s497_s25 + $0x20] sm:$0xff] %v288_v35  ;;  %321 = vst [vmem:[%s497_s25 + $0x28] sm:$0xff] %v289_v36  ;;  %v260_v48 = vadd.f32 %v474_v1, %v221_v40  ;;  %v261_v49 = vadd.f32 %v474_v1, %v222_v41  ;;  %v262_v50 = vadd.f32 %v474_v1, %v223_v42  ;;  %v199_v27 = vld [vmem:[%s469_s20 + $0xc8] sm:$0xff]  ;;  %v200_v28 = vld [vmem:[%s469_s20 + $0xd0] sm:$0xff] }
  0x1a   : > { %322 = vst [vmem:[%s497_s25 + $0x30] sm:$0xff] %v290_v39  ;;  %v227_v51 = vmul.f32 %v464_v0, %v188_v38  ;;  %323 = vst [vmem:[%s497_s25 + $0x38] sm:$0xff] %v291_v44  ;;  %v263_v52 = vadd.f32 %v474_v1, %v224_v45  ;;  %v264_v53 = vadd.f32 %v474_v1, %v225_v46  ;;  %v201_v33 = vld [vmem:[%s469_s20 + $0xd8] sm:$0xff]  ;;  %v202_v34 = vld [vmem:[%s469_s20 + $0xe0] sm:$0xff] }
  0x1b   : > { %v265_v54 = vadd.f32 %v474_v1, %v226_v47  ;;  %v228_v55 = vmul.f32 %v464_v0, %v189_v43  ;;  %v292_v59 = vmax.f32 %v260_v48, 0.0  ;;  %v293_v60 = vmax.f32 %v261_v49, 0.0  ;;  %v203_v35 = vld [vmem:[%s469_s20 + $0xe8] sm:$0xff]  ;;  %v204_v40 = vld [vmem:[%s469_s20 + $0xf0] sm:$0xff]  ;;  %v205_v45 = vld [vmem:[%s469_s20 + $0xf8] sm:$0xff] }
  0x1c   : > { %v294_v61 = vmax.f32 %v262_v50, 0.0  ;;  %v266_v62 = vadd.f32 %v474_v1, %v227_v51  ;;  %v295_v4 = vmax.f32 %v263_v52, 0.0  ;;  %v296_v5 = vmax.f32 %v264_v53, 0.0 }
  0x1d   : > { %v297_v6 = vmax.f32 %v265_v54, 0.0  ;;  %v267_v7 = vadd.f32 %v474_v1, %v228_v55  ;;  %324 = vst [vmem:[%s497_s25 + $0x40] sm:$0xff] %v292_v59  ;;  %325 = vst [vmem:[%s497_s25 + $0x48] sm:$0xff] %v293_v60  ;;  %v229_v10 = vmul.f32 %v464_v0, %v190_v56  ;;  %v230_v11 = vmul.f32 %v464_v0, %v191_v57 }
  0x1e   : > { %326 = vst [vmem:[%s497_s25 + $0x50] sm:$0xff] %v294_v61  ;;  %v298_v9 = vmax.f32 %v266_v62, 0.0  ;;  %v231_v12 = vmul.f32 %v464_v0, %v192_v58  ;;  %327 = vst [vmem:[%s497_s25 + $0x58] sm:$0xff] %v295_v4  ;;  %v232_v15 = vmul.f32 %v464_v0, %v193_v63  ;;  %v233_v16 = vmul.f32 %v464_v0, %v194_v2 }
  0x1f   : > { %328 = vst [vmem:[%s497_s25 + $0x60] sm:$0xff] %v296_v5  ;;  %329 = vst [vmem:[%s497_s25 + $0x68] sm:$0xff] %v297_v6  ;;  %v299_v14 = vmax.f32 %v267_v7, 0.0  ;;  %v234_v17 = vmul.f32 %v464_v0, %v195_v3  ;;  %v268_v18 = vadd.f32 %v474_v1, %v229_v10  ;;  %v269_v19 = vadd.f32 %v474_v1, %v230_v11 }
  0x20   : > { %330 = vst [vmem:[%s497_s25 + $0x70] sm:$0xff] %v298_v9  ;;  %v270_v20 = vadd.f32 %v474_v1, %v231_v12  ;;  %v235_v21 = vmul.f32 %v464_v0, %v196_v8  ;;  %v271_v22 = vadd.f32 %v474_v1, %v232_v15  ;;  %v272_v23 = vadd.f32 %v474_v1, %v233_v16 }
  0x21   : > { %331 = vst [vmem:[%s497_s25 + $0x78] sm:$0xff] %v299_v14  ;;  %v273_v24 = vadd.f32 %v474_v1, %v234_v17  ;;  %v236_v25 = vmul.f32 %v464_v0, %v197_v13  ;;  %v300_v29 = vmax.f32 %v268_v18, 0.0  ;;  %v301_v30 = vmax.f32 %v269_v19, 0.0 }
  0x22   : > { %v302_v31 = vmax.f32 %v270_v20, 0.0  ;;  %v274_v32 = vadd.f32 %v474_v1, %v235_v21  ;;  %v303_v36 = vmax.f32 %v271_v22, 0.0  ;;  %v304_v37 = vmax.f32 %v272_v23, 0.0 }
  0x23   : > { %v305_v38 = vmax.f32 %v273_v24, 0.0  ;;  %v275_v39 = vadd.f32 %v474_v1, %v236_v25  ;;  %332 = vst [vmem:[%s497_s25 + $0x80] sm:$0xff] %v300_v29  ;;  %333 = vst [vmem:[%s497_s25 + $0x88] sm:$0xff] %v301_v30  ;;  %v237_v42 = vmul.f32 %v464_v0, %v198_v26  ;;  %v238_v43 = vmul.f32 %v464_v0, %v199_v27 }
  0x24   : > { %334 = vst [vmem:[%s497_s25 + $0x90] sm:$0xff] %v302_v31  ;;  %v306_v41 = vmax.f32 %v274_v32, 0.0  ;;  %v239_v44 = vmul.f32 %v464_v0, %v200_v28  ;;  %335 = vst [vmem:[%s497_s25 + $0x98] sm:$0xff] %v303_v36  ;;  %v240_v47 = vmul.f32 %v464_v0, %v201_v33  ;;  %v241_v48 = vmul.f32 %v464_v0, %v202_v34 }
  0x25   : > { %336 = vst [vmem:[%s497_s25 + $0xa0] sm:$0xff] %v304_v37  ;;  %337 = vst [vmem:[%s497_s25 + $0xa8] sm:$0xff] %v305_v38  ;;  %v307_v46 = vmax.f32 %v275_v39, 0.0  ;;  %v242_v49 = vmul.f32 %v464_v0, %v203_v35  ;;  %v276_v50 = vadd.f32 %v474_v1, %v237_v42  ;;  %v277_v51 = vadd.f32 %v474_v1, %v238_v43 }
  0x26   : > { %338 = vst [vmem:[%s497_s25 + $0xb0] sm:$0xff] %v306_v41  ;;  %v278_v52 = vadd.f32 %v474_v1, %v239_v44  ;;  %v243_v53 = vmul.f32 %v464_v0, %v204_v40  ;;  %v279_v54 = vadd.f32 %v474_v1, %v240_v47  ;;  %v280_v55 = vadd.f32 %v474_v1, %v241_v48 }
  0x27   : > { %339 = vst [vmem:[%s497_s25 + $0xb8] sm:$0xff] %v307_v46  ;;  %v281_v56 = vadd.f32 %v474_v1, %v242_v49  ;;  %v244_v57 = vmul.f32 %v464_v0, %v205_v45  ;;  %v308_v58 = vmax.f32 %v276_v50, 0.0  ;;  %v309_v59 = vmax.f32 %v277_v51, 0.0 }
  0x28   : > { %v310_v60 = vmax.f32 %v278_v52, 0.0  ;;  %v282_v61 = vadd.f32 %v474_v1, %v243_v53  ;;  %v311_v62 = vmax.f32 %v279_v54, 0.0  ;;  %v312_v63 = vmax.f32 %v280_v55, 0.0 }
  0x29   : > { %v313_v2 = vmax.f32 %v281_v56, 0.0  ;;  %v283_v3 = vadd.f32 %v474_v1, %v244_v57  ;;  %340 = vst [vmem:[%s497_s25 + $0xc0] sm:$0xff] %v308_v58  ;;  %341 = vst [vmem:[%s497_s25 + $0xc8] sm:$0xff] %v309_v59 }
  0x2a   : > { %342 = vst [vmem:[%s497_s25 + $0xd0] sm:$0xff] %v310_v60  ;;  %v314_v4 = vmax.f32 %v282_v61, 0.0  ;;  %343 = vst [vmem:[%s497_s25 + $0xd8] sm:$0xff] %v311_v62 }
  0x2b   : > { %344 = vst [vmem:[%s497_s25 + $0xe0] sm:$0xff] %v312_v63  ;;  %345 = vst [vmem:[%s497_s25 + $0xe8] sm:$0xff] %v313_v2  ;;  %v315_v0 = vmax.f32 %v283_v3, 0.0 }
  0x2c   : > { %346 = vst [vmem:[%s497_s25 + $0xf0] sm:$0xff] %v314_v4 }
  0x2d   : > { %347 = vst [vmem:[%s497_s25 + $0xf8] sm:$0xff] %v315_v0 }
  0x2e PF: > { %s13_s12 = sadd.s32 1, %s431_s12  }
  0x2f   : > { %p10_p4 = scmp.ge.s32.totalorder %s13_s12, 4  }
  0x31   :  { %12 = sbr.rel (!%p10_p4) target bundleno = 1 (0x1), region = 62 }

// kernel: resize_forward.38
= control target key start
LH: loop header
LB: loop body
LE: loop exit
PB: predicated region body
PF: predicated region fallthrough
CT: control target
= control target key end

     0   :  { %s959_s15 = smov 0   ;;  %s1216_s0 = inlined_call_operand.vmem [shape: bf16[512,128], index: 0, kind: input, shape index: {}]   ;;  %s1217_s1 = inlined_call_operand.vmem [shape: bf16[128,128], index: 1, kind: input, shape index: {}]   ;;  %s1218_s2 = inlined_call_operand.vmem [shape: f32[512,128], index: 2, kind: output, shape index: {0}]   ;;  %s1219_s3 = inlined_call_operand.vmem [shape: f32[1,128], index: 3, kind: output, shape index: {1}]   ;;  %s1220_s4 = inlined_call_operand.vmem [shape: f32[1,128], index: 4, kind: output, shape index: {2}]  }
   0x1 LB: > { %s768_s16 = sadd.s32 4294967295, %s931_s15   ;;  %p772_p0 = scmp.ge.s32.totalorder %s931_s15, 1  ;;  %s931_s15 = sphi %s959_s15, %s15_s15  }
   0x2   : > { %p158_p1 = scmp.lt.s32.totalorder %s931_s15, 3 }
   0x4   : > { %p159_p2 = pnand %p772_p0, %p158_p1 }
   0x5   : > { %v901_v0 = vld [vmem:[%s1217_s1] sm:$0xff] (!%p159_p2)   ;;  %s773_s19 = sshll.u32 (!%p159_p2), %s768_s16, 5  ;;  %v902_v1 = vld [vmem:[%s1217_s1 + $0x8] sm:$0xff] (!%p159_p2)   ;;  %v903_v2 = vld [vmem:[%s1217_s1 + $0x10] sm:$0xff] (!%p159_p2)   ;;  %p801_p4 = scmp.ne.s32.totalorder (!%p159_p2), %s768_s16, 0 }
   0x6   : > { %162 = sbr.rel (%p159_p2) target bundleno = 357 (0x165), region = 28  ;;  %p185_p3 = scmp.lt.s32.totalorder (!%p159_p2), %s773_s19, 63  ;;  %828 = vmatprep.subr.bf16.mxu0 (!%p159_p2), %v901_v0  ;;  %876 = vmatprep.subr.bf16.mxu1 (!%p159_p2), %v901_v0  ;;  %v904_v3 = vld [vmem:[%s1217_s1 + $0x18] sm:$0xff] (!%p159_p2)   ;;  %v905_v6 = vld [vmem:[%s1217_s1 + $0x20] sm:$0xff] (!%p159_p2)   ;;  %v906_v7 = vld [vmem:[%s1217_s1 + $0x28] sm:$0xff] (!%p159_p2)  }
   0x7   : > { %829 = vmatpush3.bf16.msra.mxu0 (!%p159_p2), %v901_v0  ;;  %884 = vmatpush3.bf16.msra.mxu1 (!%p159_p2), %v901_v0  ;;  %v907_v8 = vld [vmem:[%s1217_s1 + $0x30] sm:$0xff] (!%p159_p2)   ;;  %v908_v9 = vld [vmem:[%s1217_s1 + $0x38] sm:$0xff] (!%p159_p2)  }
   0x8   : > { %830 = vmatprep.subr.bf16.mxu0 (!%p159_p2), %v902_v1  ;;  %877 = vmatprep.subr.bf16.mxu1 (!%p159_p2), %v902_v1 }
   0xb   : > { %831 = vmatpush3.bf16.msra.mxu0 (!%p159_p2), %v902_v1  ;;  %885 = vmatpush3.bf16.msra.mxu1 (!%p159_p2), %v902_v1 }
   0xc   : > { %832 = vmatprep.subr.bf16.mxu0 (!%p159_p2), %v903_v2  ;;  %878 = vmatprep.subr.bf16.mxu1 (!%p159_p2), %v903_v2 }
   0xd   : > { %s1222_s19 = smov (!%p185_p3, %s773_s19), 63  ;;  %v933_v56 = vmov (!%p801_p4), 0.0  }
   0xe   : > { %s774_s24 = sshll.u32 %s1222_s19, 2  ;;  %s776_s12 = sshll.u32 %s1222_s19, 3  ;;  %586 = vst [vmem:[%s1219_s3] sm:$0x1] (!%p801_p4), %v933_v56  ;;  %587 = vst [vmem:[%s1220_s4] sm:$0x1] (!%p801_p4), %v933_v56 }
   0xf   : > { %s984_s27 = scalar_lea.vmem %s1216_s0, %s774_s24  ;;  %833 = vmatpush3.bf16.msra.mxu0 %v903_v2  ;;  %886 = vmatpush3.bf16.msra.mxu1 %v903_v2  ;;  %s1021_s17 = scalar_lea.vmem %s1218_s2, %s776_s12 }
  0x10   : > { %v909_v4 = vld [vmem:[%s984_s27] sm:$0xff]   ;;  %834 = vmatprep.subr.bf16.mxu0 %v904_v3  ;;  %879 = vmatprep.subr.bf16.mxu1 %v904_v3  ;;  %v911_v10 = vld [vmem:[%s984_s27 + $0x8] sm:$0xff]   ;;  %v913_v12 = vld [vmem:[%s984_s27 + $0x10] sm:$0xff]  }
  0x11   : > { %v910_v5 = vld [vmem:[%s984_s27 + $0x40] sm:$0xff]   ;;  %844 = vmatprep.mubr.bf16.mxu0 %v909_v4  ;;  %v912_v11 = vld [vmem:[%s984_s27 + $0x48] sm:$0xff]   ;;  %v914_v13 = vld [vmem:[%s984_s27 + $0x50] sm:$0xff]  }
  0x12   : > { %860 = vmatprep.mubr.bf16.mxu1 %v910_v5  ;;  %v915_v14 = vld [vmem:[%s984_s27 + $0x18] sm:$0xff]   ;;  %v917_v16 = vld [vmem:[%s984_s27 + $0x20] sm:$0xff]   ;;  %v919_v18 = vld [vmem:[%s984_s27 + $0x28] sm:$0xff]  }
  0x13   : > { %835 = vmatpush3.bf16.msra.mxu0 %v904_v3  ;;  %887 = vmatpush3.bf16.msra.mxu1 %v904_v3  ;;  %v916_v15 = vld [vmem:[%s984_s27 + $0x58] sm:$0xff]   ;;  %v918_v17 = vld [vmem:[%s984_s27 + $0x60] sm:$0xff]   ;;  %v920_v19 = vld [vmem:[%s984_s27 + $0x68] sm:$0xff]  }
  0x14   : > { %836 = vmatprep.subr.bf16.mxu0 %v905_v6  ;;  %880 = vmatprep.subr.bf16.mxu1 %v905_v6  ;;  %v921_v20 = vld [vmem:[%s984_s27 + $0x30] sm:$0xff]   ;;  %v923_v22 = vld [vmem:[%s984_s27 + $0x38] sm:$0xff]  }
  0x15   : > { %v922_v21 = vld [vmem:[%s984_s27 + $0x70] sm:$0xff]   ;;  %v924_v23 = vld [vmem:[%s984_s27 + $0x78] sm:$0xff]  }
  0x17   : > { %837 = vmatpush3.bf16.msra.mxu0 %v905_v6  ;;  %888 = vmatpush3.bf16.msra.mxu1 %v905_v6 }
  0x18   : > { %838 = vmatprep.subr.bf16.mxu0 %v906_v7  ;;  %881 = vmatprep.subr.bf16.mxu1 %v906_v7 }
  0x1b   : > { %839 = vmatpush3.bf16.msra.mxu0 %v906_v7  ;;  %889 = vmatpush3.bf16.msra.mxu1 %v906_v7 }
  0x1c   : > { %840 = vmatprep.subr.bf16.mxu0 %v907_v8  ;;  %882 = vmatprep.subr.bf16.mxu1 %v907_v8 }
  0x1f   : > { %841 = vmatpush3.bf16.msra.mxu0 %v907_v8  ;;  %890 = vmatpush3.bf16.msra.mxu1 %v907_v8 }
  0x20   : > { %842 = vmatprep.subr.bf16.mxu0 %v908_v9  ;;  %883 = vmatprep.subr.bf16.mxu1 %v908_v9 }
  0x23   : > { %843 = vmatpush3.bf16.msra.mxu0 %v908_v9  ;;  %891 = vmatpush3.bf16.msra.mxu1 %v908_v9 }
  0x26   : > { %845 = vmatmul.mubr.bf16.vlgmr.msra.gmra.mrb[0].mxu0 %v911_v10  ;;  %861 = vmatmul.mubr.bf16.vlgmr.msra.gmra.mrb[0].mxu1 %v912_v11 }
  0x27   : > { %848 = vmatprep.mubr.bf16.mxu0 %v913_v12  ;;  %864 = vmatprep.mubr.bf16.mxu1 %v914_v13 }
  0x2e   : > { %849 = vmatmul.mubr.bf16.gmra.mrb[4].mxu0 %v915_v14  ;;  %865 = vmatmul.mubr.bf16.gmra.mrb[4].mxu1 %v916_v15 }
  0x2f   : > { %852 = vmatprep.mubr.bf16.mxu0 %v917_v16  ;;  %868 = vmatprep.mubr.bf16.mxu1 %v918_v17 }
  0x36   : > { %853 = vmatmul.mubr.bf16.gmra.mrb[8].mxu0 %v919_v18  ;;  %869 = vmatmul.mubr.bf16.gmra.mrb[8].mxu1 %v920_v19 }
  0x37   : > { %856 = vmatprep.mubr.bf16.mxu0 %v921_v20  ;;  %872 = vmatprep.mubr.bf16.mxu1 %v922_v21 }
  0x3e   : > { %857 = vmatmul.mubr.bf16.gmra.mrb[12].mxu0 %v923_v22  ;;  %873 = vmatmul.mubr.bf16.gmra.mrb[12].mxu1 %v924_v23 }
  0xf9   : > { %v1023_v24 = vpop.f32.mrb[0].mxu0  ;;  %v1025_v25 = vpop.f32.mrb[0].mxu1 }
  0xfa   : > { %552 = vst [vmem:[%s1021_s17 + $0x10] sm:$0xff] %v1023_v24  ;;  %568 = vst [vmem:[%s1021_s17 + $0x90] sm:$0xff] %v1025_v25  ;;  %v1031_v26 = vpop.f32.mrb[1].mxu0  ;;  %v1033_v27 = vpop.f32.mrb[1].mxu1 }
  0xfb   : > { %550 = vst [vmem:[%s1021_s17] sm:$0xff] %v1031_v26  ;;  %566 = vst [vmem:[%s1021_s17 + $0x80] sm:$0xff] %v1033_v27  ;;  %v1039_v28 = vpop.f32.mrb[2].mxu0  ;;  %v1041_v29 = vpop.f32.mrb[2].mxu1 }
  0xfc   : > { %553 = vst [vmem:[%s1021_s17 + $0x18] sm:$0xff] %v1039_v28  ;;  %569 = vst [vmem:[%s1021_s17 + $0x98] sm:$0xff] %v1041_v29  ;;  %v426_v30 = vpop.f32.mrb[3].mxu0  ;;  %v1047_v31 = vpop.f32.mrb[3].mxu1 }
  0xfd   : > { %551 = vst [vmem:[%s1021_s17 + $0x8] sm:$0xff] %v426_v30  ;;  %567 = vst [vmem:[%s1021_s17 + $0x88] sm:$0xff] %v1047_v31 }
 0x101   : > { %v1052_v32 = vpop.f32.mrb[4].mxu0  ;;  %v1054_v33 = vpop.f32.mrb[4].mxu1 }
 0x102   : > { %556 = vst [vmem:[%s1021_s17 + $0x30] sm:$0xff] %v1052_v32  ;;  %572 = vst [vmem:[%s1021_s17 + $0xb0] sm:$0xff] %v1054_v33  ;;  %v439_v34 = vpop.f32.mrb[5].mxu0  ;;  %v1060_v35 = vpop.f32.mrb[5].mxu1 }
 0x103   : > { %554 = vst [vmem:[%s1021_s17 + $0x20] sm:$0xff] %v439_v34  ;;  %570 = vst [vmem:[%s1021_s17 + $0xa0] sm:$0xff] %v1060_v35  ;;  %v1065_v36 = vpop.f32.mrb[6].mxu0  ;;  %v1067_v37 = vpop.f32.mrb[6].mxu1 }
 0x104   : > { %557 = vst [vmem:[%s1021_s17 + $0x38] sm:$0xff] %v1065_v36  ;;  %573 = vst [vmem:[%s1021_s17 + $0xb8] sm:$0xff] %v1067_v37  ;;  %v442_v38 = vpop.f32.mrb[7].mxu0  ;;  %v1073_v39 = vpop.f32.mrb[7].mxu1 }
 0x105   : > { %555 = vst [vmem:[%s1021_s17 + $0x28] sm:$0xff] %v442_v38  ;;  %571 = vst [vmem:[%s1021_s17 + $0xa8] sm:$0xff] %v1073_v39 }
 0x109   : > { %v1078_v40 = vpop.f32.mrb[8].mxu0  ;;  %v1080_v41 = vpop.f32.mrb[8].mxu1 }
 0x10a   : > { %560 = vst [vmem:[%s1021_s17 + $0x50] sm:$0xff] %v1078_v40  ;;  %576 = vst [vmem:[%s1021_s17 + $0xd0] sm:$0xff] %v1080_v41  ;;  %v455_v42 = vpop.f32.mrb[9].mxu0  ;;  %v1086_v43 = vpop.f32.mrb[9].mxu1 }
 0x10b   : > { %558 = vst [vmem:[%s1021_s17 + $0x40] sm:$0xff] %v455_v42  ;;  %574 = vst [vmem:[%s1021_s17 + $0xc0] sm:$0xff] %v1086_v43  ;;  %v855_v44 = vpop.f32.mrb[10].mxu0  ;;  %v1091_v45 = vpop.f32.mrb[10].mxu1 }
 0x10c   : > { %561 = vst [vmem:[%s1021_s17 + $0x58] sm:$0xff] %v855_v44  ;;  %577 = vst [vmem:[%s1021_s17 + $0xd8] sm:$0xff] %v1091_v45  ;;  %v458_v46 = vpop.f32.mrb[11].mxu0  ;;  %v1096_v47 = vpop.f32.mrb[11].mxu1 }
 0x10d   : > { %559 = vst [vmem:[%s1021_s17 + $0x48] sm:$0xff] %v458_v46  ;;  %575 = vst [vmem:[%s1021_s17 + $0xc8] sm:$0xff] %v1096_v47 }
 0x10f   : > { %585 = sbr.rel (%p801_p4) target bundleno = 278 (0x116), region = 32 }
 0x111   : > { %v1101_v48 = vpop.f32.mrb[12].mxu0  ;;  %v1103_v49 = vpop.f32.mrb[12].mxu1 }
 0x112   : > { %564 = vst [vmem:[%s1021_s17 + $0x70] sm:$0xff] %v1101_v48  ;;  %580 = vst [vmem:[%s1021_s17 + $0xf0] sm:$0xff] %v1103_v49  ;;  %v471_v50 = vpop.f32.mrb[13].mxu0  ;;  %v1109_v51 = vpop.f32.mrb[13].mxu1 }
 0x113   : > { %562 = vst [vmem:[%s1021_s17 + $0x60] sm:$0xff] %v471_v50  ;;  %578 = vst [vmem:[%s1021_s17 + $0xe0] sm:$0xff] %v1109_v51  ;;  %v859_v52 = vpop.f32.mrb[14].mxu0  ;;  %v1114_v53 = vpop.f32.mrb[14].mxu1 }
 0x114   : > { %565 = vst [vmem:[%s1021_s17 + $0x78] sm:$0xff] %v859_v52  ;;  %581 = vst [vmem:[%s1021_s17 + $0xf8] sm:$0xff] %v1114_v53  ;;  %v474_v54 = vpop.f32.mrb[15].mxu0  ;;  %v1119_v55 = vpop.f32.mrb[15].mxu1 }
 0x115   : > { %563 = vst [vmem:[%s1021_s17 + $0x68] sm:$0xff] %v474_v54  ;;  %579 = vst [vmem:[%s1021_s17 + $0xe8] sm:$0xff] %v1119_v55 }
 0x116 PF: > { %v589_v57 = vadd.f32 %v426_v30, %v1031_v26  ;;  %v629_v60 = vmul.f32 %v1031_v26, %v1031_v26  ;;  %v630_v61 = vmul.f32 %v426_v30, %v426_v30  ;;  %v631_v63 = vmul.f32 %v1023_v24, %v1023_v24 }
 0x117   : > { %v632_v1 = vmul.f32 %v1039_v28, %v1039_v28  ;;  %v633_v4 = vmul.f32 %v439_v34, %v439_v34  ;;  %v634_v7 = vmul.f32 %v442_v38, %v442_v38  ;;  %v635_v10 = vmul.f32 %v1052_v32, %v1052_v32 }
 0x118   : > { %v590_v58 = vadd.f32 %v1023_v24, %v589_v57  ;;  %v661_v2 = vadd.f32 %v630_v61, %v629_v60  ;;  %v636_v13 = vmul.f32 %v1065_v36, %v1065_v36  ;;  %v637_v16 = vmul.f32 %v455_v42, %v455_v42 }
 0x119   : > { %v638_v19 = vmul.f32 %v458_v46, %v458_v46  ;;  %v639_v22 = vmul.f32 %v1078_v40, %v1078_v40  ;;  %v640_v26 = vmul.f32 %v855_v44, %v855_v44  ;;  %v645_v60 = vmul.f32 %v1033_v27, %v1033_v27 }
 0x11a   : > { %v591_v59 = vadd.f32 %v1039_v28, %v590_v58  ;;  %v662_v5 = vadd.f32 %v661_v2, %v631_v63 }
 0x11c   : > { %v592_v62 = vadd.f32 %v591_v59, %v439_v34  ;;  %v663_v8 = vadd.f32 %v662_v5, %v632_v1  ;;  %v648_v1 = vmul.f32 %v1041_v29, %v1041_v29  ;;  %v650_v5 = vmul.f32 %v1073_v39, %v1073_v39 }
 0x11e   : > { %v593_v0 = vadd.f32 %v592_v62, %v442_v38  ;;  %v664_v11 = vadd.f32 %v663_v8, %v633_v4  ;;  %v642_v38 = vmul.f32 %v474_v54, %v474_v54 }
 0x120   : > { %v594_v3 = vadd.f32 %v1052_v32, %v593_v0  ;;  %v665_v14 = vadd.f32 %v664_v11, %v634_v7  ;;  %v641_v32 = vmul.f32 %v471_v50, %v471_v50  ;;  %v651_v7 = vmul.f32 %v1054_v33, %v1054_v33 }
 0x121   : > { %v653_v11 = vmul.f32 %v1086_v43, %v1086_v43 }
 0x122   : > { %v595_v6 = vadd.f32 %v1065_v36, %v594_v3  ;;  %v666_v17 = vadd.f32 %v665_v14, %v635_v10  ;;  %v649_v3 = vmul.f32 %v1060_v35, %v1060_v35 }
 0x124   : > { %v596_v9 = vadd.f32 %v595_v6, %v455_v42  ;;  %v667_v20 = vadd.f32 %v666_v17, %v636_v13  ;;  %v654_v13 = vmul.f32 %v1096_v47, %v1096_v47  ;;  %v656_v17 = vmul.f32 %v1091_v45, %v1091_v45 }
 0x126   : > { %v597_v12 = vadd.f32 %v596_v9, %v458_v46  ;;  %v668_v23 = vadd.f32 %v667_v20, %v637_v16  ;;  %v643_v46 = vmul.f32 %v1101_v48, %v1101_v48  ;;  %v652_v9 = vmul.f32 %v1067_v37, %v1067_v37 }
 0x128   : > { %v598_v15 = vadd.f32 %v1078_v40, %v597_v12  ;;  %v669_v28 = vadd.f32 %v668_v23, %v638_v19  ;;  %v644_v40 = vmul.f32 %v859_v52, %v859_v52  ;;  %v657_v19 = vmul.f32 %v1109_v51, %v1109_v51 }
 0x129   : > { %v659_v23 = vmul.f32 %v1103_v49, %v1103_v49 }
 0x12a   : > { %v599_v18 = vadd.f32 %v855_v44, %v598_v15  ;;  %v670_v34 = vadd.f32 %v669_v28, %v639_v22  ;;  %v655_v15 = vmul.f32 %v1080_v41, %v1080_v41 }
 0x12c   : > { %v600_v21 = vadd.f32 %v599_v18, %v471_v50  ;;  %v671_v56 = vadd.f32 %v670_v34, %v640_v26 }
 0x12e   : > { %v601_v24 = vadd.f32 %v600_v21, %v474_v54  ;;  %v672_v57 = vadd.f32 %v671_v56, %v641_v32  ;;  %v646_v54 = vmul.f32 %v1047_v31, %v1047_v31  ;;  %v658_v21 = vmul.f32 %v1119_v55, %v1119_v55 }
 0x130   : > { %v602_v30 = vadd.f32 %v1101_v48, %v601_v24  ;;  %v673_v59 = vadd.f32 %v672_v57, %v642_v38  ;;  %v647_v48 = vmul.f32 %v1025_v25, %v1025_v25 }
 0x132   : > { %v603_v36 = vadd.f32 %v859_v52, %v602_v30  ;;  %v674_v50 = vadd.f32 %v673_v59, %v643_v46 }
 0x134   : > { %v604_v42 = vadd.f32 %v603_v36, %v1033_v27  ;;  %v675_v62 = vadd.f32 %v674_v50, %v644_v40 }
 0x136   : > { %v605_v58 = vadd.f32 %v604_v42, %v1047_v31  ;;  %v676_v0 = vadd.f32 %v675_v62, %v645_v60 }
 0x138   : > { %v606_v44 = vadd.f32 %v1025_v25, %v605_v58  ;;  %v677_v2 = vadd.f32 %v676_v0, %v646_v54  ;;  %v628_v58 = vld [vmem:[%s1220_s4] sm:$0x1] }
 0x13a   : > { %v607_v61 = vadd.f32 %v1041_v29, %v606_v44  ;;  %v678_v4 = vadd.f32 %v677_v2, %v647_v48 }
 0x13c   : > { %v608_v63 = vadd.f32 %v607_v61, %v1060_v35  ;;  %v679_v6 = vadd.f32 %v678_v4, %v648_v1 }
 0x13e   : > { %v609_v52 = vadd.f32 %v608_v63, %v1073_v39  ;;  %v680_v8 = vadd.f32 %v679_v6, %v649_v3 }
 0x140   : > { %v610_v27 = vadd.f32 %v1054_v33, %v609_v52  ;;  %v681_v10 = vadd.f32 %v680_v8, %v650_v5 }
 0x142   : > { %v611_v31 = vadd.f32 %v1067_v37, %v610_v27  ;;  %v682_v12 = vadd.f32 %v681_v10, %v651_v7 }
 0x144   : > { %v612_v25 = vadd.f32 %v611_v31, %v1086_v43  ;;  %v683_v14 = vadd.f32 %v682_v12, %v652_v9 }
 0x146   : > { %v613_v29 = vadd.f32 %v612_v25, %v1096_v47  ;;  %v684_v16 = vadd.f32 %v683_v14, %v653_v11 }
 0x148   : > { %v614_v35 = vadd.f32 %v1080_v41, %v613_v29  ;;  %v685_v18 = vadd.f32 %v684_v16, %v654_v13 }
 0x14a   : > { %v615_v39 = vadd.f32 %v1091_v45, %v614_v35  ;;  %v686_v20 = vadd.f32 %v685_v18, %v655_v15  ;;  %v660_v45 = vmul.f32 %v1114_v53, %v1114_v53 }
 0x14c   : > { %v616_v33 = vadd.f32 %v615_v39, %v1109_v51  ;;  %v687_v22 = vadd.f32 %v686_v20, %v656_v17 }
 0x14e   : > { %v617_v37 = vadd.f32 %v616_v33, %v1119_v55  ;;  %v688_v24 = vadd.f32 %v687_v22, %v657_v19  ;;  %v588_v55 = vld [vmem:[%s1219_s3] sm:$0x1] }
 0x150   : > { %v618_v43 = vadd.f32 %v1103_v49, %v617_v37  ;;  %v689_v28 = vadd.f32 %v688_v24, %v658_v21 }
 0x152   : > { %v619_v47 = vadd.f32 %v1114_v53, %v618_v43  ;;  %v690_v32 = vadd.f32 %v689_v28, %v659_v23 }
 0x154   : > { %v620_v41 = vrot.slane %v619_v47, 4  ;;  %v691_v34 = vadd.f32 %v690_v32, %v660_v45 }
 0x156   : > { %v621_v26 = vadd.f32 %v620_v41, %v619_v47  ;;  %v692_v38 = vrot.slane %v691_v34, 4 }
 0x158   : > { %v622_v30 = vrot.slane %v621_v26, 2  ;;  %v693_v42 = vadd.f32 %v692_v38, %v691_v34 }
 0x15a   : > { %v623_v51 = vadd.f32 %v622_v30, %v621_v26  ;;  %v694_v49 = vrot.slane %v693_v42, 2 }
 0x15c   : > { %v624_v36 = vrot.slane %v623_v51, 1  ;;  %v695_v53 = vadd.f32 %v694_v49, %v693_v42 }
 0x15e   : > { %v625_v56 = vadd.f32 %v624_v36, %v623_v51  ;;  %v696_v57 = vrot.slane %v695_v53, 1 }
 0x160   : > { %v626_v46 = vadd.f32 %v625_v56, %v588_v55  ;;  %v697_v40 = vadd.f32 %v696_v57, %v695_v53 }
 0x162   : > { %627 = vst [vmem:[%s1219_s3] sm:$0x1] %v626_v46  ;;  %v698_v59 = vadd.f32 %v697_v40, %v628_v58 }
 0x164   : > { %699 = vst [vmem:[%s1220_s4] sm:$0x1] %v698_v59 }
 0x165 PF: > { %s15_s15 = sadd.s32 1, %s931_s15  }
 0x166   : > { %p12_p5 = scmp.ge.s32.totalorder %s15_s15, 4  }
 0x168   :  { %14 = sbr.rel (!%p12_p5) target bundleno = 1 (0x1), region = 78 }

</bundles_post_ra>
